<compile_context>
chip_gen: v6e
topology: v6e:2x2x1
jax: 0.10.0
libtpu: 0.0.40
codegen_flags: <defaults>
</compile_context>

<pallas_src>
import functools

import jax
import jax.numpy as jnp
from jax import lax
from jax.experimental import pallas as pl
from jax.experimental.pallas import tpu as pltpu

HPAD = 128      # lane-dense pad for every feature / hidden / cluster dimension
ROW_PAD = 256   # node count padded up to a multiple of this

_VMEM_SPEC = pl.BlockSpec(memory_space=pltpu.MemorySpace.VMEM)


# ---------------------------------------------------------------------------
# helpers
# ---------------------------------------------------------------------------

def _round_up(n, m):
    return ((n + m - 1) // m) * m


def _pad2(a, rows, cols):
    r, c = a.shape
    return jnp.pad(a, ((0, rows - r), (0, cols - c)))


def _pick_tile(n, candidates):
    """Largest candidate tile that divides n (n is pre-padded to 256)."""
    for t in candidates:
        if n % t == 0:
            return t
    return n


def prepare_adj(adj):
    """Pad the dense normalized adjacency to a multiple of ROW_PAD and cast to
    bf16.  adj is static across training steps, so do this ONCE outside jit."""
    n = adj.shape[0]
    npad = _round_up(n, ROW_PAD)
    return jnp.pad(adj, ((0, npad - n), (0, npad - n))).astype(jnp.bfloat16)


# ---------------------------------------------------------------------------
# Kernel 1: fused GNN chain (adj DMA'd by hand, resident in VMEM, loaded once)
# ---------------------------------------------------------------------------

def _fused_gcn_kernel(x_ref, w_ref, wcat_ref, adj_hbm,
                      z_ref, zc_ref, zhat_ref, zbf_ref,
                      adj_vmem, dma_sem):
    # Kick off the one-shot adj DMA, then overlap its latency with the
    # layer-0 feature transform (x @ W1 does not need adj).
    cp = pltpu.make_async_copy(adj_hbm, adj_vmem, dma_sem)
    cp.start()

    s0 = jnp.dot(x_ref[...], w_ref[0],
                 preferred_element_type=jnp.float32)          # (N, 128) f32

    cp.wait()
    adj = adj_vmem[...]                                       # (N, N) bf16

    def spmm(support_f32, relu):
        out = jnp.dot(adj, support_f32.astype(jnp.bfloat16),
                      preferred_element_type=jnp.float32)
        return jnp.maximum(out, 0.0) if relu else out

    def gnn(act_f32, layer, relu):
        s = jnp.dot(act_f32.astype(jnp.bfloat16), w_ref[layer],
                    preferred_element_type=jnp.float32)
        return spmm(s, relu)

    a = spmm(s0, True)          # encoder gnn_1 (relu)
    a = gnn(a, 1, True)         # encoder gnn_2 (relu)
    z = gnn(a, 2, False)        # encoder gnn_3 (no relu)

    # Fused cluster-head + decoder gnn_4: both consume z, so use one 256-wide
    # RHS [wc | w4] -> a single adj pass that fills the 256-wide MXU.
    s_cat = jnp.dot(z.astype(jnp.bfloat16), wcat_ref[...],
                    preferred_element_type=jnp.float32)       # (N, 256)
    out_cat = jnp.maximum(
        jnp.dot(adj, s_cat.astype(jnp.bfloat16),
                preferred_element_type=jnp.float32), 0.0)     # relu on both
    zc = out_cat[:, :HPAD]      # enc_cluster output (padded clusters are 0)
    d = out_cat[:, HPAD:]       # decoder gnn_4 output

    d = gnn(d, 3, True)         # decoder gnn_5 (relu)
    zh = gnn(d, 4, True)        # decoder gnn_6 (relu)

    z_ref[...] = z                              # lane-dense f32 stores
    zc_ref[...] = zc
    zhat_ref[...] = zh
    zbf_ref[...] = z.astype(jnp.bfloat16)       # bf16 z for the Gram kernel


def _fused_chain_call(x_bf, w_stack, w_cat, adj_bf):
    n = x_bf.shape[0]
    # VMEM-resident gate: adj must fit comfortably even on v7x (64 MiB VMEM).
    assert n * n * 2 <= 16 * 1024 * 1024, (
        "adj too large for the VMEM-resident fused path")
    # TODO(synk): add a k-striped (adj column blocks) fallback for larger N.
    width = 7 * HPAD  # five 128-wide adj passes + one 256-wide
    flops = 2 * n * n * width + 2 * n * HPAD * width
    bytes_acc = (n * n * 2 + n * HPAD * 2 + 7 * HPAD * HPAD * 2
                 + n * HPAD * (3 * 4 + 2))
    return pl.pallas_call(
        _fused_gcn_kernel,
        out_shape=(
            jax.ShapeDtypeStruct((n, HPAD), jnp.float32),    # z
            jax.ShapeDtypeStruct((n, HPAD), jnp.float32),    # z_cluster
            jax.ShapeDtypeStruct((n, HPAD), jnp.float32),    # z_hat
            jax.ShapeDtypeStruct((n, HPAD), jnp.bfloat16),   # z (bf16 copy)
        ),
        in_specs=[_VMEM_SPEC, _VMEM_SPEC, _VMEM_SPEC,
                  pl.BlockSpec(memory_space=pl.ANY)],        # adj: manual DMA
        out_specs=(_VMEM_SPEC, _VMEM_SPEC, _VMEM_SPEC, _VMEM_SPEC),
        scratch_shapes=[pltpu.VMEM((n, n), jnp.bfloat16),
                        pltpu.SemaphoreType.DMA(())],
        compiler_params=pltpu.CompilerParams(
            vmem_limit_bytes=40 * 1024 * 1024),
        cost_estimate=pl.CostEstimate(flops=flops, transcendentals=0,
                                      bytes_accessed=bytes_acc),
    )(x_bf, w_stack, w_cat, adj_bf)


# ---------------------------------------------------------------------------
# Kernel 2: tiled sigmoid Gram matrix  z_adj = sigmoid(z @ z.T)
# ---------------------------------------------------------------------------

def _sigmoid_gram_kernel(zr_ref, zc_ref, out_ref):
    # contract the feature dim of both operands -> no materialized transpose
    g = lax.dot_general(zr_ref[...], zc_ref[...],
                        dimension_numbers=(((1,), (1,)), ((), ())),
                        preferred_element_type=jnp.float32)
    out_ref[...] = jax.nn.sigmoid(g).astype(out_ref.dtype)


def sigmoid_gram(z_bf, out_dtype=jnp.bfloat16):
    n = z_bf.shape[0]
    # big asymmetric output tiles -> fewer grid steps, bigger writeback bursts;
    # double-buffered out block stays <= 16 MiB even for f32 output.
    tm = _pick_tile(n, (1024, 512, 256, 128))
    tn = _pick_tile(n, (2048, 1024, 512, 256, 128))
    osize = jnp.dtype(out_dtype).itemsize
    return pl.pallas_call(
        _sigmoid_gram_kernel,
        out_shape=jax.ShapeDtypeStruct((n, n), out_dtype),
        grid_spec=pltpu.PrefetchScalarGridSpec(
            num_scalar_prefetch=0,
            grid=(n // tm, n // tn),
            in_specs=[pl.BlockSpec((tm, HPAD), lambda i, j: (i, 0)),
                      pl.BlockSpec((tn, HPAD), lambda i, j: (j, 0))],
            out_specs=pl.BlockSpec((tm, tn), lambda i, j: (i, j))),
        compiler_params=pltpu.CompilerParams(
            dimension_semantics=("parallel", "parallel"),
            vmem_limit_bytes=40 * 1024 * 1024),
        cost_estimate=pl.CostEstimate(flops=2 * n * n * HPAD,
                                      transcendentals=n * n,
                                      bytes_accessed=2 * n * HPAD * 2
                                                     + n * n * osize),
    )(z_bf, z_bf)


# ---------------------------------------------------------------------------
# Kernel 3: Student's-t soft assignment q (row-tiled, lane-dense padded K)
# ---------------------------------------------------------------------------

def _cluster_q_kernel(z_ref, mu_ref, musq_ref, q_ref, *, v, k):
    z = z_ref[...]                                           # (tm, HPAD) f32
    mu = mu_ref[...]                                         # (KPAD, HPAD) f32
    z_sq = jnp.sum(z * z, axis=1, keepdims=True)             # (tm, 1)
    cross = lax.dot_general(z, mu, (((1,), (1,)), ((), ())),
                            preferred_element_type=jnp.float32)   # (tm, KPAD)
    # mu squared-norms are precomputed (1, KPAD) in the wrapper: no per-tile
    # XLU transpose here.
    dist = jnp.maximum(z_sq + musq_ref[...] - 2.0 * cross, 0.0)

    if v == 1.0:
        # exponent (v+1)/2 == 1: skip the pow; per-element rcp rides the EUP
        q = pl.reciprocal(1.0 + dist, approx=True)
    else:
        q = jnp.exp((-(v + 1.0) * 0.5) * jnp.log(1.0 + dist * (1.0 / v)))

    # zero the padded cluster columns, then EXACT row-normalization
    col = lax.broadcasted_iota(jnp.int32, q.shape, 1)
    q = jnp.where(col < k, q, 0.0)
    denom = jnp.sum(q, axis=1, keepdims=True)
    q_ref[...] = q / denom


def cluster_q(z_pad, mu, v, n_clusters):
    n = z_pad.shape[0]
    kpad = HPAD
    mu_pad = _pad2(mu, kpad, HPAD)
    mu_sq = jnp.sum(mu_pad * mu_pad, axis=1, keepdims=True).T     # (1, KPAD)
    tm = _pick_tile(n, (512, 256, 128))
    return pl.pallas_call(
        functools.partial(_cluster_q_kernel, v=float(v), k=int(n_clusters)),
        out_shape=jax.ShapeDtypeStruct((n, kpad), jnp.float32),
        grid_spec=pltpu.PrefetchScalarGridSpec(
            num_scalar_prefetch=0,
            grid=(n // tm,),
            in_specs=[pl.BlockSpec((tm, HPAD), lambda i: (i, 0)),
                      pl.BlockSpec((kpad, HPAD), lambda i: (0, 0)),
                      pl.BlockSpec((1, kpad), lambda i: (0, 0))],
            out_specs=pl.BlockSpec((tm, kpad), lambda i: (i, 0))),
        compiler_params=pltpu.CompilerParams(
            dimension_semantics=("parallel",)),
    )(z_pad, mu_pad, mu_sq)


# ---------------------------------------------------------------------------
# Parameter init (mirrors torch xavier_uniform_ / xavier_normal_)
# ---------------------------------------------------------------------------

def xavier_uniform(key, fan_in, fan_out):
    bound = jnp.sqrt(6.0 / (fan_in + fan_out))
    return jax.random.uniform(key, (fan_in, fan_out), jnp.float32, -bound, bound)


def xavier_normal(key, shape):
    fan_out, fan_in = shape
    std = jnp.sqrt(2.0 / (fan_in + fan_out))
    return std * jax.random.normal(key, shape, jnp.float32)


def init_gcn_params(key, enc1, enc2, enc3, dec1, dec2, dec3, n_input, n_clusters):
    ks = jax.random.split(key, 8)
    return {
        "w1": xavier_uniform(ks[0], n_input, enc1),      # encoder gnn_1
        "w2": xavier_uniform(ks[1], enc1, enc2),         # encoder gnn_2
        "w3": xavier_uniform(ks[2], enc2, enc3),         # encoder gnn_3
        "wc": xavier_uniform(ks[3], enc3, n_clusters),   # enc_cluster
        "w4": xavier_uniform(ks[4], dec1, dec2),         # decoder gnn_4
        "w5": xavier_uniform(ks[5], dec2, dec3),         # decoder gnn_5
        "w6": xavier_uniform(ks[6], dec3, n_input),      # decoder gnn_6
        "mu": xavier_normal(ks[7], (n_clusters, enc3)),  # cluster_layer
    }


# ---------------------------------------------------------------------------
# GCN forward (matches GCN.forward returning (z_hat, z_adj, z, z_cluster, q))
#   adj_bf must come from prepare_adj(adj) (padded, bf16, built once).
# ---------------------------------------------------------------------------

@functools.partial(jax.jit, static_argnames=("v",))
def gcn_forward(x, adj_bf, params, *, v):
    n, n_input = x.shape
    npad = adj_bf.shape[0]
    enc3 = params["w3"].shape[1]
    n_clusters = params["wc"].shape[1]

    # Lane-dense 128x128 weight stack (zero pad keeps the math exact) plus the
    # 256-wide concatenated [wc | w4] operand for the fused z-consumers.
    w_stack = jnp.stack([_pad2(params[nm], HPAD, HPAD)
                         for nm in ("w1", "w2", "w3", "w5", "w6")]
                        ).astype(jnp.bfloat16)
    w_cat = jnp.concatenate([_pad2(params["wc"], HPAD, HPAD),
                             _pad2(params["w4"], HPAD, HPAD)],
                            axis=1).astype(jnp.bfloat16)
    x_bf = _pad2(x, npad, HPAD).astype(jnp.bfloat16)

    # Single fused kernel: encoder + cluster head + decoder, adj loaded once.
    z_pad, zc_pad, zhat_pad, zbf_pad = _fused_chain_call(x_bf, w_stack, w_cat,
                                                         adj_bf)

    z = z_pad[:n, :enc3]
    z_cluster = zc_pad[:n, :n_clusters]
    z_hat = zhat_pad[:n, :n_input]

    # sigmoid(z @ z.T); bf16 output halves the N^2 HBM writeback.
    z_adj = sigmoid_gram(zbf_pad, out_dtype=jnp.bfloat16)[:n, :n]

    # Student's-t soft assignment.
    q = cluster_q(z_pad, params["mu"], v, n_clusters)[:n, :n_clusters]

    # NOTE: z_hat_adj / adj_hat of the PyTorch module are never returned ->
    # dead work, intentionally dropped.
    return z_hat, z_adj, z, z_cluster, q


# ---------------------------------------------------------------------------
# Demo
# ---------------------------------------------------------------------------

if __name__ == "__main__":
    key = jax.random.PRNGKey(0)
    k_x, k_a, k_p = jax.random.split(key, 3)

    N = 256         # number of graph nodes (small demo)
    n_input = 32    # raw feature dim
    enc1, enc2, enc3 = 32, 32, 16
    dec1, dec2, dec3 = 16, 32, 32   # gae_n_dec_1 must equal gae_n_enc_3
    n_clusters = 8
    v = 1.0

    x = jax.random.normal(k_x, (N, n_input), jnp.float32)

    # dense symmetric row-normalized adjacency with self loops
    a = jax.random.uniform(k_a, (N, N), jnp.float32)
    a = (a > 0.9).astype(jnp.float32)
    a = jnp.maximum(a, a.T) + jnp.eye(N, dtype=jnp.float32)
    adj = a / jnp.sum(a, axis=1, keepdims=True)

    params = init_gcn_params(k_p, enc1, enc2, enc3, dec1, dec2, dec3,
                             n_input, n_clusters)

    adj_bf = prepare_adj(adj)   # once, outside jit (adj is static per graph)

    z_hat, z_adj, z, z_cluster, q = gcn_forward(x, adj_bf, params, v=v)
    jax.block_until_ready((z_hat, z_adj, z, z_cluster, q))

    assert z_hat.shape == (N, n_input)
    assert z_adj.shape == (N, N)
    assert z.shape == (N, enc3)
    assert z_cluster.shape == (N, n_clusters)
    assert q.shape == (N, n_clusters)
    assert bool(jnp.all(jnp.isfinite(z_hat)))
    assert bool(jnp.all(jnp.isfinite(z_adj.astype(jnp.float32))))
    assert bool(jnp.all(jnp.isfinite(q)))
    # rows of q must sum to 1 (exact divide in the kernel)
    assert bool(jnp.all(jnp.abs(jnp.sum(q, axis=1) - 1.0) < 1e-3))

    print("KERNEL_OK")
</pallas_src>

<mosaic_0001>
module attributes {stable_mosaic.version = 11 : i64} {
  func.func @_fused_gcn_kernel(%arg0: memref<256x128xbf16, #tpu.memory_space<vmem>>, %arg1: memref<5x128x128xbf16, #tpu.memory_space<vmem>>, %arg2: memref<128x256xbf16, #tpu.memory_space<vmem>>, %arg3: memref<256x256xbf16, #tpu.memory_space<any>>, %arg4: memref<256x128xf32, #tpu.memory_space<vmem>>, %arg5: memref<256x128xf32, #tpu.memory_space<vmem>>, %arg6: memref<256x128xf32, #tpu.memory_space<vmem>>, %arg7: memref<256x128xbf16, #tpu.memory_space<vmem>>, %arg8: memref<256x256xbf16, #tpu.memory_space<vmem>>, %arg9: memref<!tpu.dma_semaphore, #tpu.memory_space<semaphore_mem>>) attributes {dimension_semantics = [], scalar_prefetch = 0 : i64, scratch_operands = 2 : i64, tpu.core_type = #tpu.core_type<tc>} {
    tpu.enqueue_dma source(%arg3 : memref<256x256xbf16, #tpu.memory_space<any>>) target(%arg8 : memref<256x256xbf16, #tpu.memory_space<vmem>>) target_semaphore(%arg9 : memref<!tpu.dma_semaphore, #tpu.memory_space<semaphore_mem>>)
    %c0 = arith.constant 0 : index
    %c0_0 = arith.constant 0 : index
    %0 = vector.load %arg0[%c0, %c0_0] : memref<256x128xbf16, #tpu.memory_space<vmem>>, vector<256x128xbf16>
    %c0_1 = arith.constant 0 : index
    %c0_2 = arith.constant 0 : index
    %c0_3 = arith.constant 0 : index
    %1 = vector.load %arg1[%c0_1, %c0_2, %c0_3] : memref<5x128x128xbf16, #tpu.memory_space<vmem>>, vector<1x128x128xbf16>
    %2 = vector.shape_cast %1 : vector<1x128x128xbf16> to vector<128x128xbf16>
    %cst = arith.constant dense<0.000000e+00> : vector<256x128xf32>
    %3 = tpu.matmul %0, %2, %cst {dimension_numbers = #tpu.dot_dimension_numbers<[1], [0], [0], [1], [0, 0, 1, 1], [], []>} : vector<256x128xbf16>, vector<128x128xbf16>, vector<256x128xf32> -> vector<256x128xf32>
    tpu.wait_dma2 semaphore(%arg9 : memref<!tpu.dma_semaphore, #tpu.memory_space<semaphore_mem>>) src(%arg3 : memref<256x256xbf16, #tpu.memory_space<any>>) dst(%arg8 : memref<256x256xbf16, #tpu.memory_space<vmem>>)
    %c0_4 = arith.constant 0 : index
    %c0_5 = arith.constant 0 : index
    %4 = vector.load %arg8[%c0_4, %c0_5] : memref<256x256xbf16, #tpu.memory_space<vmem>>, vector<256x256xbf16>
    %5 = arith.truncf %3 : vector<256x128xf32> to vector<256x128xbf16>
    %cst_6 = arith.constant dense<0.000000e+00> : vector<256x128xf32>
    %6 = tpu.matmul %4, %5, %cst_6 {dimension_numbers = #tpu.dot_dimension_numbers<[1], [0], [0], [1], [0, 0, 1, 1], [], []>} : vector<256x256xbf16>, vector<256x128xbf16>, vector<256x128xf32> -> vector<256x128xf32>
    %cst_7 = arith.constant 0.000000e+00 : f32
    %7 = vector.broadcast %cst_7 : f32 to vector<256x128xf32>
    %8 = arith.maximumf %6, %7 : vector<256x128xf32>
    %9 = arith.truncf %8 : vector<256x128xf32> to vector<256x128xbf16>
    %c1 = arith.constant 1 : index
    %c0_8 = arith.constant 0 : index
    %c0_9 = arith.constant 0 : index
    %10 = vector.load %arg1[%c1, %c0_8, %c0_9] : memref<5x128x128xbf16, #tpu.memory_space<vmem>>, vector<1x128x128xbf16>
    %11 = vector.shape_cast %10 : vector<1x128x128xbf16> to vector<128x128xbf16>
    %cst_10 = arith.constant dense<0.000000e+00> : vector<256x128xf32>
    %12 = tpu.matmul %9, %11, %cst_10 {dimension_numbers = #tpu.dot_dimension_numbers<[1], [0], [0], [1], [0, 0, 1, 1], [], []>} : vector<256x128xbf16>, vector<128x128xbf16>, vector<256x128xf32> -> vector<256x128xf32>
    %13 = arith.truncf %12 : vector<256x128xf32> to vector<256x128xbf16>
    %cst_11 = arith.constant dense<0.000000e+00> : vector<256x128xf32>
    %14 = tpu.matmul %4, %13, %cst_11 {dimension_numbers = #tpu.dot_dimension_numbers<[1], [0], [0], [1], [0, 0, 1, 1], [], []>} : vector<256x256xbf16>, vector<256x128xbf16>, vector<256x128xf32> -> vector<256x128xf32>
    %cst_12 = arith.constant 0.000000e+00 : f32
    %15 = vector.broadcast %cst_12 : f32 to vector<256x128xf32>
    %16 = arith.maximumf %14, %15 : vector<256x128xf32>
    %17 = arith.truncf %16 : vector<256x128xf32> to vector<256x128xbf16>
    %c2 = arith.constant 2 : index
    %c0_13 = arith.constant 0 : index
    %c0_14 = arith.constant 0 : index
    %18 = vector.load %arg1[%c2, %c0_13, %c0_14] : memref<5x128x128xbf16, #tpu.memory_space<vmem>>, vector<1x128x128xbf16>
    %19 = vector.shape_cast %18 : vector<1x128x128xbf16> to vector<128x128xbf16>
    %cst_15 = arith.constant dense<0.000000e+00> : vector<256x128xf32>
    %20 = tpu.matmul %17, %19, %cst_15 {dimension_numbers = #tpu.dot_dimension_numbers<[1], [0], [0], [1], [0, 0, 1, 1], [], []>} : vector<256x128xbf16>, vector<128x128xbf16>, vector<256x128xf32> -> vector<256x128xf32>
    %21 = arith.truncf %20 : vector<256x128xf32> to vector<256x128xbf16>
    %cst_16 = arith.constant dense<0.000000e+00> : vector<256x128xf32>
    %22 = tpu.matmul %4, %21, %cst_16 {dimension_numbers = #tpu.dot_dimension_numbers<[1], [0], [0], [1], [0, 0, 1, 1], [], []>} : vector<256x256xbf16>, vector<256x128xbf16>, vector<256x128xf32> -> vector<256x128xf32>
    %23 = arith.truncf %22 : vector<256x128xf32> to vector<256x128xbf16>
    %c0_17 = arith.constant 0 : index
    %c0_18 = arith.constant 0 : index
    %24 = vector.load %arg2[%c0_17, %c0_18] : memref<128x256xbf16, #tpu.memory_space<vmem>>, vector<128x256xbf16>
    %cst_19 = arith.constant dense<0.000000e+00> : vector<256x256xf32>
    %25 = tpu.matmul %23, %24, %cst_19 {dimension_numbers = #tpu.dot_dimension_numbers<[1], [0], [0], [1], [0, 0, 1, 1], [], []>} : vector<256x128xbf16>, vector<128x256xbf16>, vector<256x256xf32> -> vector<256x256xf32>
    %26 = arith.truncf %25 : vector<256x256xf32> to vector<256x256xbf16>
    %cst_20 = arith.constant dense<0.000000e+00> : vector<256x256xf32>
    %27 = tpu.matmul %4, %26, %cst_20 {dimension_numbers = #tpu.dot_dimension_numbers<[1], [0], [0], [1], [0, 0, 1, 1], [], []>} : vector<256x256xbf16>, vector<256x256xbf16>, vector<256x256xf32> -> vector<256x256xf32>
    %cst_21 = arith.constant 0.000000e+00 : f32
    %28 = vector.broadcast %cst_21 : f32 to vector<256x256xf32>
    %29 = arith.maximumf %27, %28 : vector<256x256xf32>
    %30 = vector.extract_strided_slice %29 {offsets = [0, 0], sizes = [256, 128], strides = [1, 1]} : vector<256x256xf32> to vector<256x128xf32>
    %31 = vector.extract_strided_slice %29 {offsets = [0, 128], sizes = [256, 128], strides = [1, 1]} : vector<256x256xf32> to vector<256x128xf32>
    %32 = arith.truncf %31 : vector<256x128xf32> to vector<256x128xbf16>
    %c3 = arith.constant 3 : index
    %c0_22 = arith.constant 0 : index
    %c0_23 = arith.constant 0 : index
    %33 = vector.load %arg1[%c3, %c0_22, %c0_23] : memref<5x128x128xbf16, #tpu.memory_space<vmem>>, vector<1x128x128xbf16>
    %34 = vector.shape_cast %33 : vector<1x128x128xbf16> to vector<128x128xbf16>
    %cst_24 = arith.constant dense<0.000000e+00> : vector<256x128xf32>
    %35 = tpu.matmul %32, %34, %cst_24 {dimension_numbers = #tpu.dot_dimension_numbers<[1], [0], [0], [1], [0, 0, 1, 1], [], []>} : vector<256x128xbf16>, vector<128x128xbf16>, vector<256x128xf32> -> vector<256x128xf32>
    %36 = arith.truncf %35 : vector<256x128xf32> to vector<256x128xbf16>
    %cst_25 = arith.constant dense<0.000000e+00> : vector<256x128xf32>
    %37 = tpu.matmul %4, %36, %cst_25 {dimension_numbers = #tpu.dot_dimension_numbers<[1], [0], [0], [1], [0, 0, 1, 1], [], []>} : vector<256x256xbf16>, vector<256x128xbf16>, vector<256x128xf32> -> vector<256x128xf32>
    %cst_26 = arith.constant 0.000000e+00 : f32
    %38 = vector.broadcast %cst_26 : f32 to vector<256x128xf32>
    %39 = arith.maximumf %37, %38 : vector<256x128xf32>
    %40 = arith.truncf %39 : vector<256x128xf32> to vector<256x128xbf16>
    %c4 = arith.constant 4 : index
    %c0_27 = arith.constant 0 : index
    %c0_28 = arith.constant 0 : index
    %41 = vector.load %arg1[%c4, %c0_27, %c0_28] : memref<5x128x128xbf16, #tpu.memory_space<vmem>>, vector<1x128x128xbf16>
    %42 = vector.shape_cast %41 : vector<1x128x128xbf16> to vector<128x128xbf16>
    %cst_29 = arith.constant dense<0.000000e+00> : vector<256x128xf32>
    %43 = tpu.matmul %40, %42, %cst_29 {dimension_numbers = #tpu.dot_dimension_numbers<[1], [0], [0], [1], [0, 0, 1, 1], [], []>} : vector<256x128xbf16>, vector<128x128xbf16>, vector<256x128xf32> -> vector<256x128xf32>
    %44 = arith.truncf %43 : vector<256x128xf32> to vector<256x128xbf16>
    %cst_30 = arith.constant dense<0.000000e+00> : vector<256x128xf32>
    %45 = tpu.matmul %4, %44, %cst_30 {dimension_numbers = #tpu.dot_dimension_numbers<[1], [0], [0], [1], [0, 0, 1, 1], [], []>} : vector<256x256xbf16>, vector<256x128xbf16>, vector<256x128xf32> -> vector<256x128xf32>
    %cst_31 = arith.constant 0.000000e+00 : f32
    %46 = vector.broadcast %cst_31 : f32 to vector<256x128xf32>
    %47 = arith.maximumf %45, %46 : vector<256x128xf32>
    %c0_32 = arith.constant 0 : index
    %c0_33 = arith.constant 0 : index
    %48 = vector.load %arg4[%c0_32, %c0_33] : memref<256x128xf32, #tpu.memory_space<vmem>>, vector<256x128xf32>
    tpu.vector_store %arg4[%c0_32, %c0_33], %22 {strides = array<i32>} : memref<256x128xf32, #tpu.memory_space<vmem>>, vector<256x128xf32>,
    %c0_34 = arith.constant 0 : index
    %c0_35 = arith.constant 0 : index
    %49 = vector.load %arg5[%c0_34, %c0_35] : memref<256x128xf32, #tpu.memory_space<vmem>>, vector<256x128xf32>
    tpu.vector_store %arg5[%c0_34, %c0_35], %30 {strides = array<i32>} : memref<256x128xf32, #tpu.memory_space<vmem>>, vector<256x128xf32>,
    %c0_36 = arith.constant 0 : index
    %c0_37 = arith.constant 0 : index
    %50 = vector.load %arg6[%c0_36, %c0_37] : memref<256x128xf32, #tpu.memory_space<vmem>>, vector<256x128xf32>
    tpu.vector_store %arg6[%c0_36, %c0_37], %47 {strides = array<i32>} : memref<256x128xf32, #tpu.memory_space<vmem>>, vector<256x128xf32>,
    %51 = arith.truncf %22 : vector<256x128xf32> to vector<256x128xbf16>
    %c0_38 = arith.constant 0 : index
    %c0_39 = arith.constant 0 : index
    %52 = vector.load %arg7[%c0_38, %c0_39] : memref<256x128xbf16, #tpu.memory_space<vmem>>, vector<256x128xbf16>
    tpu.vector_store %arg7[%c0_38, %c0_39], %51 {strides = array<i32>} : memref<256x128xbf16, #tpu.memory_space<vmem>>, vector<256x128xbf16>,
    return
  }
}

module attributes {stable_mosaic.version = 11 : i64} {
  func.func @_cluster_q_kernel(%arg0: i32, %arg1: memref<256x128xf32, #tpu.memory_space<vmem>>, %arg2: memref<128x128xf32, #tpu.memory_space<vmem>>, %arg3: memref<1x128xf32, #tpu.memory_space<vmem>>, %arg4: memref<256x128xf32, #tpu.memory_space<vmem>>) attributes {dimension_semantics = [#tpu.dimension_semantics<parallel>], iteration_bounds = array<i64: 1>, scalar_prefetch = 0 : i64, scratch_operands = 0 : i64, tpu.core_type = #tpu.core_type<tc>, window_params = [{transform_indices = @transform_0, window_bounds = array<i64: 256, 128>}, {pipeline_mode = #tpu.pipeline_mode<synchronous>, transform_indices = @transform_1, window_bounds = array<i64: 128, 128>}, {pipeline_mode = #tpu.pipeline_mode<synchronous>, transform_indices = @transform_2, window_bounds = array<i64: 1, 128>}, {transform_indices = @transform_3, window_bounds = array<i64: 256, 128>}]} {
    %c0 = arith.constant 0 : index
    %c0_0 = arith.constant 0 : index
    %0 = vector.load %arg1[%c0, %c0_0] : memref<256x128xf32, #tpu.memory_space<vmem>>, vector<256x128xf32>
    %c0_1 = arith.constant 0 : index
    %c0_2 = arith.constant 0 : index
    %1 = vector.load %arg2[%c0_1, %c0_2] : memref<128x128xf32, #tpu.memory_space<vmem>>, vector<128x128xf32>
    %2 = arith.mulf %0, %0 : vector<256x128xf32>
    %cst = arith.constant dense<0.000000e+00> : vector<256xf32>
    %3 = vector.multi_reduction <add>, %2, %cst [1] : vector<256x128xf32> to vector<256xf32>
    %4 = vector.shape_cast %3 : vector<256xf32> to vector<256x1xf32>
    %cst_3 = arith.constant dense<0.000000e+00> : vector<256x128xf32>
    %5 = tpu.matmul %0, %1, %cst_3 {dimension_numbers = #tpu.dot_dimension_numbers<[1], [1], [0], [0], [0, 0, 1, 0], [], []>} : vector<256x128xf32>, vector<128x128xf32>, vector<256x128xf32> -> vector<256x128xf32>
    %c0_4 = arith.constant 0 : index
    %c0_5 = arith.constant 0 : index
    %6 = vector.load %arg3[%c0_4, %c0_5] : memref<1x128xf32, #tpu.memory_space<vmem>>, vector<1x128xf32>
    %7 = vector.broadcast %4 : vector<256x1xf32> to vector<256x128xf32>
    %8 = vector.broadcast %6 : vector<1x128xf32> to vector<256x128xf32>
    %9 = arith.addf %7, %8 : vector<256x128xf32>
    %cst_6 = arith.constant 2.000000e+00 : f32
    %10 = vector.broadcast %cst_6 : f32 to vector<256x128xf32>
    %11 = arith.mulf %10, %5 : vector<256x128xf32>
    %12 = arith.subf %9, %11 : vector<256x128xf32>
    %cst_7 = arith.constant 0.000000e+00 : f32
    %13 = vector.broadcast %cst_7 : f32 to vector<256x128xf32>
    %14 = arith.maximumf %12, %13 : vector<256x128xf32>
    %cst_8 = arith.constant 1.000000e+00 : f32
    %15 = vector.broadcast %cst_8 : f32 to vector<256x128xf32>
    %16 = arith.addf %15, %14 : vector<256x128xf32>
    %17 = tpu.reciprocal %16 {approx = true} : vector<256x128xf32> -> vector<256x128xf32>
    %18 = tpu.iota {dimensions = array<i32: 1>} : vector<256x128xi32>
    %c8_i32 = arith.constant 8 : i32
    %19 = vector.broadcast %c8_i32 : i32 to vector<256x128xi32>
    %20 = arith.cmpi slt, %18, %19 : vector<256x128xi32>
    %cst_9 = arith.constant 0.000000e+00 : f32
    %21 = vector.broadcast %cst_9 : f32 to vector<256x128xf32>
    %22 = arith.select %20, %17, %21 : vector<256x128xi1>, vector<256x128xf32>
    %cst_10 = arith.constant dense<0.000000e+00> : vector<256xf32>
    %23 = vector.multi_reduction <add>, %22, %cst_10 [1] : vector<256x128xf32> to vector<256xf32>
    %24 = vector.shape_cast %23 : vector<256xf32> to vector<256x1xf32>
    %25 = vector.broadcast %24 : vector<256x1xf32> to vector<256x128xf32>
    %26 = arith.divf %22, %25 : vector<256x128xf32>
    %c0_11 = arith.constant 0 : index
    %c0_12 = arith.constant 0 : index
    %27 = vector.load %arg4[%c0_11, %c0_12] : memref<256x128xf32, #tpu.memory_space<vmem>>, vector<256x128xf32>
    tpu.vector_store %arg4[%c0_11, %c0_12], %26 {strides = array<i32>} : memref<256x128xf32, #tpu.memory_space<vmem>>, vector<256x128xf32>,
    return
  }
  func.func @transform_0(%arg0: i32) -> (i32, i32) {
    %c0_i32 = arith.constant 0 : i32
    %c0_i32_0 = arith.constant 0 : i32
    return %arg0, %c0_i32 : i32, i32
  }
  func.func @transform_1(%arg0: i32) -> (i32, i32) {
    %c0_i32 = arith.constant 0 : i32
    %c0_i32_0 = arith.constant 0 : i32
    %c0_i32_1 = arith.constant 0 : i32
    return %c0_i32, %c0_i32_0 : i32, i32
  }
  func.func @transform_2(%arg0: i32) -> (i32, i32) {
    %c0_i32 = arith.constant 0 : i32
    %c0_i32_0 = arith.constant 0 : i32
    %c0_i32_1 = arith.constant 0 : i32
    return %c0_i32, %c0_i32_0 : i32, i32
  }
  func.func @transform_3(%arg0: i32) -> (i32, i32) {
    %c0_i32 = arith.constant 0 : i32
    %c0_i32_0 = arith.constant 0 : i32
    return %arg0, %c0_i32 : i32, i32
  }
}

module attributes {stable_mosaic.version = 11 : i64} {
  func.func @_sigmoid_gram_kernel(%arg0: i32, %arg1: i32, %arg2: memref<256x128xbf16, #tpu.memory_space<vmem>>, %arg3: memref<256x128xbf16, #tpu.memory_space<vmem>>, %arg4: memref<256x256xbf16, #tpu.memory_space<vmem>>) attributes {dimension_semantics = [#tpu.dimension_semantics<parallel>, #tpu.dimension_semantics<parallel>], iteration_bounds = array<i64: 1, 1>, scalar_prefetch = 0 : i64, scratch_operands = 0 : i64, tpu.core_type = #tpu.core_type<tc>, window_params = [{transform_indices = @transform_0, window_bounds = array<i64: 256, 128>}, {transform_indices = @transform_1, window_bounds = array<i64: 256, 128>}, {transform_indices = @transform_2, window_bounds = array<i64: 256, 256>}]} {
    %c0 = arith.constant 0 : index
    %c0_0 = arith.constant 0 : index
    %0 = vector.load %arg2[%c0, %c0_0] : memref<256x128xbf16, #tpu.memory_space<vmem>>, vector<256x128xbf16>
    %c0_1 = arith.constant 0 : index
    %c0_2 = arith.constant 0 : index
    %1 = vector.load %arg3[%c0_1, %c0_2] : memref<256x128xbf16, #tpu.memory_space<vmem>>, vector<256x128xbf16>
    %cst = arith.constant dense<0.000000e+00> : vector<256x256xf32>
    %2 = tpu.matmul %0, %1, %cst {dimension_numbers = #tpu.dot_dimension_numbers<[1], [1], [0], [0], [0, 0, 1, 0], [], []>} : vector<256x128xbf16>, vector<256x128xbf16>, vector<256x256xf32> -> vector<256x256xf32>
    %3 = arith.negf %2 : vector<256x256xf32>
    %4 = math.exp %3 : vector<256x256xf32>
    %cst_3 = arith.constant 1.000000e+00 : f32
    %5 = vector.broadcast %cst_3 : f32 to vector<256x256xf32>
    %6 = arith.addf %5, %4 : vector<256x256xf32>
    %7 = arith.divf %5, %6 : vector<256x256xf32>
    %8 = arith.truncf %7 : vector<256x256xf32> to vector<256x256xbf16>
    %c0_4 = arith.constant 0 : index
    %c0_5 = arith.constant 0 : index
    %9 = vector.load %arg4[%c0_4, %c0_5] : memref<256x256xbf16, #tpu.memory_space<vmem>>, vector<256x256xbf16>
    tpu.vector_store %arg4[%c0_4, %c0_5], %8 {strides = array<i32>} : memref<256x256xbf16, #tpu.memory_space<vmem>>, vector<256x256xbf16>,
    return
  }
  func.func @transform_0(%arg0: i32, %arg1: i32) -> (i32, i32) {
    %c0_i32 = arith.constant 0 : i32
    %c0_i32_0 = arith.constant 0 : i32
    return %arg0, %c0_i32 : i32, i32
  }
  func.func @transform_1(%arg0: i32, %arg1: i32) -> (i32, i32) {
    %c0_i32 = arith.constant 0 : i32
    %c0_i32_0 = arith.constant 0 : i32
    return %arg1, %c0_i32 : i32, i32
  }
  func.func @transform_2(%arg0: i32, %arg1: i32) -> (i32, i32) {
    %c0_i32 = arith.constant 0 : i32
    return %arg0, %arg1 : i32, i32
  }
}

</mosaic_0001>

<bundles_post_ra>
// kernel: gcn_forward.5
= control target key start
LH: loop header
LB: loop body
LE: loop exit
PB: predicated region body
PF: predicated region fallthrough
CT: control target
= control target key end

     0   :  { %s1703_s1 = inlined_call_operand.vmem [shape: f32[128,128], index: 1, kind: input, shape index: {}]   ;;  %s1704_s0 = inlined_call_operand.vmem [shape: f32[256,128], index: 0, kind: input, shape index: {}]   ;;  %s1705_s2 = inlined_call_operand.vmem [shape: f32[1,128], index: 2, kind: input, shape index: {}]   ;;  %s1706_s3 = inlined_call_operand.vmem [shape: f32[256,128], index: 3, kind: output, shape index: {}]  }
   0x1   :  { %v61_v0 = vld [vmem:[%s1703_s1 + $0x78] sm:$0xff]  ;;  %v60_v1 = vld [vmem:[%s1703_s1 + $0x70] sm:$0xff]  ;;  %v59_v2 = vld [vmem:[%s1703_s1 + $0x68] sm:$0xff] }
   0x2   :  { %830 = vmatprep.subr.mxu0 %v61_v0  ;;  %910 = vmatprep.subr.mxu1 %v61_v0  ;;  %v14_v3 = vld [vmem:[%s1704_s0] sm:$0xff]  ;;  %v1110_v5 = vld [vmem:[%s1704_s0 + $0x10] sm:$0xff]  ;;  %v1120_v9 = vld [vmem:[%s1704_s0 + $0x8] sm:$0xff] }
   0x3   :  { %831 = vmatpush3.xpose.msra.mxu0 %v61_v0  ;;  %926 = vmatpush3.xpose.msra.mxu1 %v61_v0  ;;  %v1105_v4 = vld [vmem:[%s1704_s0 + $0x80] sm:$0xff]  ;;  %v62_v6 = vmul.f32 %v14_v3, %v14_v3  ;;  %v64_v7 = vmul.f32 %v1110_v5, %v1110_v5  ;;  %v1126_v10 = vld [vmem:[%s1704_s0 + $0x18] sm:$0xff]  ;;  %v63_v12 = vmul.f32 %v1120_v9, %v1120_v9  ;;  %v1143_v15 = vld [vmem:[%s1704_s0 + $0x28] sm:$0xff] }
   0x4   :  { %832 = vmatprep.subr.mxu0 %v60_v1  ;;  %911 = vmatprep.subr.mxu1 %v60_v1  ;;  %v58_v8 = vld [vmem:[%s1703_s1 + $0x60] sm:$0xff]  ;;  %v65_v11 = vmul.f32 %v1126_v10, %v1126_v10  ;;  %v57_v13 = vld [vmem:[%s1703_s1 + $0x58] sm:$0xff]  ;;  %v67_v16 = vmul.f32 %v1143_v15, %v1143_v15  ;;  %v56_v18 = vld [vmem:[%s1703_s1 + $0x50] sm:$0xff]  ;;  %v78_v46 = vmul.f32 %v1105_v4, %v1105_v4 }
   0x5   :  { %862 = vmatprep.mubr.f32.mxu0 %v14_v3  ;;  %886 = vmatprep.mubr.f32.mxu1 %v1105_v4  ;;  %v1138_v14 = vld [vmem:[%s1704_s0 + $0x20] sm:$0xff]  ;;  %v1155_v19 = vld [vmem:[%s1704_s0 + $0x30] sm:$0xff]  ;;  %v1160_v20 = vld [vmem:[%s1704_s0 + $0x38] sm:$0xff] }
   0x6   :  { %98 = vadd.xlane.f32.xlu1 %v64_v7  ;;  %94 = vadd.xlane.f32.xlu0 %v62_v6  ;;  %v66_v17 = vmul.f32 %v1138_v14, %v1138_v14  ;;  %v69_v21 = vmul.f32 %v1160_v20, %v1160_v20  ;;  %v68_v22 = vmul.f32 %v1155_v19, %v1155_v19  ;;  %v55_v23 = vld [vmem:[%s1703_s1 + $0x48] sm:$0xff]  ;;  %v1172_v24 = vld [vmem:[%s1704_s0 + $0x40] sm:$0xff]  ;;  %v1189_v29 = vld [vmem:[%s1704_s0 + $0x50] sm:$0xff] }
   0x7   :  { %833 = vmatpush3.xpose.msra.mxu0 %v60_v1  ;;  %927 = vmatpush3.xpose.msra.mxu1 %v60_v1  ;;  %v1177_v25 = vld [vmem:[%s1704_s0 + $0x48] sm:$0xff]  ;;  %v70_v27 = vmul.f32 %v1172_v24, %v1172_v24  ;;  %v54_v28 = vld [vmem:[%s1703_s1 + $0x40] sm:$0xff]  ;;  %v1194_v30 = vld [vmem:[%s1704_s0 + $0x58] sm:$0xff]  ;;  %v72_v32 = vmul.f32 %v1189_v29, %v1189_v29 }
   0x8   :  { %834 = vmatprep.subr.mxu0 %v59_v2  ;;  %912 = vmatprep.subr.mxu1 %v59_v2  ;;  %v71_v26 = vmul.f32 %v1177_v25, %v1177_v25  ;;  %v73_v31 = vmul.f32 %v1194_v30, %v1194_v30  ;;  %v53_v33 = vld [vmem:[%s1703_s1 + $0x38] sm:$0xff]  ;;  %v1206_v34 = vld [vmem:[%s1704_s0 + $0x60] sm:$0xff]  ;;  %v1211_v35 = vld [vmem:[%s1704_s0 + $0x68] sm:$0xff] }
   0x9   :  { %v75_v36 = vmul.f32 %v1211_v35, %v1211_v35  ;;  %v74_v37 = vmul.f32 %v1206_v34, %v1206_v34  ;;  %v52_v38 = vld [vmem:[%s1703_s1 + $0x30] sm:$0xff]  ;;  %v1228_v40 = vld [vmem:[%s1704_s0 + $0x78] sm:$0xff]  ;;  %v51_v43 = vld [vmem:[%s1703_s1 + $0x28] sm:$0xff] }
   0xa   :  { %100 = vadd.xlane.f32.xlu1 %v65_v11  ;;  %96 = vadd.xlane.f32.xlu0 %v63_v12  ;;  %v1223_v39 = vld [vmem:[%s1704_s0 + $0x70] sm:$0xff]  ;;  %v77_v41 = vmul.f32 %v1228_v40, %v1228_v40  ;;  %v1240_v44 = vld [vmem:[%s1704_s0 + $0x88] sm:$0xff]  ;;  %v50_v47 = vld [vmem:[%s1703_s1 + $0x20] sm:$0xff] }
   0xb   :  { %835 = vmatpush3.xpose.msra.mxu0 %v59_v2  ;;  %928 = vmatpush3.xpose.msra.mxu1 %v59_v2  ;;  %v76_v42 = vmul.f32 %v1223_v39, %v1223_v39  ;;  %v79_v45 = vmul.f32 %v1240_v44, %v1240_v44  ;;  %v1252_v48 = vld [vmem:[%s1704_s0 + $0x90] sm:$0xff]  ;;  %v1257_v49 = vld [vmem:[%s1704_s0 + $0x98] sm:$0xff]  ;;  %v1269_v53 = vld [vmem:[%s1704_s0 + $0xa0] sm:$0xff] }
   0xc   :  { %836 = vmatprep.subr.mxu0 %v58_v8  ;;  %913 = vmatprep.subr.mxu1 %v58_v8  ;;  %v81_v50 = vmul.f32 %v1257_v49, %v1257_v49  ;;  %v80_v51 = vmul.f32 %v1252_v48, %v1252_v48  ;;  %v49_v52 = vld [vmem:[%s1703_s1 + $0x18] sm:$0xff]  ;;  %v1274_v54 = vld [vmem:[%s1704_s0 + $0xa8] sm:$0xff]  ;;  %v82_v56 = vmul.f32 %v1269_v53, %v1269_v53  ;;  %v48_v57 = vld [vmem:[%s1703_s1 + $0x10] sm:$0xff] }
   0xd   :  { %v83_v55 = vmul.f32 %v1274_v54, %v1274_v54  ;;  %v36_v58 = vld [vmem:[%s1704_s0 + $0xb0] sm:$0xff]  ;;  %v37_v59 = vld [vmem:[%s1704_s0 + $0xb8] sm:$0xff]  ;;  %v47_v62 = vld [vmem:[%s1703_s1 + $0x8] sm:$0xff] }
   0xe   :  { %104 = vadd.xlane.f32.xlu1 %v67_v16  ;;  %102 = vadd.xlane.f32.xlu0 %v66_v17  ;;  %v85_v60 = vmul.f32 %v37_v59, %v37_v59  ;;  %v84_v61 = vmul.f32 %v36_v58, %v36_v58  ;;  %v38_v63 = vld [vmem:[%s1704_s0 + $0xc0] sm:$0xff]  ;;  %v39_v0 = vld [vmem:[%s1704_s0 + $0xc8] sm:$0xff]  ;;  %v40_v4 = vld [vmem:[%s1704_s0 + $0xd0] sm:$0xff] }
   0xf   :  { %837 = vmatpush3.xpose.msra.mxu0 %v58_v8  ;;  %929 = vmatpush3.xpose.msra.mxu1 %v58_v8  ;;  %v87_v1 = vmul.f32 %v39_v0, %v39_v0  ;;  %v86_v2 = vmul.f32 %v38_v63, %v38_v63  ;;  %v46_v3 = vld [vmem:[%s1703_s1] sm:$0xff]  ;;  %v41_v6 = vld [vmem:[%s1704_s0 + $0xd8] sm:$0xff]  ;;  %v88_v8 = vmul.f32 %v40_v4, %v40_v4  ;;  %v43_v12 = vld [vmem:[%s1704_s0 + $0xe8] sm:$0xff] }
  0x10   :  { %838 = vmatprep.subr.mxu0 %v57_v13  ;;  %914 = vmatprep.subr.mxu1 %v57_v13  ;;  %v89_v7 = vmul.f32 %v41_v6, %v41_v6  ;;  %v42_v11 = vld [vmem:[%s1704_s0 + $0xe0] sm:$0xff]  ;;  %v44_v17 = vld [vmem:[%s1704_s0 + $0xf0] sm:$0xff] }
  0x11   :  { %v90_v16 = vmul.f32 %v42_v11, %v42_v11 }
  0x12   :  { %108 = vadd.xlane.f32.xlu1 %v69_v21  ;;  %106 = vadd.xlane.f32.xlu0 %v68_v22  ;;  %v92_v22 = vmul.f32 %v44_v17, %v44_v17 }
  0x13   :  { %839 = vmatpush3.xpose.msra.mxu0 %v57_v13  ;;  %930 = vmatpush3.xpose.msra.mxu1 %v57_v13  ;;  %v91_v13 = vmul.f32 %v43_v12, %v43_v12 }
  0x14   :  { %840 = vmatprep.subr.mxu0 %v56_v18  ;;  %915 = vmatprep.subr.mxu1 %v56_v18 }
  0x16   :  { %112 = vadd.xlane.f32.xlu1 %v71_v26  ;;  %110 = vadd.xlane.f32.xlu0 %v70_v27 }
  0x17   :  { %841 = vmatpush3.xpose.msra.mxu0 %v56_v18  ;;  %931 = vmatpush3.xpose.msra.mxu1 %v56_v18  ;;  %v45_v18 = vld [vmem:[%s1704_s0 + $0xf8] sm:$0xff] }
  0x18   :  { %842 = vmatprep.subr.mxu0 %v55_v23  ;;  %916 = vmatprep.subr.mxu1 %v55_v23  ;;  %v93_v21 = vmul.f32 %v45_v18, %v45_v18 }
  0x1a   :  { %116 = vadd.xlane.f32.xlu1 %v73_v31  ;;  %114 = vadd.xlane.f32.xlu0 %v72_v32 }
  0x1b   :  { %843 = vmatpush3.xpose.msra.mxu0 %v55_v23  ;;  %932 = vmatpush3.xpose.msra.mxu1 %v55_v23 }
  0x1c   :  { %844 = vmatprep.subr.mxu0 %v54_v28  ;;  %917 = vmatprep.subr.mxu1 %v54_v28 }
  0x1e   :  { %120 = vadd.xlane.f32.xlu1 %v75_v36  ;;  %118 = vadd.xlane.f32.xlu0 %v74_v37 }
  0x1f   :  { %845 = vmatpush3.xpose.msra.mxu0 %v54_v28  ;;  %933 = vmatpush3.xpose.msra.mxu1 %v54_v28 }
  0x20   :  { %846 = vmatprep.subr.mxu0 %v53_v33  ;;  %918 = vmatprep.subr.mxu1 %v53_v33 }
  0x22   :  { %124 = vadd.xlane.f32.xlu1 %v77_v41  ;;  %122 = vadd.xlane.f32.xlu0 %v76_v42 }
  0x23   :  { %847 = vmatpush3.xpose.msra.mxu0 %v53_v33  ;;  %934 = vmatpush3.xpose.msra.mxu1 %v53_v33  ;;  %v1364_v33 = vld [vmem:[%s1705_s2] ss:$0 sm:$0xff] }
  0x24   :  { %848 = vmatprep.subr.mxu0 %v52_v38  ;;  %919 = vmatprep.subr.mxu1 %v52_v38 }
  0x26   :  { %128 = vadd.xlane.f32.xlu1 %v79_v45  ;;  %126 = vadd.xlane.f32.xlu0 %v78_v46 }
  0x27   :  { %849 = vmatpush3.xpose.msra.mxu0 %v52_v38  ;;  %935 = vmatpush3.xpose.msra.mxu1 %v52_v38 }
  0x28   :  { %850 = vmatprep.subr.mxu0 %v51_v43  ;;  %920 = vmatprep.subr.mxu1 %v51_v43 }
  0x2a   :  { %132 = vadd.xlane.f32.xlu1 %v81_v50  ;;  %130 = vadd.xlane.f32.xlu0 %v80_v51 }
  0x2b   :  { %851 = vmatpush3.xpose.msra.mxu0 %v51_v43  ;;  %936 = vmatpush3.xpose.msra.mxu1 %v51_v43 }
  0x2c   :  { %852 = vmatprep.subr.mxu0 %v50_v47  ;;  %921 = vmatprep.subr.mxu1 %v50_v47 }
  0x2e   :  { %136 = vadd.xlane.f32.xlu1 %v83_v55  ;;  %134 = vadd.xlane.f32.xlu0 %v82_v56  ;;  %v582_v56 = vlaneseq }
  0x2f   :  { %853 = vmatpush3.xpose.msra.mxu0 %v50_v47  ;;  %937 = vmatpush3.xpose.msra.mxu1 %v50_v47 }
  0x30   :  { %854 = vmatprep.subr.mxu0 %v49_v52  ;;  %922 = vmatprep.subr.mxu1 %v49_v52 }
  0x32   :  { %140 = vadd.xlane.f32.xlu1 %v85_v60  ;;  %138 = vadd.xlane.f32.xlu0 %v84_v61 }
  0x33   :  { %855 = vmatpush3.xpose.msra.mxu0 %v49_v52  ;;  %938 = vmatpush3.xpose.msra.mxu1 %v49_v52 }
  0x34   :  { %856 = vmatprep.subr.mxu0 %v48_v57  ;;  %923 = vmatprep.subr.mxu1 %v48_v57 }
  0x36   :  { %144 = vadd.xlane.f32.xlu1 %v87_v1  ;;  %142 = vadd.xlane.f32.xlu0 %v86_v2 }
  0x37   :  { %857 = vmatpush3.xpose.msra.mxu0 %v48_v57  ;;  %939 = vmatpush3.xpose.msra.mxu1 %v48_v57 }
  0x38   :  { %858 = vmatprep.subr.mxu0 %v47_v62  ;;  %924 = vmatprep.subr.mxu1 %v47_v62 }
  0x3a   :  { %148 = vadd.xlane.f32.xlu1 %v89_v7  ;;  %146 = vadd.xlane.f32.xlu0 %v88_v8 }
  0x3b   :  { %859 = vmatpush3.xpose.msra.mxu0 %v47_v62  ;;  %940 = vmatpush3.xpose.msra.mxu1 %v47_v62 }
  0x3c   :  { %860 = vmatprep.subr.mxu0 %v46_v3  ;;  %925 = vmatprep.subr.mxu1 %v46_v3 }
  0x3e   :  { %152 = vadd.xlane.f32.xlu1 %v91_v13  ;;  %150 = vadd.xlane.f32.xlu0 %v90_v16 }
  0x3f   :  { %861 = vmatpush3.xpose.msra.mxu0 %v46_v3  ;;  %941 = vmatpush3.xpose.msra.mxu1 %v46_v3 }
  0x42   :  { %863 = vmatmul.mubr.f32.vlgmr.msra.gmra.mxu0 %v1120_v9  ;;  %887 = vmatmul.mubr.f32.vlgmr.msra.gmra.mxu1 %v1240_v44 }
  0x43   :  { %865 = vmatprep.mubr.f32.mxu0 %v1110_v5  ;;  %889 = vmatprep.mubr.f32.mxu1 %v1252_v48 }
  0x44   :  { %156 = vadd.xlane.f32.xlu1 %v93_v21  ;;  %154 = vadd.xlane.f32.xlu0 %v92_v22 }
  0x46   :  { %866 = vmatmul.mubr.f32.gmra.mxu0 %v1126_v10  ;;  %890 = vmatmul.mubr.f32.gmra.mxu1 %v1257_v49 }
  0x47   :  { %868 = vmatprep.mubr.f32.mxu0 %v1138_v14  ;;  %892 = vmatprep.mubr.f32.mxu1 %v1269_v53 }
  0x4a   :  { %869 = vmatmul.mubr.f32.gmra.mxu0 %v1143_v15  ;;  %893 = vmatmul.mubr.f32.gmra.mxu1 %v1274_v54 }
  0x4b   :  { %871 = vmatprep.mubr.f32.mxu0 %v1155_v19  ;;  %895 = vmatprep.mubr.f32.mxu1 %v36_v58 }
  0x4e   :  { %872 = vmatmul.mubr.f32.gmra.mxu0 %v1160_v20  ;;  %896 = vmatmul.mubr.f32.gmra.mxu1 %v37_v59 }
  0x4f   :  { %874 = vmatprep.mubr.f32.mxu0 %v1172_v24  ;;  %898 = vmatprep.mubr.f32.mxu1 %v38_v63 }
  0x52   :  { %875 = vmatmul.mubr.f32.gmra.mxu0 %v1177_v25  ;;  %899 = vmatmul.mubr.f32.gmra.mxu1 %v39_v0 }
  0x53   :  { %877 = vmatprep.mubr.f32.mxu0 %v1189_v29  ;;  %901 = vmatprep.mubr.f32.mxu1 %v40_v4 }
  0x56   :  { %878 = vmatmul.mubr.f32.gmra.mxu0 %v1194_v30  ;;  %902 = vmatmul.mubr.f32.gmra.mxu1 %v41_v6 }
  0x57   :  { %880 = vmatprep.mubr.f32.mxu0 %v1206_v34  ;;  %904 = vmatprep.mubr.f32.mxu1 %v42_v11 }
  0x5a   :  { %881 = vmatmul.mubr.f32.gmra.mxu0 %v1211_v35  ;;  %905 = vmatmul.mubr.f32.gmra.mxu1 %v43_v12 }
  0x5b   :  { %883 = vmatprep.mubr.f32.mxu0 %v1223_v39  ;;  %907 = vmatprep.mubr.f32.mxu1 %v44_v17 }
  0x5e   :  { %884 = vmatmul.mubr.f32.gmra.mxu0 %v1228_v40  ;;  %908 = vmatmul.mubr.f32.gmra.mxu1 %v45_v18 }
  0x8f   :  { %v99_v5 = vpop.xlane.xlu1 %98  ;;  %v95_v9 = vpop.xlane.xlu0 %94 }
  0x90   :  { %v390_v42 = vadd.f32 %v1364_v33, %v95_v9  ;;  %v392_v51 = vadd.f32 %v1364_v33, %v99_v5 }
  0x93   :  { %v101_v10 = vpop.xlane.xlu1 %100  ;;  %v97_v14 = vpop.xlane.xlu0 %96 }
  0x94   :  { %v391_v38 = vadd.f32 %v1364_v33, %v97_v14  ;;  %v393_v52 = vadd.f32 %v1364_v33, %v101_v10 }
  0x97   :  { %v105_v15 = vpop.xlane.xlu1 %104  ;;  %v1339_v19 = vpop.xlane.xlu0 %102 }
  0x98   :  { %v395_v61 = vadd.f32 %v1364_v33, %v105_v15 }
  0x9b   :  { %v1341_v20 = vpop.xlane.xlu1 %108  ;;  %v1343_v23 = vpop.xlane.xlu0 %106 }
  0x9f   :  { %v1345_v24 = vpop.xlane.xlu1 %112  ;;  %v1347_v25 = vpop.xlane.xlu0 %110 }
  0xa3   :  { %v1349_v26 = vpop.xlane.xlu1 %116  ;;  %v1351_v27 = vpop.xlane.xlu0 %114 }
  0xa7   :  { %v1353_v28 = vpop.xlane.xlu1 %120  ;;  %v1355_v29 = vpop.xlane.xlu0 %118 }
  0xab   :  { %v1357_v30 = vpop.xlane.xlu1 %124  ;;  %v1359_v31 = vpop.xlane.xlu0 %122 }
  0xaf   :  { %v129_v32 = vpop.xlane.xlu1 %128  ;;  %v127_v35 = vpop.xlane.xlu0 %126 }
  0xb0   :  { %v407_v34 = vadd.f32 %v1364_v33, %v129_v32  ;;  %v406_v45 = vadd.f32 %v1364_v33, %v127_v35 }
  0xb3   :  { %v133_v41 = vpop.xlane.xlu1 %132  ;;  %v131_v50 = vpop.xlane.xlu0 %130 }
  0xb4   :  { %v409_v55 = vadd.f32 %v1364_v33, %v133_v41  ;;  %v408_v2 = vadd.f32 %v1364_v33, %v131_v50 }
  0xb7   :  { %v137_v5 = vpop.xlane.xlu1 %136  ;;  %v135_v32 = vpop.xlane.xlu0 %134 }
  0xb8   :  { %v411_v41 = vadd.f32 %v1364_v33, %v137_v5 }
 0x102   :  { %v864_v36 = vpop.f32.mrf.mxu0  ;;  %v888_v37 = vpop.f32.mrf.mxu1 }
 0x103   :  { %v423_v39 = vmul.f32 2.0, %v864_v36  ;;  %v439_v40 = vmul.f32 2.0, %v888_v37 }
 0x104   :  { %v224_v43 = vpop.f32.mrf.mxu0  ;;  %v304_v44 = vpop.f32.mrf.mxu1 }
 0x105   :  { %v455_v46 = vsub.f32 %v391_v38, %v423_v39  ;;  %v422_v47 = vmul.f32 2.0, %v224_v43  ;;  %v438_v48 = vmul.f32 2.0, %v304_v44  ;;  %v471_v49 = vsub.f32 %v407_v34, %v439_v40 }
 0x106   :  { %v867_v53 = vpop.f32.mrf.mxu0  ;;  %v891_v54 = vpop.f32.mrf.mxu1  ;;  %v394_v34 = vadd.f32 %v1364_v33, %v1339_v19 }
 0x107   :  { %v487_v57 = vmax.f32 %v455_v46, 0.0  ;;  %v454_v58 = vsub.f32 %v390_v42, %v422_v47  ;;  %v503_v59 = vmax.f32 %v471_v49, 0.0  ;;  %v425_v60 = vmul.f32 2.0, %v867_v53 }
 0x108   :  { %v470_v62 = vsub.f32 %v406_v45, %v438_v48  ;;  %v234_v63 = vpop.f32.mrf.mxu0  ;;  %v441_v0 = vmul.f32 2.0, %v891_v54  ;;  %v314_v1 = vpop.f32.mrf.mxu1  ;;  %v410_v46 = vadd.f32 %v1364_v33, %v135_v32  ;;  %v1379_v54 = vand.u32 127, %v582_v56 }
 0x109   :  { %v519_v3 = vadd.f32 1.0, %v487_v57  ;;  %v486_v4 = vmax.f32 %v454_v58, 0.0  ;;  %v535_v6 = vadd.f32 1.0, %v503_v59  ;;  %v457_v7 = vsub.f32 %v393_v52, %v425_v60 }
 0x10a   :  { %v502_v8 = vmax.f32 %v470_v62, 0.0  ;;  %v424_v11 = vmul.f32 2.0, %v234_v63  ;;  %v870_v12 = vpop.f32.mrf.mxu0  ;;  %v440_v13 = vmul.f32 2.0, %v314_v1  ;;  %v473_v16 = vsub.f32 %v409_v55, %v441_v0  ;;  %v894_v22 = vpop.f32.mrf.mxu1 }
 0x10b   :  { %942 = vrcp.f32 %v519_v3  ;;  %v518_v17 = vadd.f32 1.0, %v486_v4  ;;  %v489_v18 = vmax.f32 %v457_v7, 0.0  ;;  %v427_v21 = vmul.f32 2.0, %v870_v12  ;;  %v141_v55 = vpop.xlane.xlu1 %140 }
 0x10c   :  { %944 = vrcp.f32 %v535_v6  ;;  %v534_v9 = vadd.f32 1.0, %v502_v8  ;;  %v456_v10 = vsub.f32 %v392_v51, %v424_v11  ;;  %v244_v14 = vpop.f32.mrf.mxu0  ;;  %v505_v15 = vmax.f32 %v473_v16, 0.0  ;;  %v324_v45 = vpop.f32.mrf.mxu1 }
 0x10d   :  { %946 = vrcp.f32 %v518_v17  ;;  %v459_v35 = vsub.f32 %v395_v61, %v427_v21  ;;  %v426_v36 = vmul.f32 2.0, %v244_v14  ;;  %v521_v37 = vadd.f32 1.0, %v489_v18 }
 0x10e   :  { %v488_v38 = vmax.f32 %v456_v10, 0.0  ;;  %v873_v39 = vpop.f32.mrf.mxu0  ;;  %v472_v40 = vsub.f32 %v408_v2, %v440_v13  ;;  %v537_v44 = vadd.f32 1.0, %v505_v15  ;;  %948 = vrcp.f32 %v534_v9  ;;  %v897_v61 = vpop.f32.mrf.mxu1 }
 0x10f   :  { %v491_v42 = vmax.f32 %v459_v35, 0.0  ;;  %v458_v43 = vsub.f32 %v394_v34, %v426_v36  ;;  %v443_v19 = vmul.f32 2.0, %v894_v22  ;;  %v429_v51 = vmul.f32 2.0, %v873_v39 }
 0x110   :  { %v520_v47 = vadd.f32 1.0, %v488_v38  ;;  %v504_v48 = vmax.f32 %v472_v40, 0.0  ;;  %v254_v49 = vpop.f32.mrf.mxu0  ;;  %950 = vrcp.f32 %v521_v37  ;;  %v442_v52 = vmul.f32 2.0, %v324_v45  ;;  %v334_v12 = vpop.f32.mrf.mxu1 }
 0x111   :  { %v490_v50 = vmax.f32 %v458_v43, 0.0  ;;  %v475_v53 = vsub.f32 %v411_v41, %v443_v19  ;;  %v397_v57 = vadd.f32 %v1364_v33, %v1341_v20  ;;  %v523_v58 = vadd.f32 1.0, %v491_v42  ;;  %v139_v20 = vpop.xlane.xlu0 %138 }
 0x112   :  { %952 = vrcp.f32 %v537_v44  ;;  %v428_v59 = vmul.f32 2.0, %v254_v49  ;;  %v876_v60 = vpop.f32.mrf.mxu0  ;;  %v536_v62 = vadd.f32 1.0, %v504_v48  ;;  %v474_v0 = vsub.f32 %v410_v46, %v442_v52  ;;  %v900_v35 = vpop.f32.mrf.mxu1 }
 0x113   :  { %954 = vrcp.f32 %v520_v47  ;;  %v507_v63 = vmax.f32 %v475_v53, 0.0  ;;  %v396_v1 = vadd.f32 %v1364_v33, %v1343_v23  ;;  %v522_v2 = vadd.f32 1.0, %v490_v50 }
 0x114   :  { %v461_v3 = vsub.f32 %v397_v57, %v429_v51  ;;  %vm584_vm0 = vcmp.lt.s32.totalorder %v1379_v54, 8  ;;  %v445_v56 = vmul.f32 2.0, %v897_v61  ;;  %v413_v4 = vadd.f32 %v1364_v33, %v141_v55  ;;  %v264_v7 = vpop.f32.mrf.mxu0  ;;  %v344_v19 = vpop.f32.mrf.mxu1 }
 0x115   :  { %956 = vrcp.f32 %v523_v58  ;;  %v460_v6 = vsub.f32 %v396_v1, %v428_v59  ;;  %v539_v8 = vadd.f32 1.0, %v507_v63  ;;  %v506_v11 = vmax.f32 %v474_v0, 0.0  ;;  %v143_v45 = vpop.xlane.xlu0 %142 }
 0x116   :  { %958 = vrcp.f32 %v536_v62  ;;  %v493_v17 = vmax.f32 %v461_v3, 0.0  ;;  %v431_v23 = vmul.f32 2.0, %v876_v60  ;;  %v412_v18 = vadd.f32 %v1364_v33, %v139_v20  ;;  %v879_v32 = vpop.f32.mrf.mxu0  ;;  %v903_v60 = vpop.f32.mrf.mxu1 }
 0x117   :  { %960 = vrcp.f32 %v522_v2  ;;  %v430_v22 = vmul.f32 2.0, %v264_v7  ;;  %v444_v9 = vmul.f32 2.0, %v334_v12  ;;  %v477_v10 = vsub.f32 %v413_v4, %v445_v56 }
 0x118   :  { %v943_v13 = vpop.eup %942  ;;  %v399_v14 = vadd.f32 %v1364_v33, %v1345_v24  ;;  %v492_v15 = vmax.f32 %v460_v6, 0.0  ;;  %962 = vrcp.f32 %v539_v8  ;;  %v538_v34 = vadd.f32 1.0, %v506_v11  ;;  %v145_v24 = vpop.xlane.xlu1 %144 }
 0x119   :  { %v945_v16 = vpop.eup %944  ;;  %v1390_v5 = vsel %vm584_vm0, %v943_v13, 0.0  ;;  %v398_v36 = vadd.f32 %v1364_v33, %v1347_v25  ;;  %v509_v38 = vmax.f32 %v477_v10, 0.0  ;;  %v525_v41 = vadd.f32 1.0, %v493_v17  ;;  %v274_v49 = vpop.f32.mrf.mxu0 }
 0x11a   :  { %v947_v21 = vpop.eup %946  ;;  %619 = vadd.xlane.f32.xlu1 %v1390_v5  ;;  %v1403_v39 = vsel %vm584_vm0, %v945_v16, 0.0  ;;  %v463_v42 = vsub.f32 %v399_v14, %v431_v23  ;;  %v476_v44 = vsub.f32 %v412_v18, %v444_v9  ;;  %v401_v25 = vadd.f32 %v1364_v33, %v1349_v26  ;;  %v147_v8 = vpop.xlane.xlu0 %146 }
 0x11b   :  { %v1399_v37 = vsel %vm584_vm0, %v947_v21, 0.0  ;;  %v949_v40 = vpop.eup %948  ;;  %v462_v43 = vsub.f32 %v398_v36, %v430_v22  ;;  %v1410_v47 = vadd.f32 %v1364_v33, %v1351_v27  ;;  %v524_v48 = vadd.f32 1.0, %v492_v15  ;;  %v882_v1 = vpop.f32.mrf.mxu0 }
 0x11c   :  { %617 = vadd.xlane.f32.xlu0 %v1399_v37  ;;  %964 = vrcp.f32 %v538_v34  ;;  %v541_v51 = vadd.f32 1.0, %v509_v38  ;;  %v508_v52 = vmax.f32 %v476_v44, 0.0  ;;  %v1415_v53 = vsel %vm584_vm0, %v949_v40, 0.0  ;;  %v149_v26 = vpop.xlane.xlu1 %148  ;;  %v354_v17 = vpop.f32.mrf.mxu1 }
 0x11d   :  { %v951_v46 = vpop.eup %950  ;;  %v415_v55 = vadd.f32 %v1364_v33, %v145_v24  ;;  %966 = vrcp.f32 %v525_v41  ;;  %v495_v27 = vmax.f32 %v463_v42, 0.0  ;;  %v433_v58 = vmul.f32 2.0, %v879_v32  ;;  %v284_v10 = vpop.f32.mrf.mxu0 }
 0x11e   :  { %651 = vadd.xlane.f32.xlu1 %v1403_v39  ;;  %v414_v59 = vadd.f32 %v1364_v33, %v143_v45  ;;  %v494_v61 = vmax.f32 %v462_v43, 0.0  ;;  %v432_v62 = vmul.f32 2.0, %v274_v49  ;;  %v1422_v63 = vsel %vm584_vm0, %v951_v46, 0.0  ;;  %v906_v40 = vpop.f32.mrf.mxu1 }
 0x11f   :  { %v953_v50 = vpop.eup %952  ;;  %v447_v0 = vmul.f32 2.0, %v900_v35  ;;  %968 = vrcp.f32 %v524_v48  ;;  %v540_v2 = vadd.f32 1.0, %v508_v52  ;;  %v446_v3 = vmul.f32 2.0, %v344_v19 }
 0x120   :  { %v955_v57 = vpop.eup %954  ;;  %649 = vadd.xlane.f32.xlu0 %v1415_v53  ;;  %v417_v56 = vadd.f32 %v1364_v33, %v149_v26  ;;  %970 = vrcp.f32 %v541_v51  ;;  %v1432_v7 = vsel %vm584_vm0, %v953_v50, 0.0  ;;  %v527_v12 = vadd.f32 1.0, %v495_v27  ;;  %v153_v32 = vpop.xlane.xlu1 %152 }
 0x121   :  { %v1428_v20 = vsel %vm584_vm0, %v955_v57, 0.0  ;;  %v479_v6 = vsub.f32 %v415_v55, %v447_v0  ;;  %v465_v13 = vsub.f32 %v401_v25, %v433_v58  ;;  %v478_v16 = vsub.f32 %v414_v59, %v446_v3  ;;  %v364_v55 = vpop.f32.mrf.mxu1  ;;  %v151_v26 = vpop.xlane.xlu0 %150 }
 0x122   :  { %623 = vadd.xlane.f32.xlu1 %v1422_v63  ;;  %v957_v4 = vpop.eup %956  ;;  %v526_v18 = vadd.f32 1.0, %v494_v61  ;;  %v464_v21 = vsub.f32 %v1410_v47, %v432_v62  ;;  %v449_v9 = vmul.f32 2.0, %v903_v60  ;;  %972 = vrcp.f32 %v540_v2  ;;  %v885_v47 = vpop.f32.mrf.mxu0 }
 0x123   :  { %v959_v11 = vpop.eup %958  ;;  %v511_v22 = vmax.f32 %v479_v6, 0.0  ;;  %v510_v14 = vmax.f32 %v478_v16, 0.0  ;;  %v416_v15 = vadd.f32 %v1364_v33, %v147_v8  ;;  %v448_v38 = vmul.f32 2.0, %v354_v17  ;;  %v909_v8 = vpop.f32.mrf.mxu1 }
 0x124   :  { %621 = vadd.xlane.f32.xlu0 %v1428_v20  ;;  %v961_v23 = vpop.eup %960  ;;  %v1440_v36 = vsel %vm584_vm0, %v959_v11, 0.0  ;;  %v481_v24 = vsub.f32 %v417_v56, %v449_v9  ;;  %v403_v41 = vadd.f32 %v1364_v33, %v1353_v28  ;;  %974 = vrcp.f32 %v527_v12  ;;  %v157_v61 = vpop.xlane.xlu1 %156 }
 0x125   :  { %v963_v34 = vpop.eup %962  ;;  %v543_v35 = vadd.f32 1.0, %v511_v22  ;;  %v497_v42 = vmax.f32 %v465_v13, 0.0  ;;  %v435_v43 = vmul.f32 2.0, %v882_v1  ;;  %976 = vrcp.f32 %v526_v18  ;;  %v294_v0 = vpop.f32.mrf.mxu0 }
 0x126   :  { %655 = vadd.xlane.f32.xlu1 %v1432_v7  ;;  %v496_v44 = vmax.f32 %v464_v21, 0.0  ;;  %v1447_v45 = vsel %vm584_vm0, %v957_v4, 0.0  ;;  %v419_v46 = vadd.f32 %v1364_v33, %v153_v32  ;;  %v434_v25 = vmul.f32 2.0, %v284_v10  ;;  %v155_v10 = vpop.xlane.xlu0 %154 }
 0x127   :  { %v542_v48 = vadd.f32 1.0, %v510_v14  ;;  %v1453_v28 = vsel %vm584_vm0, %v961_v23, 0.0  ;;  %v1457_v49 = vsel %vm584_vm0, %v963_v34, 0.0  ;;  %978 = vrcp.f32 %v543_v35  ;;  %v374_v35 = vpop.f32.mrf.mxu1 }
 0x128   :  { %653 = vadd.xlane.f32.xlu0 %v1440_v36  ;;  %v513_v50 = vmax.f32 %v481_v24, 0.0  ;;  %v480_v51 = vsub.f32 %v416_v15, %v448_v38  ;;  %v451_v52 = vmul.f32 2.0, %v906_v40  ;;  %v402_v57 = vadd.f32 %v1364_v33, %v1355_v29 }
 0x129   :  { %v965_v19 = vpop.eup %964  ;;  %v529_v27 = vadd.f32 1.0, %v497_v42  ;;  %v467_v58 = vsub.f32 %v403_v41, %v435_v43  ;;  %v528_v60 = vadd.f32 1.0, %v496_v44  ;;  %v450_v2 = vmul.f32 2.0, %v364_v55 }
 0x12a   :  { %627 = vadd.xlane.f32.xlu1 %v1447_v45  ;;  %v967_v59 = vpop.eup %966  ;;  %v466_v62 = vsub.f32 %v402_v57, %v434_v25  ;;  %v1465_v1 = vsel %vm584_vm0, %v965_v19, 0.0  ;;  %v418_v3 = vadd.f32 %v1364_v33, %v151_v26  ;;  %980 = vrcp.f32 %v542_v48 }
 0x12b   :  { %v545_v29 = vadd.f32 1.0, %v513_v50  ;;  %v512_v4 = vmax.f32 %v480_v51, 0.0  ;;  %v483_v6 = vsub.f32 %v419_v46, %v451_v52  ;;  %v405_v12 = vadd.f32 %v1364_v33, %v1357_v30 }
 0x12c   :  { %625 = vadd.xlane.f32.xlu0 %v1453_v28  ;;  %v969_v56 = vpop.eup %968  ;;  %982 = vrcp.f32 %v529_v27  ;;  %v499_v13 = vmax.f32 %v467_v58, 0.0  ;;  %v421_v16 = vadd.f32 %v1364_v33, %v157_v61  ;;  %v437_v17 = vmul.f32 2.0, %v885_v47 }
 0x12d   :  { %v971_v11 = vpop.eup %970  ;;  %984 = vrcp.f32 %v528_v60  ;;  %v436_v23 = vmul.f32 2.0, %v294_v0  ;;  %v1474_v18 = vsel %vm584_vm0, %v967_v59, 0.0  ;;  %v498_v21 = vmax.f32 %v466_v62, 0.0 }
 0x12e   :  { %659 = vadd.xlane.f32.xlu1 %v1457_v49  ;;  %v1479_v22 = vsel %vm584_vm0, %v969_v56, 0.0  ;;  %v482_v30 = vsub.f32 %v418_v3, %v450_v2  ;;  %v453_v9 = vmul.f32 2.0, %v909_v8  ;;  %986 = vrcp.f32 %v545_v29 }
 0x12f   :  { %v973_v14 = vpop.eup %972  ;;  %v544_v15 = vadd.f32 1.0, %v512_v4  ;;  %v515_v32 = vmax.f32 %v483_v6, 0.0  ;;  %v1483_v34 = vsel %vm584_vm0, %v971_v11, 0.0  ;;  %v404_v38 = vadd.f32 %v1364_v33, %v1359_v31 }
 0x130   :  { %657 = vadd.xlane.f32.xlu0 %v1465_v1  ;;  %v531_v40 = vadd.f32 1.0, %v499_v13  ;;  %v469_v41 = vsub.f32 %v405_v12, %v437_v17  ;;  %v420_v42 = vadd.f32 %v1364_v33, %v155_v10  ;;  %v530_v44 = vadd.f32 1.0, %v498_v21 }
 0x131   :  { %v975_v24 = vpop.eup %974  ;;  %v468_v46 = vsub.f32 %v404_v38, %v436_v23  ;;  %v514_v25 = vmax.f32 %v482_v30, 0.0  ;;  %v452_v47 = vmul.f32 2.0, %v374_v35  ;;  %988 = vrcp.f32 %v544_v15 }
 0x132   :  { %631 = vadd.xlane.f32.xlu1 %v1474_v18  ;;  %v977_v43 = vpop.eup %976  ;;  %v547_v48 = vadd.f32 1.0, %v515_v32  ;;  %v1492_v19 = vsel %vm584_vm0, %v973_v14, 0.0  ;;  %v485_v31 = vsub.f32 %v421_v16, %v453_v9  ;;  %990 = vrcp.f32 %v531_v40 }
 0x133   :  { %v501_v51 = vmax.f32 %v469_v41, 0.0  ;;  %v1497_v33 = vsel %vm584_vm0, %v975_v24, 0.0  ;;  %992 = vrcp.f32 %v530_v44  ;;  %v500_v52 = vmax.f32 %v468_v46, 0.0 }
 0x134   :  { %629 = vadd.xlane.f32.xlu0 %v1479_v22  ;;  %v979_v50 = vpop.eup %978  ;;  %v1502_v55 = vsel %vm584_vm0, %v977_v43, 0.0  ;;  %v484_v26 = vsub.f32 %v420_v42, %v452_v47  ;;  %994 = vrcp.f32 %v547_v48  ;;  %v546_v57 = vadd.f32 1.0, %v514_v25 }
 0x135   :  { %v517_v27 = vmax.f32 %v485_v31, 0.0  ;;  %v1506_v58 = vsel %vm584_vm0, %v979_v50, 0.0  ;;  %v533_v61 = vadd.f32 1.0, %v501_v51  ;;  %v532_v0 = vadd.f32 1.0, %v500_v52 }
 0x136   :  { %663 = vadd.xlane.f32.xlu1 %v1483_v34  ;;  %996 = vrcp.f32 %v546_v57  ;;  %v516_v3 = vmax.f32 %v484_v26, 0.0 }
 0x137   :  { %v981_v59 = vpop.eup %980  ;;  %v549_v2 = vadd.f32 1.0, %v517_v27  ;;  %998 = vrcp.f32 %v533_v61 }
 0x138   :  { %661 = vadd.xlane.f32.xlu0 %v1492_v19  ;;  %v1512_v56 = vsel %vm584_vm0, %v981_v59, 0.0  ;;  %1000 = vrcp.f32 %v532_v0  ;;  %v548_v6 = vadd.f32 1.0, %v516_v3 }
 0x139   :  { %v983_v60 = vpop.eup %982  ;;  %1002 = vrcp.f32 %v549_v2 }
 0x13a   :  { %635 = vadd.xlane.f32.xlu1 %v1497_v33  ;;  %v985_v62 = vpop.eup %984  ;;  %v1517_v4 = vsel %vm584_vm0, %v983_v60, 0.0  ;;  %1004 = vrcp.f32 %v548_v6 }
 0x13b   :  { %v987_v29 = vpop.eup %986  ;;  %v1522_v8 = vsel %vm584_vm0, %v985_v62, 0.0 }
 0x13c   :  { %633 = vadd.xlane.f32.xlu0 %v1502_v55  ;;  %v1526_v11 = vsel %vm584_vm0, %v987_v29, 0.0 }
 0x13e   :  { %667 = vadd.xlane.f32.xlu1 %v1506_v58  ;;  %v989_v12 = vpop.eup %988 }
 0x13f   :  { %v991_v13 = vpop.eup %990  ;;  %v1532_v17 = vsel %vm584_vm0, %v989_v12, 0.0 }
 0x140   :  { %665 = vadd.xlane.f32.xlu0 %v1512_v56  ;;  %v993_v16 = vpop.eup %992  ;;  %v1537_v21 = vsel %vm584_vm0, %v991_v13, 0.0 }
 0x141   :  { %v995_v23 = vpop.eup %994  ;;  %v1542_v30 = vsel %vm584_vm0, %v993_v16, 0.0 }
 0x142   :  { %639 = vadd.xlane.f32.xlu1 %v1517_v4  ;;  %v1546_v9 = vsel %vm584_vm0, %v995_v23, 0.0 }
 0x143   :  { %v997_v10 = vpop.eup %996 }
 0x144   :  { %637 = vadd.xlane.f32.xlu0 %v1522_v8  ;;  %v999_v14 = vpop.eup %998  ;;  %v1552_v32 = vsel %vm584_vm0, %v997_v10, 0.0 }
 0x145   :  { %v1001_v15 = vpop.eup %1000  ;;  %v1557_v38 = vsel %vm584_vm0, %v999_v14, 0.0 }
 0x146   :  { %671 = vadd.xlane.f32.xlu1 %v1526_v11  ;;  %v1003_v35 = vpop.eup %1002  ;;  %v1562_v24 = vsel %vm584_vm0, %v1001_v15, 0.0 }
 0x147   :  { %v1566_v40 = vsel %vm584_vm0, %v1003_v35, 0.0  ;;  %v1005_v41 = vpop.eup %1004 }
 0x148   :  { %669 = vadd.xlane.f32.xlu0 %v1532_v17  ;;  %v1572_v42 = vsel %vm584_vm0, %v1005_v41, 0.0 }
 0x14a   :  { %643 = vadd.xlane.f32.xlu1 %v1537_v21 }
 0x14c   :  { %641 = vadd.xlane.f32.xlu0 %v1542_v30 }
 0x14e   :  { %675 = vadd.xlane.f32.xlu1 %v1546_v9 }
 0x150   :  { %673 = vadd.xlane.f32.xlu0 %v1552_v32 }
 0x152   :  { %647 = vadd.xlane.f32.xlu1 %v1557_v38 }
 0x154   :  { %645 = vadd.xlane.f32.xlu0 %v1562_v24 }
 0x156   :  { %679 = vadd.xlane.f32.xlu1 %v1566_v40 }
 0x158   :  { %677 = vadd.xlane.f32.xlu0 %v1572_v42 }
 0x1a3   :  { %v620_v43 = vpop.xlane.xlu1 %619 }
 0x1a4   :  { %1006 = vrcp.f32 %v620_v43 }
 0x1a5   :  { %v618_v44 = vpop.xlane.xlu0 %617 }
 0x1a6   :  { %1008 = vrcp.f32 %v618_v44 }
 0x1a7   :  { %v652_v46 = vpop.xlane.xlu1 %651 }
 0x1a8   :  { %1010 = vrcp.f32 %v652_v46 }
 0x1a9   :  { %v650_v25 = vpop.xlane.xlu0 %649 }
 0x1aa   :  { %1012 = vrcp.f32 %v650_v25 }
 0x1ab   :  { %v624_v47 = vpop.xlane.xlu1 %623 }
 0x1ac   :  { %1014 = vrcp.f32 %v624_v47 }
 0x1ad   :  { %v622_v48 = vpop.xlane.xlu0 %621 }
 0x1ae   :  { %1016 = vrcp.f32 %v622_v48 }
 0x1af   :  { %v656_v31 = vpop.xlane.xlu1 %655 }
 0x1b0   :  { %1018 = vrcp.f32 %v656_v31 }
 0x1b1   :  { %v1007_v50 = vpop.eup %1006  ;;  %v654_v54 = vpop.xlane.xlu0 %653 }
 0x1b2   :  { %v684_v51 = vmul.f32 %v1007_v50, %v1390_v5  ;;  %1020 = vrcp.f32 %v654_v54 }
 0x1b3   :  { %v1009_v52 = vpop.eup %1008  ;;  %v628_v26 = vpop.xlane.xlu1 %627 }
 0x1b4   :  { %746 = vst [vmem:[%s1706_s3 + $0x8] sm:$0xff] %v684_v51  ;;  %v682_v57 = vmul.f32 %v1009_v52, %v1399_v37  ;;  %1022 = vrcp.f32 %v628_v26 }
 0x1b5   :  { %v1011_v27 = vpop.eup %1010  ;;  %v626_v59 = vpop.xlane.xlu0 %625 }
 0x1b6   :  { %745 = vst [vmem:[%s1706_s3] sm:$0xff] %v682_v57  ;;  %v716_v60 = vmul.f32 %v1011_v27, %v1403_v39  ;;  %1024 = vrcp.f32 %v626_v59 }
 0x1b7   :  { %v1013_v5 = vpop.eup %1012  ;;  %v660_v61 = vpop.xlane.xlu1 %659 }
 0x1b8   :  { %762 = vst [vmem:[%s1706_s3 + $0x88] sm:$0xff] %v716_v60  ;;  %v714_v62 = vmul.f32 %v1013_v5, %v1415_v53  ;;  %1026 = vrcp.f32 %v660_v61 }
 0x1b9   :  { %v1015_v37 = vpop.eup %1014  ;;  %v658_v0 = vpop.xlane.xlu0 %657 }
 0x1ba   :  { %761 = vst [vmem:[%s1706_s3 + $0x80] sm:$0xff] %v714_v62  ;;  %v688_v2 = vmul.f32 %v1015_v37, %v1422_v63  ;;  %1028 = vrcp.f32 %v658_v0 }
 0x1bb   :  { %v1017_v39 = vpop.eup %1016  ;;  %v632_v3 = vpop.xlane.xlu1 %631 }
 0x1bc   :  { %748 = vst [vmem:[%s1706_s3 + $0x18] sm:$0xff] %v688_v2  ;;  %v686_v29 = vmul.f32 %v1017_v39, %v1428_v20  ;;  %1030 = vrcp.f32 %v632_v3 }
 0x1bd   :  { %v1019_v53 = vpop.eup %1018  ;;  %v630_v6 = vpop.xlane.xlu0 %629 }
 0x1be   :  { %747 = vst [vmem:[%s1706_s3 + $0x10] sm:$0xff] %v686_v29  ;;  %v720_v12 = vmul.f32 %v1019_v53, %v1432_v7  ;;  %1032 = vrcp.f32 %v630_v6 }
 0x1bf   :  { %v1021_v63 = vpop.eup %1020  ;;  %v664_v13 = vpop.xlane.xlu1 %663 }
 0x1c0   :  { %764 = vst [vmem:[%s1706_s3 + $0x98] sm:$0xff] %v720_v12  ;;  %v718_v16 = vmul.f32 %v1021_v63, %v1440_v36  ;;  %1034 = vrcp.f32 %v664_v13 }
 0x1c1   :  { %v1023_v20 = vpop.eup %1022  ;;  %v662_v23 = vpop.xlane.xlu0 %661 }
 0x1c2   :  { %763 = vst [vmem:[%s1706_s3 + $0x90] sm:$0xff] %v718_v16  ;;  %v692_v10 = vmul.f32 %v1023_v20, %v1447_v45  ;;  %1036 = vrcp.f32 %v662_v23 }
 0x1c3   :  { %v1025_v7 = vpop.eup %1024  ;;  %v636_v14 = vpop.xlane.xlu1 %635 }
 0x1c4   :  { %750 = vst [vmem:[%s1706_s3 + $0x28] sm:$0xff] %v692_v10  ;;  %v690_v15 = vmul.f32 %v1025_v7, %v1453_v28  ;;  %1038 = vrcp.f32 %v636_v14 }
 0x1c5   :  { %v1027_v36 = vpop.eup %1026  ;;  %v634_v35 = vpop.xlane.xlu0 %633 }
 0x1c6   :  { %749 = vst [vmem:[%s1706_s3 + $0x20] sm:$0xff] %v690_v15  ;;  %v724_v41 = vmul.f32 %v1027_v36, %v1457_v49  ;;  %1040 = vrcp.f32 %v634_v35 }
 0x1c7   :  { %v1029_v45 = vpop.eup %1028  ;;  %v668_v43 = vpop.xlane.xlu1 %667 }
 0x1c8   :  { %766 = vst [vmem:[%s1706_s3 + $0xa8] sm:$0xff] %v724_v41  ;;  %v722_v44 = vmul.f32 %v1029_v45, %v1465_v1  ;;  %1042 = vrcp.f32 %v668_v43 }
 0x1c9   :  { %v1031_v28 = vpop.eup %1030  ;;  %v666_v46 = vpop.xlane.xlu0 %665 }
 0x1ca   :  { %765 = vst [vmem:[%s1706_s3 + $0xa0] sm:$0xff] %v722_v44  ;;  %v696_v25 = vmul.f32 %v1031_v28, %v1474_v18  ;;  %1044 = vrcp.f32 %v666_v46 }
 0x1cb   :  { %v1033_v49 = vpop.eup %1032  ;;  %v640_v47 = vpop.xlane.xlu1 %639 }
 0x1cc   :  { %752 = vst [vmem:[%s1706_s3 + $0x38] sm:$0xff] %v696_v25  ;;  %v694_v48 = vmul.f32 %v1033_v49, %v1479_v22  ;;  %1046 = vrcp.f32 %v640_v47 }
 0x1cd   :  { %v1035_v1 = vpop.eup %1034  ;;  %v638_v31 = vpop.xlane.xlu0 %637 }
 0x1ce   :  { %751 = vst [vmem:[%s1706_s3 + $0x30] sm:$0xff] %v694_v48  ;;  %v728_v50 = vmul.f32 %v1035_v1, %v1483_v34  ;;  %1048 = vrcp.f32 %v638_v31 }
 0x1cf   :  { %v1037_v18 = vpop.eup %1036  ;;  %v672_v54 = vpop.xlane.xlu1 %671 }
 0x1d0   :  { %768 = vst [vmem:[%s1706_s3 + $0xb8] sm:$0xff] %v728_v50  ;;  %v726_v51 = vmul.f32 %v1037_v18, %v1492_v19  ;;  %1050 = vrcp.f32 %v672_v54 }
 0x1d1   :  { %v1039_v22 = vpop.eup %1038  ;;  %v670_v52 = vpop.xlane.xlu0 %669 }
 0x1d2   :  { %767 = vst [vmem:[%s1706_s3 + $0xb0] sm:$0xff] %v726_v51  ;;  %v700_v26 = vmul.f32 %v1039_v22, %v1497_v33  ;;  %1052 = vrcp.f32 %v670_v52 }
 0x1d3   :  { %v1041_v34 = vpop.eup %1040  ;;  %v644_v57 = vpop.xlane.xlu1 %643 }
 0x1d4   :  { %754 = vst [vmem:[%s1706_s3 + $0x48] sm:$0xff] %v700_v26  ;;  %v698_v27 = vmul.f32 %v1041_v34, %v1502_v55  ;;  %1054 = vrcp.f32 %v644_v57 }
 0x1d5   :  { %v1043_v19 = vpop.eup %1042  ;;  %v642_v59 = vpop.xlane.xlu0 %641 }
 0x1d6   :  { %753 = vst [vmem:[%s1706_s3 + $0x40] sm:$0xff] %v698_v27  ;;  %v732_v60 = vmul.f32 %v1043_v19, %v1506_v58  ;;  %1056 = vrcp.f32 %v642_v59 }
 0x1d7   :  { %v1045_v33 = vpop.eup %1044  ;;  %v676_v5 = vpop.xlane.xlu1 %675 }
 0x1d8   :  { %770 = vst [vmem:[%s1706_s3 + $0xc8] sm:$0xff] %v732_v60  ;;  %v730_v61 = vmul.f32 %v1045_v33, %v1512_v56  ;;  %1058 = vrcp.f32 %v676_v5 }
 0x1d9   :  { %v1047_v55 = vpop.eup %1046  ;;  %v674_v62 = vpop.xlane.xlu0 %673 }
 0x1da   :  { %769 = vst [vmem:[%s1706_s3 + $0xc0] sm:$0xff] %v730_v61  ;;  %v704_v37 = vmul.f32 %v1047_v55, %v1517_v4  ;;  %1060 = vrcp.f32 %v674_v62 }
 0x1db   :  { %v1049_v58 = vpop.eup %1048  ;;  %v648_v0 = vpop.xlane.xlu1 %647 }
 0x1dc   :  { %756 = vst [vmem:[%s1706_s3 + $0x58] sm:$0xff] %v704_v37  ;;  %v702_v2 = vmul.f32 %v1049_v58, %v1522_v8  ;;  %1062 = vrcp.f32 %v648_v0 }
 0x1dd   :  { %v1051_v56 = vpop.eup %1050  ;;  %v646_v39 = vpop.xlane.xlu0 %645 }
 0x1de   :  { %755 = vst [vmem:[%s1706_s3 + $0x50] sm:$0xff] %v702_v2  ;;  %v736_v3 = vmul.f32 %v1051_v56, %v1526_v11  ;;  %1064 = vrcp.f32 %v646_v39 }
 0x1df   :  { %v1053_v4 = vpop.eup %1052  ;;  %v680_v29 = vpop.xlane.xlu1 %679 }
 0x1e0   :  { %772 = vst [vmem:[%s1706_s3 + $0xd8] sm:$0xff] %v736_v3  ;;  %v734_v53 = vmul.f32 %v1053_v4, %v1532_v17  ;;  %1066 = vrcp.f32 %v680_v29 }
 0x1e1   :  { %v1055_v8 = vpop.eup %1054  ;;  %v678_v6 = vpop.xlane.xlu0 %677 }
 0x1e2   :  { %771 = vst [vmem:[%s1706_s3 + $0xd0] sm:$0xff] %v734_v53  ;;  %v708_v12 = vmul.f32 %v1055_v8, %v1537_v21  ;;  %1068 = vrcp.f32 %v678_v6 }
 0x1e3   :  { %v1057_v11 = vpop.eup %1056 }
 0x1e4   :  { %758 = vst [vmem:[%s1706_s3 + $0x68] sm:$0xff] %v708_v12  ;;  %v706_v63 = vmul.f32 %v1057_v11, %v1542_v30 }
 0x1e5   :  { %v1059_v13 = vpop.eup %1058 }
 0x1e6   :  { %757 = vst [vmem:[%s1706_s3 + $0x60] sm:$0xff] %v706_v63  ;;  %v740_v17 = vmul.f32 %v1059_v13, %v1546_v9 }
 0x1e7   :  { %v1061_v16 = vpop.eup %1060 }
 0x1e8   :  { %774 = vst [vmem:[%s1706_s3 + $0xe8] sm:$0xff] %v740_v17  ;;  %v738_v21 = vmul.f32 %v1061_v16, %v1552_v32 }
 0x1e9   :  { %v1063_v20 = vpop.eup %1062 }
 0x1ea   :  { %773 = vst [vmem:[%s1706_s3 + $0xe0] sm:$0xff] %v738_v21  ;;  %v712_v30 = vmul.f32 %v1063_v20, %v1557_v38 }
 0x1eb   :  { %v1065_v23 = vpop.eup %1064 }
 0x1ec   :  { %760 = vst [vmem:[%s1706_s3 + $0x78] sm:$0xff] %v712_v30  ;;  %v710_v9 = vmul.f32 %v1065_v23, %v1562_v24 }
 0x1ed   :  { %v1067_v10 = vpop.eup %1066 }
 0x1ee   :  { %759 = vst [vmem:[%s1706_s3 + $0x70] sm:$0xff] %v710_v9  ;;  %v744_v32 = vmul.f32 %v1067_v10, %v1566_v40 }
 0x1ef   :  { %v1069_v7 = vpop.eup %1068 }
 0x1f0   :  { %776 = vst [vmem:[%s1706_s3 + $0xf8] sm:$0xff] %v744_v32  ;;  %v742_v38 = vmul.f32 %v1069_v7, %v1572_v42 }
 0x1f2   :  { %775 = vst [vmem:[%s1706_s3 + $0xf0] sm:$0xff] %v742_v38 }

// kernel: gcn_forward.4
= control target key start
LH: loop header
LB: loop body
LE: loop exit
PB: predicated region body
PF: predicated region fallthrough
CT: control target
= control target key end

     0   :  { %s1740_s0 = inlined_call_operand.vmem [shape: bf16[256,128], index: 0, kind: input, shape index: {}, may-alias: {0,1}]   ;;  %s1741_s1 = inlined_call_operand.vmem [shape: bf16[256,128], index: 1, kind: input, shape index: {}, may-alias: {0,1}]   ;;  %s1742_s2 = inlined_call_operand.hbm [shape: bf16[256,256], index: 2, kind: output, shape index: {}]  }
   0x1   :  { %v1313_v0 = vld [vmem:[%s1741_s1 + $0x78] sm:$0xff]   ;;  %v1315_v2 = vld [vmem:[%s1741_s1 + $0x70] sm:$0xff]   ;;  %v1317_v4 = vld [vmem:[%s1741_s1 + $0x68] sm:$0xff]  }
   0x2   :  { %v1314_v1 = vld [vmem:[%s1741_s1 + $0x38] sm:$0xff]   ;;  %1246 = vmatprep.subr.bf16.mxu0 %v1313_v0  ;;  %1294 = vmatprep.subr.bf16.mxu1 %v1313_v0  ;;  %v1316_v3 = vld [vmem:[%s1741_s1 + $0x30] sm:$0xff]   ;;  %v1318_v5 = vld [vmem:[%s1741_s1 + $0x28] sm:$0xff]  }
   0x3   :  { %1247 = vmatpush3.bf16.xpose.msra.mxu0 %v1314_v1  ;;  %1302 = vmatpush3.bf16.xpose.msra.mxu1 %v1314_v1  ;;  %v1319_v6 = vld [vmem:[%s1741_s1 + $0x60] sm:$0xff]   ;;  %v1321_v10 = vld [vmem:[%s1741_s1 + $0x58] sm:$0xff]   ;;  %v1323_v12 = vld [vmem:[%s1741_s1 + $0x50] sm:$0xff]  }
   0x4   :  { %1248 = vmatprep.subr.bf16.mxu0 %v1315_v2  ;;  %1295 = vmatprep.subr.bf16.mxu1 %v1315_v2  ;;  %v1329_v7 = vld [vmem:[%s1740_s0] sm:$0xff]   ;;  %v1322_v11 = vld [vmem:[%s1741_s1 + $0x18] sm:$0xff]  }
   0x5   :  { %v1330_v8 = vld [vmem:[%s1740_s0 + $0x40] sm:$0xff]   ;;  %1262 = vmatprep.mubr.bf16.mxu0 %v1329_v7 }
   0x6   :  { %1278 = vmatprep.mubr.bf16.mxu1 %v1330_v8  ;;  %v1320_v9 = vld [vmem:[%s1741_s1 + $0x20] sm:$0xff]  }
   0xb   :  { %1249 = vmatpush3.bf16.xpose.msra.mxu0 %v1316_v3  ;;  %1303 = vmatpush3.bf16.xpose.msra.mxu1 %v1316_v3 }
   0xc   :  { %1250 = vmatprep.subr.bf16.mxu0 %v1317_v4  ;;  %1296 = vmatprep.subr.bf16.mxu1 %v1317_v4 }
  0x13   :  { %1251 = vmatpush3.bf16.xpose.msra.mxu0 %v1318_v5  ;;  %1304 = vmatpush3.bf16.xpose.msra.mxu1 %v1318_v5 }
  0x14   :  { %1252 = vmatprep.subr.bf16.mxu0 %v1319_v6  ;;  %1297 = vmatprep.subr.bf16.mxu1 %v1319_v6 }
  0x1b   :  { %1253 = vmatpush3.bf16.xpose.msra.mxu0 %v1320_v9  ;;  %1305 = vmatpush3.bf16.xpose.msra.mxu1 %v1320_v9 }
  0x1c   :  { %1254 = vmatprep.subr.bf16.mxu0 %v1321_v10  ;;  %1298 = vmatprep.subr.bf16.mxu1 %v1321_v10 }
  0x1d   :  { %7 = vsyncpa [#allocation3], 0  ;;  %v1324_v13 = vld [vmem:[%s1741_s1 + $0x10] sm:$0xff]   ;;  %v1325_v14 = vld [vmem:[%s1741_s1 + $0x48] sm:$0xff]  }
  0x1e   :  { %v1326_v15 = vld [vmem:[%s1741_s1 + $0x8] sm:$0xff]   ;;  %v1327_v16 = vld [vmem:[%s1741_s1 + $0x40] sm:$0xff]   ;;  %v1333_v20 = vld [vmem:[%s1740_s0 + $0x10] sm:$0xff]  }
  0x1f   :  { %v1328_v17 = vld [vmem:[%s1741_s1] sm:$0xff]   ;;  %v1331_v18 = vld [vmem:[%s1740_s0 + $0x8] sm:$0xff]   ;;  %v1334_v21 = vld [vmem:[%s1740_s0 + $0x50] sm:$0xff]  }
  0x20   :  { %v1332_v19 = vld [vmem:[%s1740_s0 + $0x48] sm:$0xff]   ;;  %v1335_v22 = vld [vmem:[%s1740_s0 + $0x18] sm:$0xff]   ;;  %v1337_v24 = vld [vmem:[%s1740_s0 + $0x20] sm:$0xff]  }
  0x21   :  { %v1336_v23 = vld [vmem:[%s1740_s0 + $0x58] sm:$0xff]   ;;  %v1338_v25 = vld [vmem:[%s1740_s0 + $0x60] sm:$0xff]   ;;  %v1339_v26 = vld [vmem:[%s1740_s0 + $0x28] sm:$0xff]  }
  0x22   :  { %v1340_v27 = vld [vmem:[%s1740_s0 + $0x68] sm:$0xff]   ;;  %v1341_v28 = vld [vmem:[%s1740_s0 + $0x30] sm:$0xff]   ;;  %v1343_v30 = vld [vmem:[%s1740_s0 + $0x38] sm:$0xff]  }
  0x23   :  { %1255 = vmatpush3.bf16.xpose.msra.mxu0 %v1322_v11  ;;  %1306 = vmatpush3.bf16.xpose.msra.mxu1 %v1322_v11  ;;  %v1342_v29 = vld [vmem:[%s1740_s0 + $0x70] sm:$0xff]   ;;  %v1344_v31 = vld [vmem:[%s1740_s0 + $0x78] sm:$0xff]   ;;  %s1623_s0 = smov [#allocation2]  }
  0x24   :  { %1256 = vmatprep.subr.bf16.mxu0 %v1323_v12  ;;  %1299 = vmatprep.subr.bf16.mxu1 %v1323_v12  ;;  %s1075_s16 = sshll.u32 %s1623_s0, 4  ;;  %s1076_s16 = int_to_ptr.vmem [resolvable:$true] %s1075_s16 }
  0x25   :  { %s1601_s17 = scalar_lea.vmem %s1076_s16, 4096  ;;  %p1606_p1 = scmp.lt.s32.totalorder %s1076_s16, %s1076_s16 }
  0x26   :  { %p1602_p0 = scmp.ne.s32.totalorder %s1076_s16, %s1601_s17  ;;  %p1607_p2 = scmp.lt.s32.totalorder %s1601_s17, %s1601_s17 }
  0x28   :  { %p1608_p3 = por %p1607_p2, %p1606_p1 }
  0x2a   :  { %p1609_p4 = pnand %p1608_p3, %p1602_p0 }
  0x2b   :  { %1257 = vmatpush3.bf16.xpose.msra.mxu0 %v1324_v13  ;;  %1307 = vmatpush3.bf16.xpose.msra.mxu1 %v1324_v13 }
  0x2c   :  { %1258 = vmatprep.subr.bf16.mxu0 %v1325_v14  ;;  %1300 = vmatprep.subr.bf16.mxu1 %v1325_v14 }
  0x33   :  { %1259 = vmatpush3.bf16.xpose.msra.mxu0 %v1326_v15  ;;  %1308 = vmatpush3.bf16.xpose.msra.mxu1 %v1326_v15 }
  0x34   :  { %1260 = vmatprep.subr.bf16.mxu0 %v1327_v16  ;;  %1301 = vmatprep.subr.bf16.mxu1 %v1327_v16 }
  0x3b   :  { %1261 = vmatpush3.bf16.xpose.msra.mxu0 %v1328_v17  ;;  %1309 = vmatpush3.bf16.xpose.msra.mxu1 %v1328_v17 }
  0x42   :  { %1263 = vmatmul.mubr.bf16.vlgmr.msra.gmra.mxu0 %v1329_v7  ;;  %1279 = vmatmul.mubr.bf16.vlgmr.msra.gmra.mxu1 %v1330_v8 }
  0x43   :  { %1264 = vmatprep.mubr.bf16.mxu0 %v1331_v18  ;;  %1280 = vmatprep.mubr.bf16.mxu1 %v1332_v19 }
  0x4a   :  { %1265 = vmatmul.mubr.bf16.gmra.mxu0 %v1331_v18  ;;  %1281 = vmatmul.mubr.bf16.gmra.mxu1 %v1332_v19 }
  0x4b   :  { %1266 = vmatprep.mubr.bf16.mxu0 %v1333_v20  ;;  %1282 = vmatprep.mubr.bf16.mxu1 %v1334_v21 }
  0x52   :  { %1267 = vmatmul.mubr.bf16.gmra.mxu0 %v1333_v20  ;;  %1283 = vmatmul.mubr.bf16.gmra.mxu1 %v1334_v21 }
  0x53   :  { %1268 = vmatprep.mubr.bf16.mxu0 %v1335_v22  ;;  %1284 = vmatprep.mubr.bf16.mxu1 %v1336_v23 }
  0x5a   :  { %1269 = vmatmul.mubr.bf16.gmra.mxu0 %v1335_v22  ;;  %1285 = vmatmul.mubr.bf16.gmra.mxu1 %v1336_v23 }
  0x5b   :  { %1270 = vmatprep.mubr.bf16.mxu0 %v1337_v24  ;;  %1286 = vmatprep.mubr.bf16.mxu1 %v1338_v25 }
  0x62   :  { %1271 = vmatmul.mubr.bf16.gmra.mxu0 %v1337_v24  ;;  %1287 = vmatmul.mubr.bf16.gmra.mxu1 %v1338_v25 }
  0x63   :  { %1272 = vmatprep.mubr.bf16.mxu0 %v1339_v26  ;;  %1288 = vmatprep.mubr.bf16.mxu1 %v1340_v27 }
  0x6a   :  { %1273 = vmatmul.mubr.bf16.gmra.mxu0 %v1339_v26  ;;  %1289 = vmatmul.mubr.bf16.gmra.mxu1 %v1340_v27 }
  0x6b   :  { %1274 = vmatprep.mubr.bf16.mxu0 %v1341_v28  ;;  %1290 = vmatprep.mubr.bf16.mxu1 %v1342_v29 }
  0x72   :  { %1275 = vmatmul.mubr.bf16.gmra.mxu0 %v1341_v28  ;;  %1291 = vmatmul.mubr.bf16.gmra.mxu1 %v1342_v29 }
  0x73   :  { %1276 = vmatprep.mubr.bf16.mxu0 %v1343_v30  ;;  %1292 = vmatprep.mubr.bf16.mxu1 %v1344_v31 }
  0x7a   :  { %1277 = vmatmul.mubr.bf16.gmra.mxu0 %v1343_v30  ;;  %1293 = vmatmul.mubr.bf16.gmra.mxu1 %v1344_v31 }
 0x102   :  { %v303_v32 = vpop.f32.mrf.mxu0  ;;  %v383_v33 = vpop.f32.mrf.mxu1 }
 0x103   :  { %v1118_v34 = vmul.f32 -1.442695, %v303_v32  ;;  %v1150_v35 = vmul.f32 -1.442695, %v383_v33 }
 0x104   :  { %v305_v36 = vpop.f32.mrf.mxu0  ;;  %v385_v37 = vpop.f32.mrf.mxu1 }
 0x105   :  { %1345 = vpow2.f32 %v1118_v34  ;;  %v1119_v38 = vmul.f32 -1.442695, %v305_v36  ;;  %v1151_v39 = vmul.f32 -1.442695, %v385_v37 }
 0x106   :  { %1347 = vpow2.f32 %v1150_v35  ;;  %v307_v40 = vpop.f32.mrf.mxu0  ;;  %v387_v41 = vpop.f32.mrf.mxu1 }
 0x107   :  { %1349 = vpow2.f32 %v1119_v38  ;;  %v1120_v42 = vmul.f32 -1.442695, %v307_v40  ;;  %v1152_v43 = vmul.f32 -1.442695, %v387_v41 }
 0x108   :  { %1351 = vpow2.f32 %v1151_v39  ;;  %v309_v44 = vpop.f32.mrf.mxu0  ;;  %v389_v45 = vpop.f32.mrf.mxu1 }
 0x109   :  { %1353 = vpow2.f32 %v1120_v42  ;;  %v1121_v46 = vmul.f32 -1.442695, %v309_v44  ;;  %v1153_v47 = vmul.f32 -1.442695, %v389_v45 }
 0x10a   :  { %1355 = vpow2.f32 %v1152_v43  ;;  %v313_v48 = vpop.f32.mrf.mxu0  ;;  %v393_v49 = vpop.f32.mrf.mxu1 }
 0x10b   :  { %1357 = vpow2.f32 %v1121_v46  ;;  %v1122_v50 = vmul.f32 -1.442695, %v313_v48  ;;  %v1154_v51 = vmul.f32 -1.442695, %v393_v49 }
 0x10c   :  { %1359 = vpow2.f32 %v1153_v47  ;;  %v315_v52 = vpop.f32.mrf.mxu0  ;;  %v395_v53 = vpop.f32.mrf.mxu1 }
 0x10d   :  { %1361 = vpow2.f32 %v1122_v50  ;;  %v1123_v54 = vmul.f32 -1.442695, %v315_v52  ;;  %v1155_v55 = vmul.f32 -1.442695, %v395_v53 }
 0x10e   :  { %1363 = vpow2.f32 %v1154_v51  ;;  %v317_v56 = vpop.f32.mrf.mxu0  ;;  %v397_v57 = vpop.f32.mrf.mxu1 }
 0x10f   :  { %1365 = vpow2.f32 %v1123_v54  ;;  %v1124_v58 = vmul.f32 -1.442695, %v317_v56  ;;  %v1156_v59 = vmul.f32 -1.442695, %v397_v57 }
 0x110   :  { %1367 = vpow2.f32 %v1155_v55  ;;  %v319_v60 = vpop.f32.mrf.mxu0  ;;  %v399_v61 = vpop.f32.mrf.mxu1 }
 0x111   :  { %1369 = vpow2.f32 %v1124_v58  ;;  %v1125_v62 = vmul.f32 -1.442695, %v319_v60  ;;  %v1157_v63 = vmul.f32 -1.442695, %v399_v61 }
 0x112   :  { %v1346_v0 = vpop.eup %1345  ;;  %1371 = vpow2.f32 %v1156_v59  ;;  %v323_v1 = vpop.f32.mrf.mxu0 }
 0x113   :  { %v403_v2 = vpop.f32.mrf.mxu1  ;;  %v1348_v3 = vpop.eup %1347  ;;  %v654_v4 = vadd.f32 1.0, %v1346_v0  ;;  %1373 = vpow2.f32 %v1125_v62  ;;  %v1126_v40 = vmul.f32 -1.442695, %v323_v1 }
 0x114   :  { %v1350_v5 = vpop.eup %1349  ;;  %v686_v6 = vadd.f32 1.0, %v1348_v3  ;;  %1375 = vpow2.f32 %v1157_v63  ;;  %v325_v7 = vpop.f32.mrf.mxu0  ;;  %v1158_v44 = vmul.f32 -1.442695, %v403_v2 }
 0x115   :  { %v1352_v8 = vpop.eup %1351  ;;  %1377 = vrcp.f32 %v654_v4  ;;  %v655_v9 = vadd.f32 1.0, %v1350_v5  ;;  %v405_v10 = vpop.f32.mrf.mxu1  ;;  %v1127_v46 = vmul.f32 -1.442695, %v325_v7 }
 0x116   :  { %v1354_v11 = vpop.eup %1353  ;;  %1379 = vrcp.f32 %v686_v6  ;;  %v687_v12 = vadd.f32 1.0, %v1352_v8  ;;  %v327_v17 = vpop.f32.mrf.mxu0  ;;  %v1159_v48 = vmul.f32 -1.442695, %v405_v10 }
 0x117   :  { %v1356_v13 = vpop.eup %1355  ;;  %1381 = vrcp.f32 %v655_v9  ;;  %v656_v14 = vadd.f32 1.0, %v1354_v11  ;;  %v407_v20 = vpop.f32.mrf.mxu1  ;;  %v1128_v52 = vmul.f32 -1.442695, %v327_v17 }
 0x118   :  { %v1358_v15 = vpop.eup %1357  ;;  %1383 = vrcp.f32 %v687_v12  ;;  %v688_v16 = vadd.f32 1.0, %v1356_v13  ;;  %v329_v27 = vpop.f32.mrf.mxu0  ;;  %v1160_v56 = vmul.f32 -1.442695, %v407_v20 }
 0x119   :  { %v1360_v18 = vpop.eup %1359  ;;  %1385 = vrcp.f32 %v656_v14  ;;  %v657_v19 = vadd.f32 1.0, %v1358_v15  ;;  %v409_v30 = vpop.f32.mrf.mxu1  ;;  %v1129_v58 = vmul.f32 -1.442695, %v329_v27 }
 0x11a   :  { %v1362_v21 = vpop.eup %1361  ;;  %1387 = vrcp.f32 %v688_v16  ;;  %v689_v22 = vadd.f32 1.0, %v1360_v18  ;;  %v333_v37 = vpop.f32.mrf.mxu0  ;;  %v1161_v60 = vmul.f32 -1.442695, %v409_v30 }
 0x11b   :  { %v1364_v23 = vpop.eup %1363  ;;  %1389 = vrcp.f32 %v657_v19  ;;  %v658_v24 = vadd.f32 1.0, %v1362_v21  ;;  %v413_v41 = vpop.f32.mrf.mxu1  ;;  %v1130_v0 = vmul.f32 -1.442695, %v333_v37 }
 0x11c   :  { %v1366_v25 = vpop.eup %1365  ;;  %1391 = vrcp.f32 %v689_v22  ;;  %v690_v26 = vadd.f32 1.0, %v1364_v23  ;;  %v335_v49 = vpop.f32.mrf.mxu0  ;;  %v1162_v4 = vmul.f32 -1.442695, %v413_v41 }
 0x11d   :  { %v1368_v28 = vpop.eup %1367  ;;  %1393 = vrcp.f32 %v658_v24  ;;  %v659_v29 = vadd.f32 1.0, %v1366_v25  ;;  %v415_v53 = vpop.f32.mrf.mxu1  ;;  %v1131_v6 = vmul.f32 -1.442695, %v335_v49 }
 0x11e   :  { %v1370_v31 = vpop.eup %1369  ;;  %1395 = vrcp.f32 %v690_v26  ;;  %v691_v32 = vadd.f32 1.0, %v1368_v28  ;;  %v337_v61 = vpop.f32.mrf.mxu0  ;;  %v1163_v8 = vmul.f32 -1.442695, %v415_v53 }
 0x11f   :  { %v1372_v33 = vpop.eup %1371  ;;  %1397 = vrcp.f32 %v659_v29  ;;  %v660_v34 = vadd.f32 1.0, %v1370_v31  ;;  %v417_v1 = vpop.f32.mrf.mxu1  ;;  %v1132_v12 = vmul.f32 -1.442695, %v337_v61 }
 0x120   :  { %v1374_v35 = vpop.eup %1373  ;;  %1399 = vrcp.f32 %v691_v32  ;;  %v692_v36 = vadd.f32 1.0, %v1372_v33  ;;  %v339_v9 = vpop.f32.mrf.mxu0  ;;  %v1164_v16 = vmul.f32 -1.442695, %v417_v1 }
 0x121   :  { %v1376_v38 = vpop.eup %1375  ;;  %1401 = vrcp.f32 %v660_v34  ;;  %v661_v39 = vadd.f32 1.0, %v1374_v35  ;;  %v419_v13 = vpop.f32.mrf.mxu1  ;;  %v1133_v18 = vmul.f32 -1.442695, %v339_v9 }
 0x122   :  { %v1378_v42 = vpop.eup %1377  ;;  %1403 = vrcp.f32 %v692_v36  ;;  %v693_v43 = vadd.f32 1.0, %v1376_v38  ;;  %v1165_v20 = vmul.f32 -1.442695, %v419_v13  ;;  %v343_v21 = vpop.f32.mrf.mxu0 }
 0x123   :  { %v1380_v45 = vpop.eup %1379  ;;  %1405 = vrcp.f32 %v661_v39  ;;  %v423_v24 = vpop.f32.mrf.mxu1 }
 0x124   :  { %v1382_v47 = vpop.eup %1381  ;;  %1407 = vrcp.f32 %v693_v43  ;;  %v345_v31 = vpop.f32.mrf.mxu0 }
 0x125   :  { %v1384_v50 = vpop.eup %1383  ;;  %v1214_v51 = vpack.c.bf16 %v1382_v47, %v1378_v42  ;;  %1409 = vpow2.f32 %v1126_v40  ;;  %v425_v34 = vpop.f32.mrf.mxu1 }
 0x126   :  { %v1386_v54 = vpop.eup %1385  ;;  %v1230_v55 = vpack.c.bf16 %v1384_v50, %v1380_v45  ;;  %1411 = vpow2.f32 %v1158_v44  ;;  %v347_v41 = vpop.f32.mrf.mxu0 }
 0x127   :  { %v1388_v57 = vpop.eup %1387  ;;  %1038 = vst [vmem:[#allocation2] sm:$0xff] %v1214_v51  ;;  %1413 = vpow2.f32 %v1127_v46  ;;  %v427_v44 = vpop.f32.mrf.mxu1 }
 0x128   :  { %v1390_v59 = vpop.eup %1389  ;;  %1054 = vst [vmem:[#allocation2 + $0x80] sm:$0xff] %v1230_v55  ;;  %1415 = vpow2.f32 %v1159_v48  ;;  %v349_v51 = vpop.f32.mrf.mxu0 }
 0x129   :  { %v1392_v62 = vpop.eup %1391  ;;  %v1215_v63 = vpack.c.bf16 %v1390_v59, %v1386_v54  ;;  %1417 = vpow2.f32 %v1128_v52  ;;  %v429_v54 = vpop.f32.mrf.mxu1 }
 0x12a   :  { %v1394_v2 = vpop.eup %1393  ;;  %v1231_v3 = vpack.c.bf16 %v1392_v62, %v1388_v57  ;;  %1419 = vpow2.f32 %v1160_v56  ;;  %v353_v61 = vpop.f32.mrf.mxu0 }
 0x12b   :  { %v1396_v5 = vpop.eup %1395  ;;  %1039 = vst [vmem:[#allocation2 + $0x8] sm:$0xff] %v1215_v63  ;;  %1421 = vpow2.f32 %v1129_v58  ;;  %v433_v1 = vpop.f32.mrf.mxu1 }
 0x12c   :  { %v1398_v7 = vpop.eup %1397  ;;  %1055 = vst [vmem:[#allocation2 + $0x88] sm:$0xff] %v1231_v3  ;;  %1423 = vpow2.f32 %v1161_v60  ;;  %v355_v9 = vpop.f32.mrf.mxu0 }
 0x12d   :  { %v1400_v10 = vpop.eup %1399  ;;  %v1216_v11 = vpack.c.bf16 %v1398_v7, %v1394_v2  ;;  %1425 = vpow2.f32 %v1130_v0  ;;  %v1134_v0 = vmul.f32 -1.442695, %v343_v21  ;;  %v435_v13 = vpop.f32.mrf.mxu1 }
 0x12e   :  { %v1402_v14 = vpop.eup %1401  ;;  %v1232_v15 = vpack.c.bf16 %v1400_v10, %v1396_v5  ;;  %1427 = vpow2.f32 %v1162_v4  ;;  %v1166_v4 = vmul.f32 -1.442695, %v423_v24  ;;  %v357_v21 = vpop.f32.mrf.mxu0  ;;  %v1138_v24 = vmul.f32 -1.442695, %v353_v61 }
 0x12f   :  { %v1404_v17 = vpop.eup %1403  ;;  %1040 = vst [vmem:[#allocation2 + $0x10] sm:$0xff] %v1216_v11  ;;  %1429 = vpow2.f32 %v1131_v6  ;;  %v1135_v6 = vmul.f32 -1.442695, %v345_v31 }
 0x130   :  { %v1406_v19 = vpop.eup %1405  ;;  %1056 = vst [vmem:[#allocation2 + $0x90] sm:$0xff] %v1232_v15  ;;  %1431 = vpow2.f32 %v1163_v8  ;;  %v1167_v8 = vmul.f32 -1.442695, %v425_v34 }
 0x131   :  { %v1408_v22 = vpop.eup %1407  ;;  %v1217_v23 = vpack.c.bf16 %v1406_v19, %v1402_v14  ;;  %1433 = vpow2.f32 %v1132_v12  ;;  %v1136_v12 = vmul.f32 -1.442695, %v347_v41 }
 0x132   :  { %v1410_v25 = vpop.eup %1409  ;;  %v1233_v26 = vpack.c.bf16 %v1408_v22, %v1404_v17  ;;  %1435 = vpow2.f32 %v1164_v16  ;;  %v1168_v16 = vmul.f32 -1.442695, %v427_v44 }
 0x133   :  { %v1412_v27 = vpop.eup %1411  ;;  %1041 = vst [vmem:[#allocation2 + $0x18] sm:$0xff] %v1217_v23  ;;  %v662_v28 = vadd.f32 1.0, %v1410_v25  ;;  %1437 = vpow2.f32 %v1133_v18  ;;  %v1137_v18 = vmul.f32 -1.442695, %v349_v51  ;;  %v437_v25 = vpop.f32.mrf.mxu1 }
 0x134   :  { %v1414_v29 = vpop.eup %1413  ;;  %1057 = vst [vmem:[#allocation2 + $0x98] sm:$0xff] %v1233_v26  ;;  %v694_v30 = vadd.f32 1.0, %v1412_v27  ;;  %1439 = vpow2.f32 %v1165_v20  ;;  %v1169_v20 = vmul.f32 -1.442695, %v429_v54 }
 0x135   :  { %v1416_v32 = vpop.eup %1415  ;;  %1441 = vrcp.f32 %v662_v28  ;;  %v663_v33 = vadd.f32 1.0, %v1414_v29  ;;  %v1170_v28 = vmul.f32 -1.442695, %v433_v1 }
 0x136   :  { %v1418_v35 = vpop.eup %1417  ;;  %1443 = vrcp.f32 %v694_v30  ;;  %v695_v36 = vadd.f32 1.0, %v1416_v32  ;;  %v1139_v30 = vmul.f32 -1.442695, %v355_v9  ;;  %v1171_v32 = vmul.f32 -1.442695, %v435_v13 }
 0x137   :  { %v1420_v37 = vpop.eup %1419  ;;  %1445 = vrcp.f32 %v663_v33  ;;  %v664_v38 = vadd.f32 1.0, %v1418_v35  ;;  %v359_v33 = vpop.f32.mrf.mxu0 }
 0x138   :  { %v1422_v39 = vpop.eup %1421  ;;  %1447 = vrcp.f32 %v695_v36  ;;  %v696_v40 = vadd.f32 1.0, %v1420_v37  ;;  %v1140_v36 = vmul.f32 -1.442695, %v357_v21  ;;  %v439_v37 = vpop.f32.mrf.mxu1 }
 0x139   :  { %v1424_v42 = vpop.eup %1423  ;;  %1449 = vrcp.f32 %v664_v38  ;;  %v665_v43 = vadd.f32 1.0, %v1422_v39  ;;  %v1173_v44 = vmul.f32 -1.442695, %v439_v37 }
 0x13a   :  { %v1426_v45 = vpop.eup %1425  ;;  %1451 = vrcp.f32 %v696_v40  ;;  %v697_v46 = vadd.f32 1.0, %v1424_v42  ;;  %v1172_v40 = vmul.f32 -1.442695, %v437_v25  ;;  %v1141_v42 = vmul.f32 -1.442695, %v359_v33 }
 0x13b   :  { %v1428_v47 = vpop.eup %1427  ;;  %1453 = vrcp.f32 %v665_v43  ;;  %v666_v48 = vadd.f32 1.0, %v1426_v45  ;;  %v363_v45 = vpop.f32.mrf.mxu0 }
 0x13c   :  { %v1430_v49 = vpop.eup %1429  ;;  %1455 = vrcp.f32 %v697_v46  ;;  %v698_v50 = vadd.f32 1.0, %v1428_v47 }
 0x13d   :  { %v1432_v52 = vpop.eup %1431  ;;  %1457 = vrcp.f32 %v666_v48  ;;  %v667_v53 = vadd.f32 1.0, %v1430_v49  ;;  %v443_v48 = vpop.f32.mrf.mxu1 }
 0x13e   :  { %v1434_v55 = vpop.eup %1433  ;;  %1459 = vrcp.f32 %v698_v50  ;;  %v699_v56 = vadd.f32 1.0, %v1432_v52 }
 0x13f   :  { %v1436_v57 = vpop.eup %1435  ;;  %1461 = vrcp.f32 %v667_v53  ;;  %v668_v58 = vadd.f32 1.0, %v1434_v55  ;;  %v365_v55 = vpop.f32.mrf.mxu0 }
 0x140   :  { %v1438_v59 = vpop.eup %1437  ;;  %1463 = vrcp.f32 %v699_v56  ;;  %v700_v60 = vadd.f32 1.0, %v1436_v57 }
 0x141   :  { %v1440_v62 = vpop.eup %1439  ;;  %1465 = vrcp.f32 %v668_v58  ;;  %v669_v63 = vadd.f32 1.0, %v1438_v59  ;;  %v445_v58 = vpop.f32.mrf.mxu1 }
 0x142   :  { %v1442_v2 = vpop.eup %1441  ;;  %1467 = vrcp.f32 %v700_v60  ;;  %v701_v3 = vadd.f32 1.0, %v1440_v62  ;;  %v367_v1 = vpop.f32.mrf.mxu0 }
 0x143   :  { %v1444_v5 = vpop.eup %1443  ;;  %1469 = vrcp.f32 %v669_v63 }
 0x144   :  { %v1446_v7 = vpop.eup %1445  ;;  %1471 = vrcp.f32 %v701_v3 }
 0x145   :  { %v1448_v10 = vpop.eup %1447  ;;  %v1218_v11 = vpack.c.bf16 %v1446_v7, %v1442_v2  ;;  %1473 = vpow2.f32 %v1134_v0 }
 0x146   :  { %v1450_v14 = vpop.eup %1449  ;;  %v1234_v15 = vpack.c.bf16 %v1448_v10, %v1444_v5  ;;  %1475 = vpow2.f32 %v1166_v4  ;;  %v447_v4 = vpop.f32.mrf.mxu1 }
 0x147   :  { %v1452_v17 = vpop.eup %1451  ;;  %1042 = vst [vmem:[#allocation2 + $0x20] sm:$0xff] %v1218_v11  ;;  %1477 = vpow2.f32 %v1135_v6  ;;  %v369_v11 = vpop.f32.mrf.mxu0 }
 0x148   :  { %v1454_v19 = vpop.eup %1453  ;;  %1058 = vst [vmem:[#allocation2 + $0xa0] sm:$0xff] %v1234_v15  ;;  %1479 = vpow2.f32 %v1167_v8 }
 0x149   :  { %v1456_v22 = vpop.eup %1455  ;;  %v1219_v23 = vpack.c.bf16 %v1454_v19, %v1450_v14  ;;  %1481 = vpow2.f32 %v1136_v12  ;;  %v449_v14 = vpop.f32.mrf.mxu1 }
 0x14a   :  { %v1458_v26 = vpop.eup %1457  ;;  %v1235_v27 = vpack.c.bf16 %v1456_v22, %v1452_v17  ;;  %1483 = vpow2.f32 %v1168_v16  ;;  %v373_v21 = vpop.f32.mrf.mxu0 }
 0x14b   :  { %v1460_v29 = vpop.eup %1459  ;;  %1043 = vst [vmem:[#allocation2 + $0x28] sm:$0xff] %v1219_v23  ;;  %1485 = vpow2.f32 %v1137_v18  ;;  %v453_v25 = vpop.f32.mrf.mxu1 }
 0x14c   :  { %v1462_v31 = vpop.eup %1461  ;;  %1059 = vst [vmem:[#allocation2 + $0xa8] sm:$0xff] %v1235_v27  ;;  %1487 = vpow2.f32 %v1169_v20  ;;  %v375_v33 = vpop.f32.mrf.mxu0 }
 0x14d   :  { %v1464_v34 = vpop.eup %1463  ;;  %v1220_v35 = vpack.c.bf16 %v1462_v31, %v1458_v26  ;;  %1489 = vpow2.f32 %v1138_v24  ;;  %v1142_v24 = vmul.f32 -1.442695, %v363_v45  ;;  %v455_v37 = vpop.f32.mrf.mxu1 }
 0x14e   :  { %v1466_v38 = vpop.eup %1465  ;;  %v1236_v39 = vpack.c.bf16 %v1464_v34, %v1460_v29  ;;  %1491 = vpow2.f32 %v1170_v28  ;;  %v1174_v28 = vmul.f32 -1.442695, %v443_v48  ;;  %v377_v45 = vpop.f32.mrf.mxu0  ;;  %v1146_v48 = vmul.f32 -1.442695, %v373_v21 }
 0x14f   :  { %v1468_v41 = vpop.eup %1467  ;;  %1044 = vst [vmem:[#allocation2 + $0x30] sm:$0xff] %v1220_v35  ;;  %1493 = vpow2.f32 %v1139_v30  ;;  %v1143_v30 = vmul.f32 -1.442695, %v365_v55 }
 0x150   :  { %v1470_v43 = vpop.eup %1469  ;;  %1060 = vst [vmem:[#allocation2 + $0xb0] sm:$0xff] %v1236_v39  ;;  %1495 = vpow2.f32 %v1171_v32  ;;  %v1175_v32 = vmul.f32 -1.442695, %v445_v58 }
 0x151   :  { %v1472_v46 = vpop.eup %1471  ;;  %v1221_v47 = vpack.c.bf16 %v1470_v43, %v1466_v38  ;;  %1497 = vpow2.f32 %v1140_v36  ;;  %v1144_v36 = vmul.f32 -1.442695, %v367_v1 }
 0x152   :  { %v1474_v49 = vpop.eup %1473  ;;  %v1237_v50 = vpack.c.bf16 %v1472_v46, %v1468_v41  ;;  %1499 = vpow2.f32 %v1172_v40  ;;  %v1176_v40 = vmul.f32 -1.442695, %v447_v4 }
 0x153   :  { %v1476_v51 = vpop.eup %1475  ;;  %1045 = vst [vmem:[#allocation2 + $0x38] sm:$0xff] %v1221_v47  ;;  %v670_v52 = vadd.f32 1.0, %v1474_v49  ;;  %1501 = vpow2.f32 %v1141_v42  ;;  %v1145_v42 = vmul.f32 -1.442695, %v369_v11  ;;  %v457_v49 = vpop.f32.mrf.mxu1 }
 0x154   :  { %v1478_v53 = vpop.eup %1477  ;;  %1061 = vst [vmem:[#allocation2 + $0xb8] sm:$0xff] %v1237_v50  ;;  %v702_v54 = vadd.f32 1.0, %v1476_v51  ;;  %1503 = vpow2.f32 %v1173_v44  ;;  %v1177_v44 = vmul.f32 -1.442695, %v449_v14 }
 0x155   :  { %v1480_v56 = vpop.eup %1479  ;;  %1505 = vrcp.f32 %v670_v52  ;;  %v671_v57 = vadd.f32 1.0, %v1478_v53  ;;  %v1178_v52 = vmul.f32 -1.442695, %v453_v25 }
 0x156   :  { %v1482_v59 = vpop.eup %1481  ;;  %1507 = vrcp.f32 %v702_v54  ;;  %v703_v60 = vadd.f32 1.0, %v1480_v56  ;;  %v1147_v54 = vmul.f32 -1.442695, %v375_v33  ;;  %v1179_v56 = vmul.f32 -1.442695, %v455_v37 }
 0x157   :  { %v1484_v61 = vpop.eup %1483  ;;  %1509 = vrcp.f32 %v671_v57  ;;  %v672_v62 = vadd.f32 1.0, %v1482_v59  ;;  %v379_v57 = vpop.f32.mrf.mxu0 }
 0x158   :  { %v1486_v63 = vpop.eup %1485  ;;  %1511 = vrcp.f32 %v703_v60  ;;  %v704_v0 = vadd.f32 1.0, %v1484_v61  ;;  %v1148_v60 = vmul.f32 -1.442695, %v377_v45  ;;  %v459_v61 = vpop.f32.mrf.mxu1 }
 0x159   :  { %v1488_v2 = vpop.eup %1487  ;;  %1513 = vrcp.f32 %v672_v62  ;;  %v673_v3 = vadd.f32 1.0, %v1486_v63  ;;  %v1181_v4 = vmul.f32 -1.442695, %v459_v61 }
 0x15a   :  { %v1490_v5 = vpop.eup %1489  ;;  %1515 = vrcp.f32 %v704_v0  ;;  %v705_v6 = vadd.f32 1.0, %v1488_v2  ;;  %v1180_v0 = vmul.f32 -1.442695, %v457_v49  ;;  %v1149_v2 = vmul.f32 -1.442695, %v379_v57 }
 0x15b   :  { %v1492_v7 = vpop.eup %1491  ;;  %1517 = vrcp.f32 %v673_v3  ;;  %v674_v8 = vadd.f32 1.0, %v1490_v5 }
 0x15c   :  { %v1494_v9 = vpop.eup %1493  ;;  %1519 = vrcp.f32 %v705_v6  ;;  %v706_v10 = vadd.f32 1.0, %v1492_v7 }
 0x15d   :  { %v1496_v12 = vpop.eup %1495  ;;  %1521 = vrcp.f32 %v674_v8  ;;  %v675_v13 = vadd.f32 1.0, %v1494_v9 }
 0x15e   :  { %v1498_v15 = vpop.eup %1497  ;;  %1523 = vrcp.f32 %v706_v10  ;;  %v707_v16 = vadd.f32 1.0, %v1496_v12 }
 0x15f   :  { %v1500_v17 = vpop.eup %1499  ;;  %1525 = vrcp.f32 %v675_v13  ;;  %v676_v18 = vadd.f32 1.0, %v1498_v15 }
 0x160   :  { %v1502_v19 = vpop.eup %1501  ;;  %1527 = vrcp.f32 %v707_v16  ;;  %v708_v20 = vadd.f32 1.0, %v1500_v17 }
 0x161   :  { %v1504_v22 = vpop.eup %1503  ;;  %1529 = vrcp.f32 %v676_v18  ;;  %v677_v23 = vadd.f32 1.0, %v1502_v19 }
 0x162   :  { %v1506_v26 = vpop.eup %1505  ;;  %1531 = vrcp.f32 %v708_v20  ;;  %v709_v27 = vadd.f32 1.0, %v1504_v22 }
 0x163   :  { %v1508_v29 = vpop.eup %1507  ;;  %1533 = vrcp.f32 %v677_v23 }
 0x164   :  { %v1510_v31 = vpop.eup %1509  ;;  %1535 = vrcp.f32 %v709_v27 }
 0x165   :  { %v1512_v34 = vpop.eup %1511  ;;  %v1222_v35 = vpack.c.bf16 %v1510_v31, %v1506_v26  ;;  %1537 = vpow2.f32 %v1142_v24 }
 0x166   :  { %v1514_v38 = vpop.eup %1513  ;;  %v1238_v39 = vpack.c.bf16 %v1512_v34, %v1508_v29  ;;  %1539 = vpow2.f32 %v1174_v28 }
 0x167   :  { %v1516_v41 = vpop.eup %1515  ;;  %1046 = vst [vmem:[#allocation2 + $0x40] sm:$0xff] %v1222_v35  ;;  %1541 = vpow2.f32 %v1143_v30 }
 0x168   :  { %v1518_v43 = vpop.eup %1517  ;;  %1062 = vst [vmem:[#allocation2 + $0xc0] sm:$0xff] %v1238_v39  ;;  %1543 = vpow2.f32 %v1175_v32 }
 0x169   :  { %v1520_v46 = vpop.eup %1519  ;;  %v1223_v47 = vpack.c.bf16 %v1518_v43, %v1514_v38  ;;  %1545 = vpow2.f32 %v1144_v36 }
 0x16a   :  { %v1522_v50 = vpop.eup %1521  ;;  %v1239_v51 = vpack.c.bf16 %v1520_v46, %v1516_v41  ;;  %1547 = vpow2.f32 %v1176_v40 }
 0x16b   :  { %v1524_v53 = vpop.eup %1523  ;;  %1047 = vst [vmem:[#allocation2 + $0x48] sm:$0xff] %v1223_v47  ;;  %1549 = vpow2.f32 %v1145_v42 }
 0x16c   :  { %v1526_v55 = vpop.eup %1525  ;;  %1063 = vst [vmem:[#allocation2 + $0xc8] sm:$0xff] %v1239_v51  ;;  %1551 = vpow2.f32 %v1177_v44 }
 0x16d   :  { %v1528_v58 = vpop.eup %1527  ;;  %v1224_v59 = vpack.c.bf16 %v1526_v55, %v1522_v50  ;;  %1553 = vpow2.f32 %v1146_v48 }
 0x16e   :  { %v1530_v62 = vpop.eup %1529  ;;  %v1240_v63 = vpack.c.bf16 %v1528_v58, %v1524_v53  ;;  %1555 = vpow2.f32 %v1178_v52 }
 0x16f   :  { %v1532_v1 = vpop.eup %1531  ;;  %1048 = vst [vmem:[#allocation2 + $0x50] sm:$0xff] %v1224_v59  ;;  %1557 = vpow2.f32 %v1147_v54 }
 0x170   :  { %v1534_v3 = vpop.eup %1533  ;;  %1064 = vst [vmem:[#allocation2 + $0xd0] sm:$0xff] %v1240_v63  ;;  %1559 = vpow2.f32 %v1179_v56 }
 0x171   :  { %v1536_v5 = vpop.eup %1535  ;;  %v1225_v6 = vpack.c.bf16 %v1534_v3, %v1530_v62  ;;  %1561 = vpow2.f32 %v1148_v60 }
 0x172   :  { %v1538_v7 = vpop.eup %1537  ;;  %v1241_v8 = vpack.c.bf16 %v1536_v5, %v1532_v1  ;;  %1563 = vpow2.f32 %v1180_v0 }
 0x173   :  { %v1540_v9 = vpop.eup %1539  ;;  %1049 = vst [vmem:[#allocation2 + $0x58] sm:$0xff] %v1225_v6  ;;  %v678_v10 = vadd.f32 1.0, %v1538_v7  ;;  %1565 = vpow2.f32 %v1149_v2 }
 0x174   :  { %v1542_v11 = vpop.eup %1541  ;;  %1065 = vst [vmem:[#allocation2 + $0xd8] sm:$0xff] %v1241_v8  ;;  %v710_v12 = vadd.f32 1.0, %v1540_v9  ;;  %1567 = vpow2.f32 %v1181_v4 }
 0x175   :  { %v1544_v13 = vpop.eup %1543  ;;  %1569 = vrcp.f32 %v678_v10  ;;  %v679_v14 = vadd.f32 1.0, %v1542_v11 }
 0x176   :  { %v1546_v15 = vpop.eup %1545  ;;  %1571 = vrcp.f32 %v710_v12  ;;  %v711_v16 = vadd.f32 1.0, %v1544_v13 }
 0x177   :  { %v1548_v17 = vpop.eup %1547  ;;  %1573 = vrcp.f32 %v679_v14  ;;  %v680_v18 = vadd.f32 1.0, %v1546_v15 }
 0x178   :  { %v1550_v19 = vpop.eup %1549  ;;  %1575 = vrcp.f32 %v711_v16  ;;  %v712_v20 = vadd.f32 1.0, %v1548_v17 }
 0x179   :  { %v1552_v21 = vpop.eup %1551  ;;  %1577 = vrcp.f32 %v680_v18  ;;  %v681_v22 = vadd.f32 1.0, %v1550_v19 }
 0x17a   :  { %v1554_v23 = vpop.eup %1553  ;;  %1579 = vrcp.f32 %v712_v20  ;;  %v713_v24 = vadd.f32 1.0, %v1552_v21 }
 0x17b   :  { %v1556_v25 = vpop.eup %1555  ;;  %1581 = vrcp.f32 %v681_v22  ;;  %v682_v26 = vadd.f32 1.0, %v1554_v23 }
 0x17c   :  { %v1558_v27 = vpop.eup %1557  ;;  %1583 = vrcp.f32 %v713_v24  ;;  %v714_v28 = vadd.f32 1.0, %v1556_v25 }
 0x17d   :  { %v1560_v29 = vpop.eup %1559  ;;  %1585 = vrcp.f32 %v682_v26  ;;  %v683_v30 = vadd.f32 1.0, %v1558_v27 }
 0x17e   :  { %v1562_v31 = vpop.eup %1561  ;;  %1587 = vrcp.f32 %v714_v28  ;;  %v715_v32 = vadd.f32 1.0, %v1560_v29 }
 0x17f   :  { %v1564_v33 = vpop.eup %1563  ;;  %1589 = vrcp.f32 %v683_v30  ;;  %v684_v34 = vadd.f32 1.0, %v1562_v31 }
 0x180   :  { %v1566_v35 = vpop.eup %1565  ;;  %1591 = vrcp.f32 %v715_v32  ;;  %v716_v36 = vadd.f32 1.0, %v1564_v33 }
 0x181   :  { %v1568_v37 = vpop.eup %1567  ;;  %1593 = vrcp.f32 %v684_v34  ;;  %v685_v38 = vadd.f32 1.0, %v1566_v35 }
 0x182   :  { %v1570_v39 = vpop.eup %1569  ;;  %1595 = vrcp.f32 %v716_v36  ;;  %v717_v40 = vadd.f32 1.0, %v1568_v37 }
 0x183   :  { %v1572_v41 = vpop.eup %1571  ;;  %1597 = vrcp.f32 %v685_v38 }
 0x184   :  { %v1574_v42 = vpop.eup %1573  ;;  %1599 = vrcp.f32 %v717_v40 }
 0x185   :  { %v1576_v43 = vpop.eup %1575  ;;  %v1226_v44 = vpack.c.bf16 %v1574_v42, %v1570_v39 }
 0x186   :  { %v1578_v45 = vpop.eup %1577  ;;  %v1242_v46 = vpack.c.bf16 %v1576_v43, %v1572_v41 }
 0x187   :  { %v1580_v47 = vpop.eup %1579  ;;  %1050 = vst [vmem:[#allocation2 + $0x60] sm:$0xff] %v1226_v44 }
 0x188   :  { %v1582_v48 = vpop.eup %1581  ;;  %1066 = vst [vmem:[#allocation2 + $0xe0] sm:$0xff] %v1242_v46 }
 0x189   :  { %v1584_v49 = vpop.eup %1583  ;;  %v1227_v50 = vpack.c.bf16 %v1582_v48, %v1578_v45 }
 0x18a   :  { %v1586_v51 = vpop.eup %1585  ;;  %v1243_v52 = vpack.c.bf16 %v1584_v49, %v1580_v47 }
 0x18b   :  { %v1588_v53 = vpop.eup %1587  ;;  %1051 = vst [vmem:[#allocation2 + $0x68] sm:$0xff] %v1227_v50 }
 0x18c   :  { %v1590_v54 = vpop.eup %1589  ;;  %1067 = vst [vmem:[#allocation2 + $0xe8] sm:$0xff] %v1243_v52 }
 0x18d   :  { %v1592_v55 = vpop.eup %1591  ;;  %v1228_v56 = vpack.c.bf16 %v1590_v54, %v1586_v51 }
 0x18e   :  { %v1594_v57 = vpop.eup %1593  ;;  %v1244_v58 = vpack.c.bf16 %v1592_v55, %v1588_v53 }
 0x18f   :  { %v1596_v59 = vpop.eup %1595  ;;  %1052 = vst [vmem:[#allocation2 + $0x70] sm:$0xff] %v1228_v56 }
 0x190   :  { %v1598_v60 = vpop.eup %1597  ;;  %1068 = vst [vmem:[#allocation2 + $0xf0] sm:$0xff] %v1244_v58 }
 0x191   :  { %v1600_v61 = vpop.eup %1599  ;;  %v1229_v62 = vpack.c.bf16 %v1598_v60, %v1594_v57 }
 0x192   :  { %v1245_v63 = vpack.c.bf16 %v1600_v61, %v1596_v59 }
 0x193   :  { %1053 = vst [vmem:[#allocation2 + $0x78] sm:$0xff] %v1229_v62 }
 0x194   :  { %1069 = vst [vmem:[#allocation2 + $0xf8] sm:$0xff] %v1245_v63 }
 0x195   :  { %1612 = shalt.err (!%p1609_p4)
}
 0x196   :  { %s1624_s18 = smov 128   ;;  %s1625_s19 = smov 8  }
 0x197   :  { %1081 = dma.vmem_to_hbm [thread:$0]  %s1076_s16, 4096, %s1742_s2, [#allocation3], %s1624_s18, %s1624_s18, %s1625_s19  }
 0x198   :  { %1621 = dma.done.wait [#allocation3], 4096  }
 0x199   :  { %1622 = vsyncadd [#allocation3], 4294963200 }
 0x19a   :  { %1085 = vsyncpa [#allocation3], 1 }

// kernel: gcn_forward.3
= control target key start
LH: loop header
LB: loop body
LE: loop exit
PB: predicated region body
PF: predicated region fallthrough
CT: control target
= control target key end

     0   :  { %s6060_s0 = inlined_call_operand.vmem [shape: bf16[256,128], index: 0, kind: input, shape index: {}]   ;;  %s6061_s1 = inlined_call_operand.vmem [shape: bf16[5,128,128], index: 1, kind: input, shape index: {}]   ;;  %s6062_s2 = inlined_call_operand.vmem [shape: bf16[128,256], index: 2, kind: input, shape index: {}]   ;;  %s6063_s3 = inlined_call_operand.vmem [shape: bf16[256,256], index: 3, kind: input, shape index: {}]   ;;  %s6064_s4 = inlined_call_operand.vmem [shape: f32[256,128], index: 4, kind: output, shape index: {0}]   ;;  %s6065_s5 = inlined_call_operand.vmem [shape: f32[256,128], index: 5, kind: output, shape index: {1}]   ;;  %s6066_s6 = inlined_call_operand.vmem [shape: f32[256,128], index: 6, kind: output, shape index: {2}]   ;;  %s6067_s7 = inlined_call_operand.vmem [shape: bf16[256,128], index: 7, kind: output, shape index: {3}]  }
   0x1   :  { %v4910_v0 = vld [vmem:[%s6063_s3] sm:$0xff]  ;;  %v4915_v1 = vld [vmem:[%s6063_s3 + $0x8] sm:$0xff]  ;;  %v4920_v2 = vld [vmem:[%s6063_s3 + $0x10] sm:$0xff] }
   0x2   :  { %v4925_v3 = vld [vmem:[%s6063_s3 + $0x18] sm:$0xff]  ;;  %v4930_v4 = vld [vmem:[%s6063_s3 + $0x20] sm:$0xff]  ;;  %v4935_v5 = vld [vmem:[%s6063_s3 + $0x28] sm:$0xff] }
   0x3   :  { %v4940_v6 = vld [vmem:[%s6063_s3 + $0x30] sm:$0xff]  ;;  %v4945_v7 = vld [vmem:[%s6063_s3 + $0x38] sm:$0xff]  ;;  %v4950_v8 = vld [vmem:[%s6063_s3 + $0x40] sm:$0xff] }
   0x4   :  { %v4955_v9 = vld [vmem:[%s6063_s3 + $0x48] sm:$0xff]  ;;  %v4960_v10 = vld [vmem:[%s6063_s3 + $0x50] sm:$0xff]  ;;  %v4965_v11 = vld [vmem:[%s6063_s3 + $0x58] sm:$0xff] }
   0x5   :  { %v4970_v12 = vld [vmem:[%s6063_s3 + $0x60] sm:$0xff]  ;;  %v4975_v13 = vld [vmem:[%s6063_s3 + $0x68] sm:$0xff]  ;;  %v4980_v14 = vld [vmem:[%s6063_s3 + $0x70] sm:$0xff] }
   0x6   :  { %v4985_v15 = vld [vmem:[%s6063_s3 + $0x78] sm:$0xff]  ;;  %v4990_v16 = vld [vmem:[%s6063_s3 + $0x80] sm:$0xff]  ;;  %v4995_v17 = vld [vmem:[%s6063_s3 + $0x88] sm:$0xff] }
   0x7   :  { %v5000_v18 = vld [vmem:[%s6063_s3 + $0x90] sm:$0xff]  ;;  %v5005_v19 = vld [vmem:[%s6063_s3 + $0x98] sm:$0xff]  ;;  %v5010_v20 = vld [vmem:[%s6063_s3 + $0xa0] sm:$0xff] }
   0x8   :  { %v5015_v21 = vld [vmem:[%s6063_s3 + $0xa8] sm:$0xff]  ;;  %v5020_v22 = vld [vmem:[%s6063_s3 + $0xb0] sm:$0xff]  ;;  %v5025_v23 = vld [vmem:[%s6063_s3 + $0xb8] sm:$0xff] }
   0x9   :  { %v5030_v24 = vld [vmem:[%s6063_s3 + $0xc0] sm:$0xff]  ;;  %v5035_v25 = vld [vmem:[%s6063_s3 + $0xc8] sm:$0xff]  ;;  %v5040_v26 = vld [vmem:[%s6063_s3 + $0xd0] sm:$0xff] }
   0xa   :  { %6099 = vst [vmem:[#allocation6_spill] sm:$0xff] %v5030_v24  ;;  %6100 = vst [vmem:[#allocation7_spill] sm:$0xff] %v5040_v26  ;;  %v5045_v27 = vld [vmem:[%s6063_s3 + $0xd8] sm:$0xff]  ;;  %v5050_v28 = vld [vmem:[%s6063_s3 + $0xe0] sm:$0xff] }
   0xb   :  { %6101 = vst [vmem:[#allocation8_spill] sm:$0xff] %v5045_v27  ;;  %6102 = vst [vmem:[#allocation9_spill] sm:$0xff] %v5050_v28  ;;  %v5055_v29 = vld [vmem:[%s6063_s3 + $0xe8] sm:$0xff]  ;;  %v5060_v30 = vld [vmem:[%s6063_s3 + $0xf0] sm:$0xff] }
   0xc   :  { %6103 = vst [vmem:[#allocation10_spill] sm:$0xff] %v5055_v29  ;;  %6104 = vst [vmem:[#allocation11_spill] sm:$0xff] %v5060_v30  ;;  %v5065_v31 = vld [vmem:[%s6063_s3 + $0xf8] sm:$0xff] }
   0xd   :  { %6105 = vst [vmem:[#allocation12_spill] sm:$0xff] %v5065_v31 }
   0xe   :  { %124 = vsyncadd [#allocation3], 4096  ;;  %v4784_v32 = vld [vmem:[%s6061_s1 + $0x38] sm:$0xff]   ;;  %v4785_v33 = vld [vmem:[%s6061_s1 + $0x30] sm:$0xff]  }
   0xf   :  { %4527 = vmatprep.subr.bf16.mxu0 %v4784_v32  ;;  %v4786_v34 = vld [vmem:[%s6061_s1 + $0x28] sm:$0xff]   ;;  %v4787_v35 = vld [vmem:[%s6061_s1 + $0x20] sm:$0xff]   ;;  %v4788_v37 = vld [vmem:[%s6061_s1 + $0x18] sm:$0xff]  }
  0x10   :  { %4528 = vmatpush3.bf16.msra.mxu0 %v4784_v32  ;;  %v4792_v36 = vld [vmem:[%s6060_s0] sm:$0xff]   ;;  %v4789_v38 = vld [vmem:[%s6061_s1 + $0x10] sm:$0xff]   ;;  %v4790_v39 = vld [vmem:[%s6061_s1 + $0x8] sm:$0xff]  }
  0x11   :  { %4529 = vmatprep.subr.bf16.mxu0 %v4785_v33  ;;  %4543 = vmatprep.mubr.bf16.mxu0 %v4792_v36  ;;  %v4791_v40 = vld [vmem:[%s6061_s1] sm:$0xff]   ;;  %v4793_v41 = vld [vmem:[%s6060_s0 + $0x8] sm:$0xff]   ;;  %v4794_v42 = vld [vmem:[%s6060_s0 + $0x10] sm:$0xff]  }
  0x12   :  { %v4795_v43 = vld [vmem:[%s6060_s0 + $0x18] sm:$0xff]   ;;  %v4796_v44 = vld [vmem:[%s6060_s0 + $0x20] sm:$0xff]   ;;  %v4797_v45 = vld [vmem:[%s6060_s0 + $0x28] sm:$0xff]  }
  0x13   :  { %v4798_v46 = vld [vmem:[%s6060_s0 + $0x30] sm:$0xff]   ;;  %v4799_v47 = vld [vmem:[%s6060_s0 + $0x38] sm:$0xff]   ;;  %v4800_v48 = vld [vmem:[%s6060_s0 + $0x40] sm:$0xff]  }
  0x14   :  { %4530 = vmatpush3.bf16.msra.mxu0 %v4785_v33  ;;  %v4801_v49 = vld [vmem:[%s6060_s0 + $0x48] sm:$0xff]   ;;  %v4802_v50 = vld [vmem:[%s6060_s0 + $0x50] sm:$0xff]   ;;  %v4803_v51 = vld [vmem:[%s6060_s0 + $0x58] sm:$0xff]  }
  0x15   :  { %4531 = vmatprep.subr.bf16.mxu0 %v4786_v34  ;;  %v4804_v52 = vld [vmem:[%s6060_s0 + $0x60] sm:$0xff]   ;;  %v4805_v53 = vld [vmem:[%s6060_s0 + $0x68] sm:$0xff]   ;;  %v4806_v54 = vld [vmem:[%s6060_s0 + $0x70] sm:$0xff]  }
  0x16   :  { %v4807_v55 = vld [vmem:[%s6060_s0 + $0x78] sm:$0xff]  }
  0x18   :  { %4532 = vmatpush3.bf16.msra.mxu0 %v4786_v34 }
  0x19   :  { %4533 = vmatprep.subr.bf16.mxu0 %v4787_v35 }
  0x1c   :  { %4534 = vmatpush3.bf16.msra.mxu0 %v4787_v35 }
  0x1d   :  { %4535 = vmatprep.subr.bf16.mxu0 %v4788_v37 }
  0x20   :  { %4536 = vmatpush3.bf16.msra.mxu0 %v4788_v37 }
  0x21   :  { %4537 = vmatprep.subr.bf16.mxu0 %v4789_v38 }
  0x24   :  { %4538 = vmatpush3.bf16.msra.mxu0 %v4789_v38 }
  0x25   :  { %4539 = vmatprep.subr.bf16.mxu0 %v4790_v39 }
  0x28   :  { %4540 = vmatpush3.bf16.msra.mxu0 %v4790_v39 }
  0x29   :  { %4541 = vmatprep.subr.bf16.mxu0 %v4791_v40 }
  0x2c   :  { %4542 = vmatpush3.bf16.msra.mxu0 %v4791_v40 }
  0x2f   :  { %4544 = vmatmul.mubr.bf16.vlgmr.msra.gmra.mxu0 %v4793_v41 }
  0x30   :  { %4547 = vmatprep.mubr.bf16.mxu0 %v4794_v42 }
  0x37   :  { %4548 = vmatmul.mubr.bf16.gmra.mxu0 %v4795_v43 }
  0x38   :  { %4551 = vmatprep.mubr.bf16.mxu0 %v4796_v44 }
  0x3f   :  { %4552 = vmatmul.mubr.bf16.gmra.mxu0 %v4797_v45 }
  0x40   :  { %4555 = vmatprep.mubr.bf16.mxu0 %v4798_v46 }
  0x47   :  { %4556 = vmatmul.mubr.bf16.gmra.mxu0 %v4799_v47 }
  0x48   :  { %4559 = vmatprep.mubr.bf16.mxu0 %v4800_v48 }
  0x4f   :  { %4560 = vmatmul.mubr.bf16.gmra.mxu0 %v4801_v49 }
  0x50   :  { %4563 = vmatprep.mubr.bf16.mxu0 %v4802_v50 }
  0x57   :  { %4564 = vmatmul.mubr.bf16.gmra.mxu0 %v4803_v51 }
  0x58   :  { %4567 = vmatprep.mubr.bf16.mxu0 %v4804_v52 }
  0x5f   :  { %4568 = vmatmul.mubr.bf16.gmra.mxu0 %v4805_v53 }
  0x60   :  { %4571 = vmatprep.mubr.bf16.mxu0 %v4806_v54 }
  0x67   :  { %4572 = vmatmul.mubr.bf16.gmra.mxu0 %v4807_v55 }
  0xef   :  { %v5139_v56 = vpop.f32.mrf.mxu0 }
  0xf1   :  { %v5141_v57 = vpop.f32.mrf.mxu0 }
  0xf3   :  { %v5143_v58 = vpop.f32.mrf.mxu0 }
  0xf5   :  { %v5145_v59 = vpop.f32.mrf.mxu0 }
  0xf7   :  { %v4549_v60 = vpop.f32.mrf.mxu0 }
  0xf9   :  { %v5147_v61 = vpop.f32.mrf.mxu0 }
  0xfb   :  { %v4550_v62 = vpop.f32.mrf.mxu0 }
  0xfd   :  { %v370_v63 = vpop.f32.mrf.mxu0 }
  0xff   :  { %v4553_v32 = vpop.f32.mrf.mxu0 }
 0x101   :  { %v383_v33 = vpop.f32.mrf.mxu0 }
 0x103   :  { %v4554_v34 = vpop.f32.mrf.mxu0 }
 0x105   :  { %v386_v35 = vpop.f32.mrf.mxu0 }
 0x107   :  { %v4557_v36 = vpop.f32.mrf.mxu0 }
 0x109   :  { %v399_v37 = vpop.f32.mrf.mxu0 }
 0x10b   :  { %v4558_v38 = vpop.f32.mrf.mxu0 }
 0x10c   :  { %v521_v31 = vpack.c.bf16 %v4558_v38, %v4557_v36 }
 0x10d   :  { %v402_v39 = vpop.f32.mrf.mxu0 }
 0x10f   :  { %v4561_v40 = vpop.f32.mrf.mxu0 }
 0x111   :  { %v415_v41 = vpop.f32.mrf.mxu0 }
 0x113   :  { %v4562_v42 = vpop.f32.mrf.mxu0 }
 0x115   :  { %v418_v43 = vpop.f32.mrf.mxu0 }
 0x117   :  { %v4565_v44 = vpop.f32.mrf.mxu0 }
 0x119   :  { %v431_v45 = vpop.f32.mrf.mxu0 }
 0x11b   :  { %v4566_v46 = vpop.f32.mrf.mxu0 }
 0x11d   :  { %v434_v47 = vpop.f32.mrf.mxu0 }
 0x11f   :  { %v4569_v48 = vpop.f32.mrf.mxu0 }
 0x121   :  { %v447_v49 = vpop.f32.mrf.mxu0 }
 0x123   :  { %v4570_v50 = vpop.f32.mrf.mxu0 }
 0x125   :  { %v450_v51 = vpop.f32.mrf.mxu0 }
 0x127   :  { %v4573_v52 = vpop.f32.mrf.mxu0 }
 0x129   :  { %v463_v53 = vpop.f32.mrf.mxu0 }
 0x12b   :  { %v4574_v54 = vpop.f32.mrf.mxu0 }
 0x12c   :  { %v529_v30 = vpack.c.bf16 %v4574_v54, %v4573_v52 }
 0x12d   :  { %v466_v55 = vpop.f32.mrf.mxu0 }
 0x12e   :  { %v528_v28 = vpack.c.bf16 %v466_v55, %v463_v53 }
 0x12f   :  { %4864 = dma.done.wait [#allocation3], 4096 }
 0x130   :  { %4865 = vsyncadd [#allocation3], 4294963200  ;;  %3871 = vmatprep.subr.bf16.mxu0 %v529_v30  ;;  %4767 = vmatprep.subr.bf16.mxu1 %v529_v30  ;;  %v520_v29 = vpack.c.bf16 %v402_v39, %v399_v37  ;;  %v527_v26 = vpack.c.bf16 %v4570_v50, %v4569_v48  ;;  %v5151_v27 = vcombine.high %v4910_v0, %v4915_v1  ;;  %v6117_v39 = vld [vmem:[#allocation9_spill] sm:$0xff]  ;;  %v4815_v48 = vld [vmem:[%s6061_s1 + $0x40] sm:$0xff]  }
 0x131   :  { %3872 = vmatpush3.bf16.msra.mxu0 %v521_v31  ;;  %4775 = vmatpush3.bf16.msra.mxu1 %v521_v31  ;;  %v5155_v24 = vcombine.high %v4950_v8, %v4955_v9  ;;  %v519_v36 = vpack.c.bf16 %v4554_v34, %v4553_v32  ;;  %v526_v30 = vpack.c.bf16 %v450_v51, %v447_v49 }
 0x132   :  { %3873 = vmatprep.subr.bf16.mxu0 %v528_v28  ;;  %4768 = vmatprep.subr.bf16.mxu1 %v528_v28  ;;  %6106 = vst [vmem:[#allocation13_spill] sm:$0xff] %v5151_v27  ;;  %v518_v28 = vpack.c.bf16 %v386_v35, %v383_v33  ;;  %v525_v31 = vpack.c.bf16 %v4566_v46, %v4565_v44  ;;  %v6116_v35 = vld [vmem:[#allocation10_spill] sm:$0xff]  ;;  %v6120_v44 = vld [vmem:[#allocation12_spill] sm:$0xff] }
 0x133   :  { %722 = vmatprep.mubr.bf16.mxu0 %v5151_v27  ;;  %754 = vmatprep.mubr.bf16.mxu1 %v5155_v24  ;;  %v517_v37 = vpack.c.bf16 %v4550_v62, %v4549_v60  ;;  %v524_v38 = vpack.c.bf16 %v434_v47, %v431_v45  ;;  %v515_v32 = vpack.c.bf16 %v5143_v58, %v5139_v56  ;;  %v4808_v60 = vld [vmem:[%s6061_s1 + $0x78] sm:$0xff]   ;;  %v6121_v45 = vld [vmem:[#allocation11_spill] sm:$0xff] }
 0x134   :  { %v522_v33 = vpack.c.bf16 %v418_v43, %v415_v41  ;;  %v5169_v62 = vcombine.low %v4910_v0, %v4915_v1  ;;  %v5173_v56 = vcombine.low %v4950_v8, %v4955_v9  ;;  %v5177_v58 = vcombine.high %v4920_v2, %v4925_v3  ;;  %v4812_v41 = vld [vmem:[%s6061_s1 + $0x58] sm:$0xff]   ;;  %v4814_v47 = vld [vmem:[%s6061_s1 + $0x48] sm:$0xff]  }
 0x135   :  { %3874 = vmatpush3.bf16.msra.mxu0 %v520_v29  ;;  %4776 = vmatpush3.bf16.msra.mxu1 %v520_v29  ;;  %v516_v29 = vpack.c.bf16 %v370_v63, %v5147_v61  ;;  %v514_v61 = vpack.c.bf16 %v5145_v59, %v5141_v57  ;;  %v5181_v63 = vcombine.high %v4960_v10, %v4965_v11  ;;  %v4809_v57 = vld [vmem:[%s6061_s1 + $0x70] sm:$0xff]   ;;  %v6113_v59 = vld [vmem:[#allocation7_spill] sm:$0xff] }
 0x136   :  { %3875 = vmatprep.subr.bf16.mxu0 %v527_v26  ;;  %4769 = vmatprep.subr.bf16.mxu1 %v527_v26  ;;  %v523_v26 = vpack.c.bf16 %v4562_v42, %v4561_v40  ;;  %v5192_v0 = vcombine.low %v4920_v2, %v4925_v3  ;;  %v5196_v1 = vcombine.low %v4960_v10, %v4965_v11  ;;  %v4813_v42 = vld [vmem:[%s6061_s1 + $0x50] sm:$0xff]  }
 0x137   :  { %v5200_v8 = vcombine.high %v4930_v4, %v4935_v5  ;;  %v5204_v9 = vcombine.high %v4970_v12, %v4975_v13  ;;  %v5212_v2 = vcombine.low %v4930_v4, %v4935_v5  ;;  %v5216_v3 = vcombine.low %v4970_v12, %v4975_v13 }
 0x138   :  { %v5220_v10 = vcombine.high %v4940_v6, %v4945_v7  ;;  %v5224_v11 = vcombine.high %v4980_v14, %v4985_v15  ;;  %v5232_v4 = vcombine.low %v4940_v6, %v4945_v7  ;;  %v5236_v5 = vcombine.low %v4980_v14, %v4985_v15 }
 0x139   :  { %3876 = vmatpush3.bf16.msra.mxu0 %v519_v36  ;;  %4777 = vmatpush3.bf16.msra.mxu1 %v519_v36  ;;  %v5240_v12 = vcombine.high %v4990_v16, %v4995_v17  ;;  %v5247_v13 = vcombine.low %v4990_v16, %v4995_v17  ;;  %v5251_v6 = vcombine.high %v5000_v18, %v5005_v19 }
 0x13a   :  { %3877 = vmatprep.subr.bf16.mxu0 %v526_v30  ;;  %4770 = vmatprep.subr.bf16.mxu1 %v526_v30  ;;  %v5257_v7 = vcombine.low %v5000_v18, %v5005_v19  ;;  %v5261_v14 = vcombine.high %v5010_v20, %v5015_v21  ;;  %v5267_v15 = vcombine.low %v5010_v20, %v5015_v21  ;;  %v6109_v18 = vld [vmem:[#allocation6_spill] sm:$0xff]  ;;  %v6112_v21 = vld [vmem:[#allocation8_spill] sm:$0xff] }
 0x13b   :  { %v5271_v16 = vcombine.high %v5020_v22, %v5025_v23  ;;  %v5277_v17 = vcombine.low %v5020_v22, %v5025_v23  ;;  %v5281_v19 = vcombine.high %v6109_v18, %v5035_v25  ;;  %v5287_v20 = vcombine.low %v6109_v18, %v5035_v25  ;;  %v4810_v22 = vld [vmem:[%s6061_s1 + $0x68] sm:$0xff]   ;;  %v4811_v23 = vld [vmem:[%s6061_s1 + $0x60] sm:$0xff]  }
 0x13c   :  { %v5291_v34 = vcombine.high %v6113_v59, %v6112_v21  ;;  %v5303_v25 = vcombine.low %v6113_v59, %v6112_v21  ;;  %v5307_v40 = vcombine.high %v6117_v39, %v6116_v35  ;;  %v5319_v43 = vcombine.low %v6117_v39, %v6116_v35 }
 0x13d   :  { %3878 = vmatpush3.bf16.msra.mxu0 %v518_v28  ;;  %4778 = vmatpush3.bf16.msra.mxu1 %v518_v28  ;;  %6107 = vst [vmem:[#allocation14_spill] sm:$0xff] %v5271_v16  ;;  %6108 = vst [vmem:[#allocation15_spill] sm:$0xff] %v5277_v17  ;;  %v5323_v46 = vcombine.high %v6121_v45, %v6120_v44  ;;  %v5335_v49 = vcombine.low %v6121_v45, %v6120_v44 }
 0x13e   :  { %3879 = vmatprep.subr.bf16.mxu0 %v525_v31  ;;  %4771 = vmatprep.subr.bf16.mxu1 %v525_v31  ;;  %6110 = vst [vmem:[#allocation6_spill] sm:$0xff] %v5281_v19  ;;  %6111 = vst [vmem:[#allocation16_spill] sm:$0xff] %v5287_v20 }
 0x13f   :  { %6114 = vst [vmem:[#allocation8_spill] sm:$0xff] %v5291_v34  ;;  %6115 = vst [vmem:[#allocation7_spill] sm:$0xff] %v5303_v25 }
 0x140   :  { %6118 = vst [vmem:[#allocation10_spill] sm:$0xff] %v5307_v40  ;;  %6119 = vst [vmem:[#allocation9_spill] sm:$0xff] %v5319_v43 }
 0x141   :  { %3880 = vmatpush3.bf16.msra.mxu0 %v517_v37  ;;  %4779 = vmatpush3.bf16.msra.mxu1 %v517_v37  ;;  %6122 = vst [vmem:[#allocation12_spill] sm:$0xff] %v5323_v46  ;;  %6123 = vst [vmem:[#allocation11_spill] sm:$0xff] %v5335_v49 }
 0x142   :  { %3881 = vmatprep.subr.bf16.mxu0 %v524_v38  ;;  %4772 = vmatprep.subr.bf16.mxu1 %v524_v38 }
 0x145   :  { %3882 = vmatpush3.bf16.msra.mxu0 %v516_v29  ;;  %4780 = vmatpush3.bf16.msra.mxu1 %v516_v29 }
 0x146   :  { %3883 = vmatprep.subr.bf16.mxu0 %v523_v26  ;;  %4773 = vmatprep.subr.bf16.mxu1 %v523_v26 }
 0x149   :  { %3884 = vmatpush3.bf16.msra.mxu0 %v515_v32  ;;  %4781 = vmatpush3.bf16.msra.mxu1 %v515_v32 }
 0x14a   :  { %3885 = vmatprep.subr.bf16.mxu0 %v522_v33  ;;  %4774 = vmatprep.subr.bf16.mxu1 %v522_v33 }
 0x14d   :  { %3886 = vmatpush3.bf16.msra.mxu0 %v514_v61  ;;  %4782 = vmatpush3.bf16.msra.mxu1 %v514_v61 }
 0x14e   :  { %4575 = vmatprep.subr.bf16.mxu0 %v4808_v60 }
 0x150   :  { %723 = vmatmul.mubr.bf16.vlgmr.msra.gmra.mxu0 %v5169_v62  ;;  %755 = vmatmul.mubr.bf16.vlgmr.msra.gmra.mxu1 %v5173_v56 }
 0x151   :  { %730 = vmatprep.mubr.bf16.mxu0 %v5177_v58  ;;  %762 = vmatprep.mubr.bf16.mxu1 %v5181_v63 }
 0x152   :  { %4576 = vmatpush3.bf16.msra.mxu0 %v4808_v60 }
 0x153   :  { %4577 = vmatprep.subr.bf16.mxu0 %v4809_v57 }
 0x156   :  { %4578 = vmatpush3.bf16.msra.mxu0 %v4809_v57 }
 0x157   :  { %4579 = vmatprep.subr.bf16.mxu0 %v4810_v22 }
 0x158   :  { %731 = vmatmul.mubr.bf16.gmra.mxu0 %v5192_v0  ;;  %763 = vmatmul.mubr.bf16.gmra.mxu1 %v5196_v1 }
 0x159   :  { %738 = vmatprep.mubr.bf16.mxu0 %v5200_v8  ;;  %770 = vmatprep.mubr.bf16.mxu1 %v5204_v9 }
 0x15a   :  { %4580 = vmatpush3.bf16.msra.mxu0 %v4810_v22 }
 0x15b   :  { %4581 = vmatprep.subr.bf16.mxu0 %v4811_v23 }
 0x15e   :  { %4582 = vmatpush3.bf16.msra.mxu0 %v4811_v23 }
 0x15f   :  { %4583 = vmatprep.subr.bf16.mxu0 %v4812_v41 }
 0x160   :  { %739 = vmatmul.mubr.bf16.gmra.mxu0 %v5212_v2  ;;  %771 = vmatmul.mubr.bf16.gmra.mxu1 %v5216_v3 }
 0x161   :  { %746 = vmatprep.mubr.bf16.mxu0 %v5220_v10  ;;  %778 = vmatprep.mubr.bf16.mxu1 %v5224_v11 }
 0x162   :  { %4584 = vmatpush3.bf16.msra.mxu0 %v4812_v41 }
 0x163   :  { %4585 = vmatprep.subr.bf16.mxu0 %v4813_v42 }
 0x166   :  { %4586 = vmatpush3.bf16.msra.mxu0 %v4813_v42 }
 0x167   :  { %4587 = vmatprep.subr.bf16.mxu0 %v4814_v47 }
 0x168   :  { %747 = vmatmul.mubr.bf16.gmra.mxu0 %v5232_v4  ;;  %779 = vmatmul.mubr.bf16.gmra.mxu1 %v5236_v5 }
 0x169   :  { %786 = vmatprep.mubr.bf16.mxu1 %v5240_v12 }
 0x16a   :  { %4588 = vmatpush3.bf16.msra.mxu0 %v4814_v47 }
 0x16b   :  { %4589 = vmatprep.subr.bf16.mxu0 %v4815_v48 }
 0x16e   :  { %4590 = vmatpush3.bf16.msra.mxu0 %v4815_v48 }
 0x170   :  { %787 = vmatmul.mubr.bf16.gmra.mxu1 %v5247_v13 }
 0x171   :  { %794 = vmatprep.mubr.bf16.mxu1 %v5251_v6 }
 0x178   :  { %795 = vmatmul.mubr.bf16.gmra.mxu1 %v5257_v7 }
 0x179   :  { %802 = vmatprep.mubr.bf16.mxu1 %v5261_v14 }
 0x180   :  { %803 = vmatmul.mubr.bf16.gmra.mxu1 %v5267_v15 }
 0x181   :  { %810 = vmatprep.mubr.bf16.mxu1 %v5271_v16 }
 0x188   :  { %811 = vmatmul.mubr.bf16.gmra.mxu1 %v5277_v17 }
 0x189   :  { %818 = vmatprep.mubr.bf16.mxu1 %v5281_v19 }
 0x190   :  { %819 = vmatmul.mubr.bf16.gmra.mxu1 %v5287_v20 }
 0x191   :  { %826 = vmatprep.mubr.bf16.mxu1 %v5291_v34 }
 0x198   :  { %827 = vmatmul.mubr.bf16.gmra.mxu1 %v5303_v25 }
 0x199   :  { %834 = vmatprep.mubr.bf16.mxu1 %v5307_v40 }
 0x1a0   :  { %835 = vmatmul.mubr.bf16.gmra.mxu1 %v5319_v43 }
 0x1a1   :  { %842 = vmatprep.mubr.bf16.mxu1 %v5323_v46 }
 0x1a8   :  { %843 = vmatmul.mubr.bf16.gmra.mxu1 %v5335_v49 }
 0x210   :  { %v3887_v50 = vpop.f32.mrf.mxu0  ;;  %v3911_v51 = vpop.f32.mrf.mxu1 }
 0x212   :  { %v3888_v52 = vpop.f32.mrf.mxu0  ;;  %v3912_v53 = vpop.f32.mrf.mxu1 }
 0x213   :  { %v3889_v54 = vadd.f32 %v3888_v52, %v3887_v50 }
 0x214   :  { %v3890_v55 = vpop.f32.mrf.mxu0  ;;  %v3914_v36 = vpop.f32.mrf.mxu1 }
 0x215   :  { %v851_v31 = vmax.f32 %v3889_v54, 0.0 }
 0x216   :  { %v3891_v30 = vpop.f32.mrf.mxu0  ;;  %v3915_v28 = vpop.f32.mrf.mxu1 }
 0x217   :  { %v3892_v37 = vadd.f32 %v3891_v30, %v3890_v55 }
 0x218   :  { %v3893_v38 = vpop.f32.mrf.mxu0  ;;  %v3917_v29 = vpop.f32.mrf.mxu1 }
 0x219   :  { %v852_v26 = vmax.f32 %v3892_v37, 0.0 }
 0x21a   :  { %v3894_v32 = vpop.f32.mrf.mxu0  ;;  %v3918_v33 = vpop.f32.mrf.mxu1 }
 0x21b   :  { %v3895_v60 = vadd.f32 %v3894_v32, %v3893_v38  ;;  %v883_v61 = vpack.c.bf16 %v852_v26, %v851_v31 }
 0x21c   :  { %v3896_v57 = vpop.f32.mrf.mxu0  ;;  %v3920_v18 = vpop.f32.mrf.mxu1 }
 0x21d   :  { %4591 = vmatprep.mubr.bf16.mxu0 %v883_v61  ;;  %v853_v22 = vmax.f32 %v3895_v60, 0.0 }
 0x21e   :  { %v3897_v21 = vpop.f32.mrf.mxu0  ;;  %v3921_v59 = vpop.f32.mrf.mxu1 }
 0x21f   :  { %v3898_v23 = vadd.f32 %v3897_v21, %v3896_v57  ;;  %v3916_v57 = vadd.f32 %v3915_v28, %v3914_v36  ;;  %v3922_v43 = vadd.f32 %v3921_v59, %v3920_v18 }
 0x220   :  { %v3899_v35 = vpop.f32.mrf.mxu0  ;;  %v3923_v39 = vpop.f32.mrf.mxu1 }
 0x221   :  { %v854_v41 = vmax.f32 %v3898_v23, 0.0  ;;  %v860_v49 = vmax.f32 %v3916_v57, 0.0 }
 0x222   :  { %v3900_v42 = vpop.f32.mrf.mxu0  ;;  %v3924_v44 = vpop.f32.mrf.mxu1 }
 0x223   :  { %v884_v45 = vpack.c.bf16 %v854_v41, %v853_v22  ;;  %v3901_v47 = vadd.f32 %v3900_v42, %v3899_v35  ;;  %v3913_v22 = vadd.f32 %v3912_v53, %v3911_v51  ;;  %v3925_v36 = vadd.f32 %v3924_v44, %v3923_v39 }
 0x224   :  { %v3902_v48 = vpop.f32.mrf.mxu0  ;;  %v3926_v50 = vpop.f32.mrf.mxu1  ;;  %v862_v51 = vmax.f32 %v3922_v43, 0.0 }
 0x225   :  { %4592 = vmatmul.mubr.bf16.vlgmr.msra.gmra.mxu0 %v884_v45  ;;  %v855_v55 = vmax.f32 %v3901_v47, 0.0 }
 0x226   :  { %v3903_v52 = vpop.f32.mrf.mxu0  ;;  %v3927_v54 = vpop.f32.mrf.mxu1 }
 0x227   :  { %v3904_v30 = vadd.f32 %v3903_v52, %v3902_v48  ;;  %v859_v48 = vmax.f32 %v3913_v22, 0.0  ;;  %v3928_v40 = vadd.f32 %v3927_v54, %v3926_v50 }
 0x228   :  { %v3905_v31 = vpop.f32.mrf.mxu0  ;;  %v3929_v37 = vpop.f32.mrf.mxu1 }
 0x229   :  { %v856_v38 = vmax.f32 %v3904_v30, 0.0  ;;  %v864_v53 = vmax.f32 %v3928_v40, 0.0 }
 0x22a   :  { %v3906_v26 = vpop.f32.mrf.mxu0  ;;  %v3930_v32 = vpop.f32.mrf.mxu1 }
 0x22b   :  { %v3907_v60 = vadd.f32 %v3906_v26, %v3905_v31  ;;  %v885_v61 = vpack.c.bf16 %v856_v38, %v855_v55  ;;  %v887_v31 = vpack.c.bf16 %v860_v49, %v859_v48  ;;  %v3919_v55 = vadd.f32 %v3918_v33, %v3917_v29 }
 0x22c   :  { %v3908_v21 = vpop.f32.mrf.mxu0  ;;  %v3932_v23 = vpop.f32.mrf.mxu1  ;;  %v3931_v59 = vadd.f32 %v3930_v32, %v3929_v37 }
 0x22d   :  { %4595 = vmatprep.mubr.bf16.mxu0 %v885_v61  ;;  %v857_v42 = vmax.f32 %v3907_v60, 0.0  ;;  %v861_v26 = vmax.f32 %v3919_v55, 0.0  ;;  %v863_v60 = vmax.f32 %v3925_v36, 0.0 }
 0x22e   :  { %v3909_v35 = vpop.f32.mrf.mxu0  ;;  %v3933_v41 = vpop.f32.mrf.mxu1  ;;  %v865_v44 = vmax.f32 %v3931_v59, 0.0 }
 0x22f   :  { %v3910_v45 = vadd.f32 %v3909_v35, %v3908_v21  ;;  %v3934_v57 = vadd.f32 %v3933_v41, %v3932_v23  ;;  %v888_v21 = vpack.c.bf16 %v862_v51, %v861_v26  ;;  %v889_v18 = vpack.c.bf16 %v864_v53, %v863_v60 }
 0x230   :  { %v3935_v46 = vpop.f32.mrf.mxu1 }
 0x231   :  { %v858_v47 = vmax.f32 %v3910_v45, 0.0  ;;  %v866_v29 = vmax.f32 %v3934_v57, 0.0 }
 0x232   :  { %v3936_v52 = vpop.f32.mrf.mxu1 }
 0x233   :  { %v886_v30 = vpack.c.bf16 %v858_v47, %v857_v42  ;;  %v3937_v50 = vadd.f32 %v3936_v52, %v3935_v46  ;;  %v890_v42 = vpack.c.bf16 %v866_v29, %v865_v44 }
 0x234   :  { %v3938_v25 = vpop.f32.mrf.mxu1 }
 0x235   :  { %4596 = vmatmul.mubr.bf16.gmra.mxu0 %v886_v30  ;;  %v867_v43 = vmax.f32 %v3937_v50, 0.0 }
 0x236   :  { %v3939_v28 = vpop.f32.mrf.mxu1  ;;  %4599 = vmatprep.mubr.bf16.mxu0 %v887_v31 }
 0x237   :  { %v3940_v22 = vadd.f32 %v3939_v28, %v3938_v25 }
 0x238   :  { %v3941_v38 = vpop.f32.mrf.mxu1 }
 0x239   :  { %v868_v33 = vmax.f32 %v3940_v22, 0.0 }
 0x23a   :  { %v3942_v61 = vpop.f32.mrf.mxu1 }
 0x23b   :  { %v891_v47 = vpack.c.bf16 %v868_v33, %v867_v43  ;;  %v3943_v23 = vadd.f32 %v3942_v61, %v3941_v38 }
 0x23c   :  { %v3944_v35 = vpop.f32.mrf.mxu1 }
 0x23d   :  { %4600 = vmatmul.mubr.bf16.gmra.mxu0 %v888_v21  ;;  %v869_v48 = vmax.f32 %v3943_v23, 0.0 }
 0x23e   :  { %v3945_v49 = vpop.f32.mrf.mxu1  ;;  %4603 = vmatprep.mubr.bf16.mxu0 %v889_v18 }
 0x23f   :  { %v3946_v54 = vadd.f32 %v3945_v49, %v3944_v35 }
 0x240   :  { %v3947_v39 = vpop.f32.mrf.mxu1 }
 0x241   :  { %v870_v37 = vmax.f32 %v3946_v54, 0.0 }
 0x242   :  { %v3948_v40 = vpop.f32.mrf.mxu1 }
 0x243   :  { %v3949_v41 = vadd.f32 %v3948_v40, %v3947_v39  ;;  %v892_v55 = vpack.c.bf16 %v870_v37, %v869_v48 }
 0x244   :  { %v3950_v45 = vpop.f32.mrf.mxu1 }
 0x245   :  { %4604 = vmatmul.mubr.bf16.gmra.mxu0 %v890_v42  ;;  %v871_v52 = vmax.f32 %v3949_v41, 0.0 }
 0x246   :  { %v3951_v25 = vpop.f32.mrf.mxu1  ;;  %4607 = vmatprep.mubr.bf16.mxu0 %v891_v47 }
 0x247   :  { %v3952_v32 = vadd.f32 %v3951_v25, %v3950_v45 }
 0x248   :  { %v3953_v46 = vpop.f32.mrf.mxu1 }
 0x249   :  { %v872_v30 = vmax.f32 %v3952_v32, 0.0 }
 0x24a   :  { %v3954_v31 = vpop.f32.mrf.mxu1 }
 0x24b   :  { %v893_v36 = vpack.c.bf16 %v872_v30, %v871_v52  ;;  %v3955_v51 = vadd.f32 %v3954_v31, %v3953_v46 }
 0x24c   :  { %v3956_v28 = vpop.f32.mrf.mxu1 }
 0x24d   :  { %4608 = vmatmul.mubr.bf16.gmra.mxu0 %v892_v55  ;;  %v873_v60 = vmax.f32 %v3955_v51, 0.0 }
 0x24e   :  { %v3957_v53 = vpop.f32.mrf.mxu1  ;;  %4611 = vmatprep.mubr.bf16.mxu0 %v893_v36 }
 0x24f   :  { %v3958_v26 = vadd.f32 %v3957_v53, %v3956_v28 }
 0x250   :  { %v3959_v38 = vpop.f32.mrf.mxu1 }
 0x251   :  { %v874_v61 = vmax.f32 %v3958_v26, 0.0 }
 0x252   :  { %v3960_v57 = vpop.f32.mrf.mxu1 }
 0x253   :  { %v894_v21 = vpack.c.bf16 %v874_v61, %v873_v60  ;;  %v3961_v35 = vadd.f32 %v3960_v57, %v3959_v38 }
 0x254   :  { %v3962_v22 = vpop.f32.mrf.mxu1 }
 0x255   :  { %4612 = vmatmul.mubr.bf16.gmra.mxu0 %v894_v21  ;;  %v875_v49 = vmax.f32 %v3961_v35, 0.0 }
 0x256   :  { %v3963_v18 = vpop.f32.mrf.mxu1 }
 0x257   :  { %v3964_v59 = vadd.f32 %v3963_v18, %v3962_v22 }
 0x258   :  { %v3965_v50 = vpop.f32.mrf.mxu1 }
 0x259   :  { %v876_v29 = vmax.f32 %v3964_v59, 0.0 }
 0x25a   :  { %v3966_v33 = vpop.f32.mrf.mxu1 }
 0x25b   :  { %v895_v39 = vpack.c.bf16 %v876_v29, %v875_v49  ;;  %v3967_v43 = vadd.f32 %v3966_v33, %v3965_v50 }
 0x25c   :  { %v3968_v44 = vpop.f32.mrf.mxu1 }
 0x25d   :  { %4615 = vmatprep.mubr.bf16.mxu0 %v895_v39  ;;  %v877_v45 = vmax.f32 %v3967_v43, 0.0 }
 0x25e   :  { %v3969_v40 = vpop.f32.mrf.mxu1 }
 0x25f   :  { %v3970_v54 = vadd.f32 %v3969_v40, %v3968_v44 }
 0x260   :  { %v3971_v42 = vpop.f32.mrf.mxu1 }
 0x261   :  { %v878_v47 = vmax.f32 %v3970_v54, 0.0 }
 0x262   :  { %v3972_v23 = vpop.f32.mrf.mxu1 }
 0x263   :  { %v896_v41 = vpack.c.bf16 %v878_v47, %v877_v45  ;;  %v3973_v37 = vadd.f32 %v3972_v23, %v3971_v42 }
 0x264   :  { %v3974_v25 = vpop.f32.mrf.mxu1 }
 0x265   :  { %4616 = vmatmul.mubr.bf16.gmra.mxu0 %v896_v41  ;;  %v879_v52 = vmax.f32 %v3973_v37, 0.0 }
 0x266   :  { %v3975_v32 = vpop.f32.mrf.mxu1 }
 0x267   :  { %v3976_v46 = vadd.f32 %v3975_v32, %v3974_v25 }
 0x268   :  { %v3977_v48 = vpop.f32.mrf.mxu1 }
 0x269   :  { %v880_v30 = vmax.f32 %v3976_v46, 0.0 }
 0x26a   :  { %v3978_v31 = vpop.f32.mrf.mxu1 }
 0x26b   :  { %v897_v55 = vpack.c.bf16 %v880_v30, %v879_v52  ;;  %v3979_v28 = vadd.f32 %v3978_v31, %v3977_v48 }
 0x26c   :  { %v3980_v36 = vpop.f32.mrf.mxu1 }
 0x26d   :  { %4619 = vmatprep.mubr.bf16.mxu0 %v897_v55  ;;  %v881_v26 = vmax.f32 %v3979_v28, 0.0 }
 0x26e   :  { %v3981_v51 = vpop.f32.mrf.mxu1 }
 0x26f   :  { %v3982_v53 = vadd.f32 %v3981_v51, %v3980_v36 }
 0x271   :  { %v882_v38 = vmax.f32 %v3982_v53, 0.0 }
 0x273   :  { %v898_v60 = vpack.c.bf16 %v882_v38, %v881_v26 }
 0x275   :  { %4620 = vmatmul.mubr.bf16.gmra.mxu0 %v898_v60 }
 0x276   :  { %1173 = vmatprep.mubr.bf16.mxu0 %v5151_v27 }
 0x2e5   :  { %v4593_v61 = vpop.f32.mrf.mxu0 }
 0x2e7   :  { %v5339_v57 = vpop.f32.mrf.mxu0 }
 0x2e9   :  { %v4594_v21 = vpop.f32.mrf.mxu0 }
 0x2ea   :  { %v1126_v22 = vpack.c.bf16 %v4594_v21, %v4593_v61 }
 0x2eb   :  { %v5341_v35 = vpop.f32.mrf.mxu0 }
 0x2f5   :  { %v4597_v18 = vpop.f32.mrf.mxu0 }
 0x2f7   :  { %v1014_v59 = vpop.f32.mrf.mxu0 }
 0x2f9   :  { %v4598_v50 = vpop.f32.mrf.mxu0 }
 0x2fa   :  { %v1128_v49 = vpack.c.bf16 %v4598_v50, %v4597_v18 }
 0x2fb   :  { %v1017_v29 = vpop.f32.mrf.mxu0 }
 0x2fd   :  { %v4601_v33 = vpop.f32.mrf.mxu0 }
 0x2ff   :  { %v1030_v39 = vpop.f32.mrf.mxu0 }
 0x301   :  { %v4602_v44 = vpop.f32.mrf.mxu0 }
 0x302   :  { %v1130_v18 = vpack.c.bf16 %v4602_v44, %v4601_v33  ;;  %v4817_v33 = vld [vmem:[%s6061_s1 + $0xb0] sm:$0xff]   ;;  %v6127_v44 = vld [vmem:[#allocation10_spill] sm:$0xff] }
 0x303   :  { %v1033_v43 = vpop.f32.mrf.mxu0 }
 0x304   :  { %v1129_v27 = vpack.c.bf16 %v1033_v43, %v1030_v39  ;;  %v6126_v39 = vld [vmem:[#allocation7_spill] sm:$0xff]  ;;  %v6128_v43 = vld [vmem:[#allocation9_spill] sm:$0xff] }
 0x305   :  { %v4605_v40 = vpop.f32.mrf.mxu0 }
 0x307   :  { %v1046_v54 = vpop.f32.mrf.mxu0 }
 0x309   :  { %v4606_v42 = vpop.f32.mrf.mxu0 }
 0x30a   :  { %v1132_v26 = vpack.c.bf16 %v4606_v42, %v4605_v40  ;;  %v1127_v40 = vpack.c.bf16 %v1017_v29, %v1014_v59  ;;  %v4823_v59 = vld [vmem:[%s6061_s1 + $0x80] sm:$0xff]   ;;  %v6125_v29 = vld [vmem:[#allocation8_spill] sm:$0xff] }
 0x30b   :  { %v1049_v45 = vpop.f32.mrf.mxu0 }
 0x30c   :  { %v1131_v61 = vpack.c.bf16 %v1049_v45, %v1046_v54  ;;  %v4816_v54 = vld [vmem:[%s6061_s1 + $0xb8] sm:$0xff]   ;;  %v6129_v45 = vld [vmem:[#allocation12_spill] sm:$0xff] }
 0x30d   :  { %v4609_v47 = vpop.f32.mrf.mxu0  ;;  %4623 = vmatprep.subr.bf16.mxu1 %v4816_v54 }
 0x30e   :  { %4624 = vmatpush3.bf16.msra.mxu1 %v4816_v54 }
 0x30f   :  { %v1062_v23 = vpop.f32.mrf.mxu0  ;;  %4625 = vmatprep.subr.bf16.mxu1 %v4817_v33 }
 0x311   :  { %v4610_v41 = vpop.f32.mrf.mxu0 }
 0x312   :  { %v1134_v42 = vpack.c.bf16 %v4610_v41, %v4609_v47  ;;  %4626 = vmatpush3.bf16.msra.mxu1 %v4817_v33  ;;  %v6130_v47 = vld [vmem:[#allocation11_spill] sm:$0xff] }
 0x313   :  { %v1065_v25 = vpop.f32.mrf.mxu0 }
 0x315   :  { %v4613_v37 = vpop.f32.mrf.mxu0 }
 0x317   :  { %v1078_v32 = vpop.f32.mrf.mxu0 }
 0x319   :  { %v4614_v46 = vpop.f32.mrf.mxu0 }
 0x31a   :  { %v1136_v34 = vpack.c.bf16 %v4614_v46, %v4613_v37 }
 0x31b   :  { %v1081_v48 = vpop.f32.mrf.mxu0 }
 0x31c   :  { %v1135_v20 = vpack.c.bf16 %v1081_v48, %v1078_v32 }
 0x325   :  { %v4617_v52 = vpop.f32.mrf.mxu0 }
 0x327   :  { %v1094_v30 = vpop.f32.mrf.mxu0 }
 0x329   :  { %v4618_v31 = vpop.f32.mrf.mxu0 }
 0x32a   :  { %v1138_v21 = vpack.c.bf16 %v4618_v31, %v4617_v52 }
 0x32b   :  { %v1097_v55 = vpop.f32.mrf.mxu0 }
 0x32c   :  { %v1137_v50 = vpack.c.bf16 %v1097_v55, %v1094_v30 }
 0x335   :  { %v4621_v36 = vpop.f32.mrf.mxu0 }
 0x337   :  { %v1110_v28 = vpop.f32.mrf.mxu0 }
 0x339   :  { %v4622_v51 = vpop.f32.mrf.mxu0 }
 0x33a   :  { %v1140_v53 = vpack.c.bf16 %v4622_v51, %v4621_v36  ;;  %v1133_v36 = vpack.c.bf16 %v1065_v25, %v1062_v23 }
 0x33b   :  { %v1113_v38 = vpop.f32.mrf.mxu0 }
 0x33c   :  { %v1139_v60 = vpack.c.bf16 %v1113_v38, %v1110_v28  ;;  %4007 = vmatprep.subr.bf16.mxu0 %v1140_v53 }
 0x33d   :  { %4008 = vmatpush3.bf16.msra.mxu0 %v1132_v26 }
 0x33e   :  { %4009 = vmatprep.subr.bf16.mxu0 %v1139_v60 }
 0x341   :  { %4010 = vmatpush3.bf16.msra.mxu0 %v1131_v61 }
 0x342   :  { %4011 = vmatprep.subr.bf16.mxu0 %v1138_v21 }
 0x345   :  { %4012 = vmatpush3.bf16.msra.mxu0 %v1130_v18 }
 0x346   :  { %4013 = vmatprep.subr.bf16.mxu0 %v1137_v50 }
 0x349   :  { %4014 = vmatpush3.bf16.msra.mxu0 %v1129_v27  ;;  %v1125_v27 = vpack.c.bf16 %v5341_v35, %v5339_v57  ;;  %v4820_v57 = vld [vmem:[%s6061_s1 + $0x98] sm:$0xff]   ;;  %v4822_v35 = vld [vmem:[%s6061_s1 + $0x88] sm:$0xff]  }
 0x34a   :  { %4015 = vmatprep.subr.bf16.mxu0 %v1136_v34  ;;  %v4819_v34 = vld [vmem:[%s6061_s1 + $0xa0] sm:$0xff]  }
 0x34d   :  { %4016 = vmatpush3.bf16.msra.mxu0 %v1128_v49  ;;  %v6124_v49 = vld [vmem:[#allocation16_spill] sm:$0xff] }
 0x34e   :  { %4017 = vmatprep.subr.bf16.mxu0 %v1135_v20  ;;  %v4818_v20 = vld [vmem:[%s6061_s1 + $0xa8] sm:$0xff]  }
 0x34f   :  { %4627 = vmatprep.subr.bf16.mxu1 %v4818_v20 }
 0x350   :  { %4628 = vmatpush3.bf16.msra.mxu1 %v4818_v20 }
 0x351   :  { %4018 = vmatpush3.bf16.msra.mxu0 %v1127_v40  ;;  %4629 = vmatprep.subr.bf16.mxu1 %v4819_v34 }
 0x352   :  { %4019 = vmatprep.subr.bf16.mxu0 %v1134_v42 }
 0x354   :  { %4630 = vmatpush3.bf16.msra.mxu1 %v4819_v34 }
 0x355   :  { %4020 = vmatpush3.bf16.msra.mxu0 %v1126_v22  ;;  %4631 = vmatprep.subr.bf16.mxu1 %v4820_v57  ;;  %v4821_v22 = vld [vmem:[%s6061_s1 + $0x90] sm:$0xff]  }
 0x356   :  { %4021 = vmatprep.subr.bf16.mxu0 %v1133_v36 }
 0x358   :  { %4632 = vmatpush3.bf16.msra.mxu1 %v4820_v57 }
 0x359   :  { %4022 = vmatpush3.bf16.msra.mxu0 %v1125_v27  ;;  %4633 = vmatprep.subr.bf16.mxu1 %v4821_v22 }
 0x35c   :  { %1174 = vmatmul.mubr.bf16.vlgmr.msra.gmra.mxu0 %v5169_v62  ;;  %4634 = vmatpush3.bf16.msra.mxu1 %v4821_v22 }
 0x35d   :  { %1181 = vmatprep.mubr.bf16.mxu0 %v5177_v58  ;;  %4635 = vmatprep.subr.bf16.mxu1 %v4822_v35 }
 0x360   :  { %4636 = vmatpush3.bf16.msra.mxu1 %v4822_v35 }
 0x361   :  { %4637 = vmatprep.subr.bf16.mxu1 %v4823_v59 }
 0x364   :  { %1182 = vmatmul.mubr.bf16.gmra.mxu0 %v5192_v0  ;;  %4638 = vmatpush3.bf16.msra.mxu1 %v4823_v59 }
 0x365   :  { %1189 = vmatprep.mubr.bf16.mxu0 %v5200_v8 }
 0x36c   :  { %1190 = vmatmul.mubr.bf16.gmra.mxu0 %v5212_v2 }
 0x36d   :  { %1197 = vmatprep.mubr.bf16.mxu0 %v5220_v10 }
 0x374   :  { %1198 = vmatmul.mubr.bf16.gmra.mxu0 %v5232_v4 }
 0x375   :  { %1205 = vmatprep.mubr.bf16.mxu0 %v5155_v24 }
 0x37c   :  { %1206 = vmatmul.mubr.bf16.gmra.mxu0 %v5173_v56 }
 0x37d   :  { %1213 = vmatprep.mubr.bf16.mxu0 %v5181_v63 }
 0x384   :  { %1214 = vmatmul.mubr.bf16.gmra.mxu0 %v5196_v1 }
 0x385   :  { %1221 = vmatprep.mubr.bf16.mxu0 %v5204_v9 }
 0x38c   :  { %1222 = vmatmul.mubr.bf16.gmra.mxu0 %v5216_v3 }
 0x38d   :  { %1229 = vmatprep.mubr.bf16.mxu0 %v5224_v11 }
 0x394   :  { %1230 = vmatmul.mubr.bf16.gmra.mxu0 %v5236_v5 }
 0x395   :  { %1237 = vmatprep.mubr.bf16.mxu0 %v5240_v12 }
 0x39c   :  { %1238 = vmatmul.mubr.bf16.gmra.mxu0 %v5247_v13 }
 0x39d   :  { %1245 = vmatprep.mubr.bf16.mxu0 %v5251_v6 }
 0x3a4   :  { %1246 = vmatmul.mubr.bf16.gmra.mxu0 %v5257_v7 }
 0x3a5   :  { %1253 = vmatprep.mubr.bf16.mxu0 %v5261_v14 }
 0x3ac   :  { %1254 = vmatmul.mubr.bf16.gmra.mxu0 %v5267_v15 }
 0x3ad   :  { %1261 = vmatprep.mubr.bf16.mxu0 %v5271_v16 }
 0x3b4   :  { %1262 = vmatmul.mubr.bf16.gmra.mxu0 %v5277_v17 }
 0x3b5   :  { %1269 = vmatprep.mubr.bf16.mxu0 %v5281_v19 }
 0x3bc   :  { %1270 = vmatmul.mubr.bf16.gmra.mxu0 %v6124_v49 }
 0x3bd   :  { %1277 = vmatprep.mubr.bf16.mxu0 %v6125_v29 }
 0x3c4   :  { %1278 = vmatmul.mubr.bf16.gmra.mxu0 %v6126_v39  ;;  %v4824_v39 = vld [vmem:[%s6062_s2 + $0x70] ss:$8 sps:$4 sm:$0xff]  }
 0x3c5   :  { %1285 = vmatprep.mubr.bf16.mxu0 %v6127_v44 }
 0x3cc   :  { %1286 = vmatmul.mubr.bf16.gmra.mxu0 %v6128_v43 }
 0x3cd   :  { %1293 = vmatprep.mubr.bf16.mxu0 %v6129_v45 }
 0x3d4   :  { %1294 = vmatmul.mubr.bf16.gmra.mxu0 %v6130_v47 }
 0x41c   :  { %v4023_v23 = vpop.f32.mrf.mxu0 }
 0x41e   :  { %v4024_v41 = vpop.f32.mrf.mxu0 }
 0x41f   :  { %v4025_v37 = vadd.f32 %v4024_v41, %v4023_v23 }
 0x420   :  { %v4026_v25 = vpop.f32.mrf.mxu0 }
 0x421   :  { %v1302_v52 = vmax.f32 %v4025_v37, 0.0 }
 0x422   :  { %v4027_v32 = vpop.f32.mrf.mxu0 }
 0x423   :  { %v4028_v46 = vadd.f32 %v4027_v32, %v4026_v25 }
 0x424   :  { %v4029_v48 = vpop.f32.mrf.mxu0 }
 0x425   :  { %v1303_v30 = vmax.f32 %v4028_v46, 0.0 }
 0x426   :  { %v4030_v31 = vpop.f32.mrf.mxu0 }
 0x427   :  { %v1334_v55 = vpack.c.bf16 %v1303_v30, %v1302_v52  ;;  %v4031_v51 = vadd.f32 %v4030_v31, %v4029_v48 }
 0x428   :  { %v4032_v28 = vpop.f32.mrf.mxu0 }
 0x429   :  { %4639 = vmatprep.mubr.bf16.mxu1 %v1334_v55  ;;  %v1304_v60 = vmax.f32 %v4031_v51, 0.0 }
 0x42a   :  { %v4033_v53 = vpop.f32.mrf.mxu0 }
 0x42b   :  { %v4034_v26 = vadd.f32 %v4033_v53, %v4032_v28 }
 0x42c   :  { %v4035_v38 = vpop.f32.mrf.mxu0 }
 0x42d   :  { %v1305_v61 = vmax.f32 %v4034_v26, 0.0 }
 0x42e   :  { %v4036_v21 = vpop.f32.mrf.mxu0 }
 0x42f   :  { %v1335_v18 = vpack.c.bf16 %v1305_v61, %v1304_v60  ;;  %v4037_v40 = vadd.f32 %v4036_v21, %v4035_v38 }
 0x430   :  { %v4038_v50 = vpop.f32.mrf.mxu0 }
 0x431   :  { %4640 = vmatmul.mubr.bf16.vlgmr.msra.gmra.mxu1 %v1335_v18  ;;  %v1306_v33 = vmax.f32 %v4037_v40, 0.0 }
 0x432   :  { %v4039_v42 = vpop.f32.mrf.mxu0 }
 0x433   :  { %v4040_v36 = vadd.f32 %v4039_v42, %v4038_v50 }
 0x434   :  { %v4041_v54 = vpop.f32.mrf.mxu0 }
 0x435   :  { %v1307_v27 = vmax.f32 %v4040_v36, 0.0 }
 0x436   :  { %v4042_v20 = vpop.f32.mrf.mxu0 }
 0x437   :  { %v1336_v34 = vpack.c.bf16 %v1307_v27, %v1306_v33  ;;  %v4043_v22 = vadd.f32 %v4042_v20, %v4041_v54 }
 0x438   :  { %v4044_v57 = vpop.f32.mrf.mxu0 }
 0x439   :  { %4643 = vmatprep.mubr.bf16.mxu1 %v1336_v34  ;;  %v1308_v41 = vmax.f32 %v4043_v22, 0.0 }
 0x43a   :  { %v4045_v35 = vpop.f32.mrf.mxu0 }
 0x43b   :  { %v4046_v59 = vadd.f32 %v4045_v35, %v4044_v57 }
 0x43c   :  { %v4047_v23 = vpop.f32.mrf.mxu0 }
 0x43d   :  { %v1309_v25 = vmax.f32 %v4046_v59, 0.0 }
 0x43e   :  { %v4048_v37 = vpop.f32.mrf.mxu0 }
 0x43f   :  { %v1337_v32 = vpack.c.bf16 %v1309_v25, %v1308_v41  ;;  %v4049_v48 = vadd.f32 %v4048_v37, %v4047_v23 }
 0x440   :  { %v4050_v46 = vpop.f32.mrf.mxu0 }
 0x441   :  { %4644 = vmatmul.mubr.bf16.gmra.mxu1 %v1337_v32  ;;  %v1310_v55 = vmax.f32 %v4049_v48, 0.0 }
 0x442   :  { %v4051_v52 = vpop.f32.mrf.mxu0 }
 0x443   :  { %v4052_v30 = vadd.f32 %v4051_v52, %v4050_v46 }
 0x444   :  { %v4053_v31 = vpop.f32.mrf.mxu0 }
 0x445   :  { %v1311_v28 = vmax.f32 %v4052_v30, 0.0 }
 0x446   :  { %v4054_v51 = vpop.f32.mrf.mxu0 }
 0x447   :  { %v1338_v53 = vpack.c.bf16 %v1311_v28, %v1310_v55  ;;  %v4055_v38 = vadd.f32 %v4054_v51, %v4053_v31 }
 0x448   :  { %v4056_v26 = vpop.f32.mrf.mxu0 }
 0x449   :  { %4647 = vmatprep.mubr.bf16.mxu1 %v1338_v53  ;;  %v1312_v18 = vmax.f32 %v4055_v38, 0.0 }
 0x44a   :  { %v4057_v60 = vpop.f32.mrf.mxu0 }
 0x44b   :  { %v4058_v61 = vadd.f32 %v4057_v60, %v4056_v26 }
 0x44c   :  { %v4059_v21 = vpop.f32.mrf.mxu0 }
 0x44d   :  { %v1313_v50 = vmax.f32 %v4058_v61, 0.0 }
 0x44e   :  { %v4060_v40 = vpop.f32.mrf.mxu0 }
 0x44f   :  { %v1339_v42 = vpack.c.bf16 %v1313_v50, %v1312_v18  ;;  %v4061_v54 = vadd.f32 %v4060_v40, %v4059_v21 }
 0x450   :  { %v4062_v36 = vpop.f32.mrf.mxu0 }
 0x451   :  { %4648 = vmatmul.mubr.bf16.gmra.mxu1 %v1339_v42  ;;  %v1314_v34 = vmax.f32 %v4061_v54, 0.0 }
 0x452   :  { %v4063_v33 = vpop.f32.mrf.mxu0 }
 0x453   :  { %v4064_v27 = vadd.f32 %v4063_v33, %v4062_v36 }
 0x454   :  { %v4065_v20 = vpop.f32.mrf.mxu0 }
 0x455   :  { %v1315_v57 = vmax.f32 %v4064_v27, 0.0 }
 0x456   :  { %v4066_v22 = vpop.f32.mrf.mxu0 }
 0x457   :  { %v1340_v35 = vpack.c.bf16 %v1315_v57, %v1314_v34  ;;  %v4067_v23 = vadd.f32 %v4066_v22, %v4065_v20 }
 0x458   :  { %v4068_v59 = vpop.f32.mrf.mxu0 }
 0x459   :  { %4651 = vmatprep.mubr.bf16.mxu1 %v1340_v35  ;;  %v1316_v32 = vmax.f32 %v4067_v23, 0.0 }
 0x45a   :  { %v4069_v41 = vpop.f32.mrf.mxu0 }
 0x45b   :  { %v4070_v25 = vadd.f32 %v4069_v41, %v4068_v59 }
 0x45c   :  { %v4071_v37 = vpop.f32.mrf.mxu0 }
 0x45d   :  { %v1317_v46 = vmax.f32 %v4070_v25, 0.0 }
 0x45e   :  { %v4072_v48 = vpop.f32.mrf.mxu0 }
 0x45f   :  { %v1341_v52 = vpack.c.bf16 %v1317_v46, %v1316_v32  ;;  %v4073_v31 = vadd.f32 %v4072_v48, %v4071_v37 }
 0x460   :  { %v4074_v30 = vpop.f32.mrf.mxu0 }
 0x461   :  { %4652 = vmatmul.mubr.bf16.gmra.mxu1 %v1341_v52  ;;  %v1318_v53 = vmax.f32 %v4073_v31, 0.0 }
 0x462   :  { %v4075_v55 = vpop.f32.mrf.mxu0 }
 0x463   :  { %v4076_v28 = vadd.f32 %v4075_v55, %v4074_v30 }
 0x464   :  { %v4077_v51 = vpop.f32.mrf.mxu0 }
 0x465   :  { %v1319_v26 = vmax.f32 %v4076_v28, 0.0 }
 0x466   :  { %v4078_v38 = vpop.f32.mrf.mxu0 }
 0x467   :  { %v1342_v60 = vpack.c.bf16 %v1319_v26, %v1318_v53  ;;  %v4079_v21 = vadd.f32 %v4078_v38, %v4077_v51 }
 0x468   :  { %v4080_v61 = vpop.f32.mrf.mxu0 }
 0x469   :  { %4655 = vmatprep.mubr.bf16.mxu1 %v1342_v60  ;;  %v1320_v42 = vmax.f32 %v4079_v21, 0.0 }
 0x46a   :  { %v4081_v18 = vpop.f32.mrf.mxu0 }
 0x46b   :  { %v4082_v50 = vadd.f32 %v4081_v18, %v4080_v61 }
 0x46c   :  { %v4083_v40 = vpop.f32.mrf.mxu0 }
 0x46d   :  { %v1321_v36 = vmax.f32 %v4082_v50, 0.0 }
 0x46e   :  { %v4084_v54 = vpop.f32.mrf.mxu0 }
 0x46f   :  { %v1343_v33 = vpack.c.bf16 %v1321_v36, %v1320_v42  ;;  %v4085_v20 = vadd.f32 %v4084_v54, %v4083_v40 }
 0x470   :  { %v4086_v27 = vpop.f32.mrf.mxu0 }
 0x471   :  { %4656 = vmatmul.mubr.bf16.gmra.mxu1 %v1343_v33  ;;  %v1322_v35 = vmax.f32 %v4085_v20, 0.0 }
 0x472   :  { %v4087_v34 = vpop.f32.mrf.mxu0 }
 0x473   :  { %v4088_v57 = vadd.f32 %v4087_v34, %v4086_v27 }
 0x474   :  { %v4089_v22 = vpop.f32.mrf.mxu0 }
 0x475   :  { %v1323_v59 = vmax.f32 %v4088_v57, 0.0 }
 0x476   :  { %v4090_v23 = vpop.f32.mrf.mxu0 }
 0x477   :  { %v1344_v41 = vpack.c.bf16 %v1323_v59, %v1322_v35  ;;  %v4091_v37 = vadd.f32 %v4090_v23, %v4089_v22 }
 0x478   :  { %v4092_v25 = vpop.f32.mrf.mxu0 }
 0x479   :  { %4659 = vmatprep.mubr.bf16.mxu1 %v1344_v41  ;;  %v1324_v52 = vmax.f32 %v4091_v37, 0.0 }
 0x47a   :  { %v4093_v32 = vpop.f32.mrf.mxu0 }
 0x47b   :  { %v4094_v46 = vadd.f32 %v4093_v32, %v4092_v25 }
 0x47c   :  { %v4095_v48 = vpop.f32.mrf.mxu0 }
 0x47d   :  { %v1325_v30 = vmax.f32 %v4094_v46, 0.0 }
 0x47e   :  { %v4096_v31 = vpop.f32.mrf.mxu0 }
 0x47f   :  { %v1345_v55 = vpack.c.bf16 %v1325_v30, %v1324_v52  ;;  %v4097_v51 = vadd.f32 %v4096_v31, %v4095_v48 }
 0x480   :  { %v4098_v28 = vpop.f32.mrf.mxu0 }
 0x481   :  { %4660 = vmatmul.mubr.bf16.gmra.mxu1 %v1345_v55  ;;  %v1326_v60 = vmax.f32 %v4097_v51, 0.0  ;;  %v6131_v51 = vld [vmem:[#allocation13_spill] sm:$0xff] }
 0x482   :  { %v4099_v53 = vpop.f32.mrf.mxu0 }
 0x483   :  { %v4100_v26 = vadd.f32 %v4099_v53, %v4098_v28 }
 0x484   :  { %v4101_v38 = vpop.f32.mrf.mxu0 }
 0x485   :  { %v1327_v61 = vmax.f32 %v4100_v26, 0.0 }
 0x486   :  { %v4102_v21 = vpop.f32.mrf.mxu0 }
 0x487   :  { %v1346_v18 = vpack.c.bf16 %v1327_v61, %v1326_v60  ;;  %v4103_v40 = vadd.f32 %v4102_v21, %v4101_v38 }
 0x488   :  { %v4104_v50 = vpop.f32.mrf.mxu0 }
 0x489   :  { %4663 = vmatprep.mubr.bf16.mxu1 %v1346_v18  ;;  %v1328_v33 = vmax.f32 %v4103_v40, 0.0 }
 0x48a   :  { %v4105_v42 = vpop.f32.mrf.mxu0 }
 0x48b   :  { %v4106_v36 = vadd.f32 %v4105_v42, %v4104_v50 }
 0x48c   :  { %v4107_v54 = vpop.f32.mrf.mxu0 }
 0x48d   :  { %v1329_v27 = vmax.f32 %v4106_v36, 0.0 }
 0x48e   :  { %v4108_v20 = vpop.f32.mrf.mxu0 }
 0x48f   :  { %v1347_v34 = vpack.c.bf16 %v1329_v27, %v1328_v33  ;;  %v4109_v22 = vadd.f32 %v4108_v20, %v4107_v54 }
 0x490   :  { %v4110_v57 = vpop.f32.mrf.mxu0 }
 0x491   :  { %4664 = vmatmul.mubr.bf16.gmra.mxu1 %v1347_v34  ;;  %v1330_v41 = vmax.f32 %v4109_v22, 0.0 }
 0x492   :  { %v4111_v35 = vpop.f32.mrf.mxu0 }
 0x493   :  { %v4112_v59 = vadd.f32 %v4111_v35, %v4110_v57 }
 0x494   :  { %v4113_v23 = vpop.f32.mrf.mxu0 }
 0x495   :  { %v1331_v25 = vmax.f32 %v4112_v59, 0.0 }
 0x496   :  { %v4114_v37 = vpop.f32.mrf.mxu0 }
 0x497   :  { %v1348_v32 = vpack.c.bf16 %v1331_v25, %v1330_v41  ;;  %v4115_v48 = vadd.f32 %v4114_v37, %v4113_v23 }
 0x498   :  { %v4116_v46 = vpop.f32.mrf.mxu0 }
 0x499   :  { %4667 = vmatprep.mubr.bf16.mxu1 %v1348_v32  ;;  %v1332_v31 = vmax.f32 %v4115_v48, 0.0 }
 0x49a   :  { %v4117_v52 = vpop.f32.mrf.mxu0 }
 0x49b   :  { %v4118_v30 = vadd.f32 %v4117_v52, %v4116_v46 }
 0x49d   :  { %v1333_v55 = vmax.f32 %v4118_v30, 0.0 }
 0x49f   :  { %v1349_v28 = vpack.c.bf16 %v1333_v55, %v1332_v31 }
 0x4a1   :  { %4668 = vmatmul.mubr.bf16.gmra.mxu1 %v1349_v28 }
 0x4a2   :  { %1624 = vmatprep.mubr.bf16.mxu1 %v6131_v51 }
 0x4f1   :  { %v5401_v53 = vpop.f32.mrf.mxu1 }
 0x4f3   :  { %v5403_v26 = vpop.f32.mrf.mxu1 }
 0x4f5   :  { %v5405_v38 = vpop.f32.mrf.mxu1 }
 0x4f6   :  { %v1577_v60 = vpack.c.bf16 %v5405_v38, %v5401_v53 }
 0x4f7   :  { %v5409_v61 = vpop.f32.mrf.mxu1 }
 0x501   :  { %v4645_v21 = vpop.f32.mrf.mxu1 }
 0x503   :  { %v1465_v18 = vpop.f32.mrf.mxu1 }
 0x505   :  { %v4646_v50 = vpop.f32.mrf.mxu1 }
 0x506   :  { %v1579_v40 = vpack.c.bf16 %v4646_v50, %v4645_v21 }
 0x507   :  { %v1468_v42 = vpop.f32.mrf.mxu1 }
 0x511   :  { %v4649_v36 = vpop.f32.mrf.mxu1 }
 0x513   :  { %v1481_v54 = vpop.f32.mrf.mxu1 }
 0x515   :  { %v4650_v33 = vpop.f32.mrf.mxu1 }
 0x516   :  { %v1581_v43 = vpack.c.bf16 %v4650_v33, %v4649_v36 }
 0x517   :  { %v1484_v27 = vpop.f32.mrf.mxu1 }
 0x521   :  { %v4653_v20 = vpop.f32.mrf.mxu1 }
 0x523   :  { %v1497_v34 = vpop.f32.mrf.mxu1 }
 0x525   :  { %v4654_v57 = vpop.f32.mrf.mxu1 }
 0x526   :  { %v1583_v21 = vpack.c.bf16 %v4654_v57, %v4653_v20  ;;  %v1580_v20 = vpack.c.bf16 %v1484_v27, %v1481_v54  ;;  %v4839_v54 = vld [vmem:[%s6062_s2 + $0x20] ss:$8 sps:$4 sm:$0xff]   ;;  %v4844_v27 = vld [vmem:[%s6062_s2 + $0x14] ss:$8 sps:$4 sm:$0xff]   ;;  %v4842_v57 = vld [vmem:[%s6062_s2 + $0x10] ss:$8 sps:$4 sm:$0xff]  }
 0x527   :  { %v1500_v22 = vpop.f32.mrf.mxu1 }
 0x528   :  { %v1582_v47 = vpack.c.bf16 %v1500_v22, %v1497_v34  ;;  %v4827_v34 = vld [vmem:[%s6062_s2 + $0x60] ss:$8 sps:$4 sm:$0xff]   ;;  %v4847_v22 = vld [vmem:[%s6062_s2 + $0x4] ss:$8 sps:$4 sm:$0xff]  }
 0x531   :  { %v4657_v35 = vpop.f32.mrf.mxu1 }
 0x533   :  { %v1513_v59 = vpop.f32.mrf.mxu1 }
 0x535   :  { %v4658_v23 = vpop.f32.mrf.mxu1 }
 0x536   :  { %v1585_v36 = vpack.c.bf16 %v4658_v23, %v4657_v35  ;;  %v4845_v35 = vld [vmem:[%s6062_s2] ss:$8 sps:$4 sm:$0xff]  }
 0x537   :  { %v1516_v41 = vpop.f32.mrf.mxu1  ;;  %v6132_v23 = vld [vmem:[#allocation7_spill] sm:$0xff] }
 0x538   :  { %v1584_v33 = vpack.c.bf16 %v1516_v41, %v1513_v59  ;;  %v4866_v59 = vmov 0   ;;  %v6133_v41 = vld [vmem:[#allocation10_spill] sm:$0xff] }
 0x539   :  { %1897 = vmatprep.mubr.bf16.mxu0 %v4866_v59 }
 0x541   :  { %v4661_v25 = vpop.f32.mrf.mxu1 }
 0x543   :  { %v1529_v37 = vpop.f32.mrf.mxu1 }
 0x545   :  { %v4662_v32 = vpop.f32.mrf.mxu1 }
 0x547   :  { %v1532_v46 = vpop.f32.mrf.mxu1 }
 0x551   :  { %v4665_v48 = vpop.f32.mrf.mxu1 }
 0x553   :  { %v1545_v52 = vpop.f32.mrf.mxu1 }
 0x555   :  { %v4666_v30 = vpop.f32.mrf.mxu1 }
 0x556   :  { %v1589_v45 = vpack.c.bf16 %v4666_v30, %v4665_v48 }
 0x557   :  { %v1548_v31 = vpop.f32.mrf.mxu1 }
 0x558   :  { %v1588_v44 = vpack.c.bf16 %v1548_v31, %v1545_v52 }
 0x561   :  { %v4669_v55 = vpop.f32.mrf.mxu1 }
 0x563   :  { %v1561_v28 = vpop.f32.mrf.mxu1 }
 0x565   :  { %v4670_v53 = vpop.f32.mrf.mxu1 }
 0x566   :  { %v1591_v38 = vpack.c.bf16 %v4670_v53, %v4669_v55  ;;  %v4826_v55 = vld [vmem:[%s6062_s2 + $0x74] ss:$8 sps:$4 sm:$0xff]  }
 0x567   :  { %v1564_v50 = vpop.f32.mrf.mxu1  ;;  %1865 = vmatprep.subr.bf16.mxu0 %v4826_v55 }
 0x568   :  { %v1590_v51 = vpack.c.bf16 %v1564_v50, %v1561_v28  ;;  %4143 = vmatprep.subr.bf16.mxu1 %v1591_v38  ;;  %1866 = vmatpush1.bf16.msra.mxu0 %v4824_v39  ;;  %v4832_v39 = vld [vmem:[%s6062_s2 + $0x54] ss:$8 sps:$4 sm:$0xff]  }
 0x569   :  { %4144 = vmatpush3.bf16.msra.mxu1 %v1583_v21 }
 0x56a   :  { %4145 = vmatprep.subr.bf16.mxu1 %v1590_v51  ;;  %v1587_v51 = vpack.c.bf16 %v4662_v32, %v4661_v25  ;;  %v6134_v25 = vld [vmem:[#allocation9_spill] sm:$0xff]  ;;  %v6136_v32 = vld [vmem:[#allocation11_spill] sm:$0xff] }
 0x56d   :  { %4146 = vmatpush3.bf16.msra.mxu1 %v1582_v47  ;;  %v1586_v47 = vpack.c.bf16 %v1532_v46, %v1529_v37  ;;  %v6135_v37 = vld [vmem:[#allocation12_spill] sm:$0xff]  ;;  %v6137_v46 = vld [vmem:[#allocation13_spill] sm:$0xff] }
 0x56e   :  { %4147 = vmatprep.subr.bf16.mxu1 %v1589_v45  ;;  %v1578_v45 = vpack.c.bf16 %v1468_v42, %v1465_v18  ;;  %v4830_v18 = vld [vmem:[%s6062_s2 + $0x50] ss:$8 sps:$4 sm:$0xff]   ;;  %v4841_v42 = vld [vmem:[%s6062_s2 + $0x24] ss:$8 sps:$4 sm:$0xff]  }
 0x571   :  { %4148 = vmatpush3.bf16.msra.mxu1 %v1581_v43  ;;  %v1576_v43 = vpack.c.bf16 %v5409_v61, %v5403_v26  ;;  %v4838_v26 = vld [vmem:[%s6062_s2 + $0x34] ss:$8 sps:$4 sm:$0xff]   ;;  %v4836_v61 = vld [vmem:[%s6062_s2 + $0x30] ss:$8 sps:$4 sm:$0xff]  }
 0x572   :  { %4149 = vmatprep.subr.bf16.mxu1 %v1588_v44  ;;  %v4829_v44 = vld [vmem:[%s6062_s2 + $0x64] ss:$8 sps:$4 sm:$0xff]  }
 0x573   :  { %1867 = vmatprep.subr.bf16.mxu0 %v4829_v44 }
 0x574   :  { %1868 = vmatpush1.bf16.msra.mxu0 %v4827_v34 }
 0x575   :  { %4150 = vmatpush3.bf16.msra.mxu1 %v1580_v20  ;;  %1869 = vmatprep.subr.bf16.mxu0 %v4832_v39 }
 0x576   :  { %4151 = vmatprep.subr.bf16.mxu1 %v1587_v51 }
 0x578   :  { %1870 = vmatpush1.bf16.msra.mxu0 %v4830_v18 }
 0x579   :  { %4152 = vmatpush3.bf16.msra.mxu1 %v1579_v40  ;;  %v4835_v40 = vld [vmem:[%s6062_s2 + $0x44] ss:$8 sps:$4 sm:$0xff]  }
 0x57a   :  { %4153 = vmatprep.subr.bf16.mxu1 %v1586_v47  ;;  %1871 = vmatprep.subr.bf16.mxu0 %v4835_v40 }
 0x57d   :  { %4154 = vmatpush3.bf16.msra.mxu1 %v1578_v45 }
 0x57e   :  { %4155 = vmatprep.subr.bf16.mxu1 %v1585_v36 }
 0x581   :  { %4156 = vmatpush3.bf16.msra.mxu1 %v1577_v60  ;;  %v4833_v60 = vld [vmem:[%s6062_s2 + $0x40] ss:$8 sps:$4 sm:$0xff]  }
 0x582   :  { %4157 = vmatprep.subr.bf16.mxu1 %v1584_v33  ;;  %1872 = vmatpush1.bf16.msra.mxu0 %v4833_v60 }
 0x583   :  { %1873 = vmatprep.subr.bf16.mxu0 %v4838_v26 }
 0x585   :  { %4158 = vmatpush3.bf16.msra.mxu1 %v1576_v43 }
 0x586   :  { %1874 = vmatpush1.bf16.msra.mxu0 %v4836_v61 }
 0x587   :  { %1875 = vmatprep.subr.bf16.mxu0 %v4841_v42 }
 0x588   :  { %1625 = vmatmul.mubr.bf16.vlgmr.msra.gmra.mxu1 %v5169_v62 }
 0x589   :  { %1632 = vmatprep.mubr.bf16.mxu1 %v5177_v58 }
 0x58a   :  { %1876 = vmatpush1.bf16.msra.mxu0 %v4839_v54 }
 0x58b   :  { %1877 = vmatprep.subr.bf16.mxu0 %v4844_v27 }
 0x58e   :  { %1878 = vmatpush1.bf16.msra.mxu0 %v4842_v57 }
 0x58f   :  { %1879 = vmatprep.subr.bf16.mxu0 %v4847_v22 }
 0x590   :  { %1633 = vmatmul.mubr.bf16.gmra.mxu1 %v5192_v0 }
 0x591   :  { %1640 = vmatprep.mubr.bf16.mxu1 %v5200_v8 }
 0x592   :  { %1880 = vmatpush1.bf16.msra.mxu0 %v4845_v35 }
 0x598   :  { %1641 = vmatmul.mubr.bf16.gmra.mxu1 %v5212_v2 }
 0x599   :  { %1648 = vmatprep.mubr.bf16.mxu1 %v5220_v10 }
 0x5a0   :  { %1649 = vmatmul.mubr.bf16.gmra.mxu1 %v5232_v4 }
 0x5a1   :  { %1656 = vmatprep.mubr.bf16.mxu1 %v5155_v24 }
 0x5a8   :  { %1657 = vmatmul.mubr.bf16.gmra.mxu1 %v5173_v56 }
 0x5a9   :  { %1664 = vmatprep.mubr.bf16.mxu1 %v5181_v63 }
 0x5b0   :  { %1665 = vmatmul.mubr.bf16.gmra.mxu1 %v5196_v1 }
 0x5b1   :  { %1672 = vmatprep.mubr.bf16.mxu1 %v5204_v9 }
 0x5b8   :  { %1673 = vmatmul.mubr.bf16.gmra.mxu1 %v5216_v3 }
 0x5b9   :  { %1680 = vmatprep.mubr.bf16.mxu1 %v5224_v11 }
 0x5c0   :  { %1681 = vmatmul.mubr.bf16.gmra.mxu1 %v5236_v5 }
 0x5c1   :  { %1688 = vmatprep.mubr.bf16.mxu1 %v5240_v12 }
 0x5c8   :  { %1689 = vmatmul.mubr.bf16.gmra.mxu1 %v5247_v13 }
 0x5c9   :  { %1696 = vmatprep.mubr.bf16.mxu1 %v5251_v6 }
 0x5d0   :  { %1697 = vmatmul.mubr.bf16.gmra.mxu1 %v5257_v7 }
 0x5d1   :  { %1704 = vmatprep.mubr.bf16.mxu1 %v5261_v14 }
 0x5d8   :  { %1705 = vmatmul.mubr.bf16.gmra.mxu1 %v5267_v15 }
 0x5d9   :  { %1712 = vmatprep.mubr.bf16.mxu1 %v5271_v16 }
 0x5e0   :  { %1713 = vmatmul.mubr.bf16.gmra.mxu1 %v5277_v17 }
 0x5e1   :  { %1720 = vmatprep.mubr.bf16.mxu1 %v5281_v19 }
 0x5e8   :  { %1721 = vmatmul.mubr.bf16.gmra.mxu1 %v6124_v49 }
 0x5e9   :  { %1728 = vmatprep.mubr.bf16.mxu1 %v6125_v29 }
 0x5f0   :  { %1729 = vmatmul.mubr.bf16.gmra.mxu1 %v6132_v23 }
 0x5f1   :  { %1736 = vmatprep.mubr.bf16.mxu1 %v6133_v41 }
 0x5f8   :  { %1737 = vmatmul.mubr.bf16.gmra.mxu1 %v6134_v25 }
 0x5f9   :  { %1744 = vmatprep.mubr.bf16.mxu1 %v6135_v37 }
 0x600   :  { %1745 = vmatmul.mubr.bf16.gmra.mxu1 %v6136_v32 }
 0x601   :  { %2122 = vmatprep.mubr.bf16.mxu1 %v6137_v46 }
 0x648   :  { %v4159_v48 = vpop.f32.mrf.mxu1 }
 0x64a   :  { %v4160_v52 = vpop.f32.mrf.mxu1 }
 0x64b   :  { %v4161_v30 = vadd.f32 %v4160_v52, %v4159_v48 }
 0x64c   :  { %v4162_v31 = vpop.f32.mrf.mxu1 }
 0x64d   :  { %3249 = vst [vmem:[%s6064_s4] sm:$0xff] %v4161_v30 }
 0x64e   :  { %v4163_v28 = vpop.f32.mrf.mxu1 }
 0x64f   :  { %v4164_v53 = vadd.f32 %v4163_v28, %v4162_v31 }
 0x650   :  { %v4165_v38 = vpop.f32.mrf.mxu1 }
 0x651   :  { %v1753_v21 = vpack.c.bf16 %v4164_v53, %v4161_v30  ;;  %3250 = vst [vmem:[%s6064_s4 + $0x8] sm:$0xff] %v4164_v53 }
 0x652   :  { %v4166_v50 = vpop.f32.mrf.mxu1 }
 0x653   :  { %3756 = vst [vmem:[%s6067_s7] sm:$0xff] %v1753_v21   ;;  %v4167_v55 = vadd.f32 %v4166_v50, %v4165_v38  ;;  %1898 = vmatmul.mubr.bf16.vlgmr.msra.gmra.mxu0 %v1753_v21 }
 0x654   :  { %v4168_v20 = vpop.f32.mrf.mxu1  ;;  %1907 = vmatprep.mubr.bf16.mxu0 %v4866_v59 }
 0x655   :  { %3251 = vst [vmem:[%s6064_s4 + $0x10] sm:$0xff] %v4167_v55 }
 0x656   :  { %v4169_v51 = vpop.f32.mrf.mxu1 }
 0x657   :  { %v4170_v47 = vadd.f32 %v4169_v51, %v4168_v20 }
 0x658   :  { %v4171_v45 = vpop.f32.mrf.mxu1 }
 0x659   :  { %v1754_v36 = vpack.c.bf16 %v4170_v47, %v4167_v55  ;;  %3252 = vst [vmem:[%s6064_s4 + $0x18] sm:$0xff] %v4170_v47 }
 0x65a   :  { %v4172_v33 = vpop.f32.mrf.mxu1 }
 0x65b   :  { %3832 = vst [vmem:[%s6067_s7 + $0x8] sm:$0xff] %v1754_v36   ;;  %v4173_v34 = vadd.f32 %v4172_v33, %v4171_v45  ;;  %1908 = vmatmul.mubr.bf16.gmra.mxu0 %v1754_v36 }
 0x65c   :  { %v4174_v44 = vpop.f32.mrf.mxu1  ;;  %1917 = vmatprep.mubr.bf16.mxu0 %v4866_v59 }
 0x65d   :  { %3253 = vst [vmem:[%s6064_s4 + $0x20] sm:$0xff] %v4173_v34 }
 0x65e   :  { %v4175_v39 = vpop.f32.mrf.mxu1 }
 0x65f   :  { %v4176_v43 = vadd.f32 %v4175_v39, %v4174_v44 }
 0x660   :  { %v4177_v18 = vpop.f32.mrf.mxu1 }
 0x661   :  { %v1755_v40 = vpack.c.bf16 %v4176_v43, %v4173_v34  ;;  %3254 = vst [vmem:[%s6064_s4 + $0x28] sm:$0xff] %v4176_v43 }
 0x662   :  { %v4178_v60 = vpop.f32.mrf.mxu1 }
 0x663   :  { %3833 = vst [vmem:[%s6067_s7 + $0x10] sm:$0xff] %v1755_v40   ;;  %v4179_v26 = vadd.f32 %v4178_v60, %v4177_v18  ;;  %1918 = vmatmul.mubr.bf16.gmra.mxu0 %v1755_v40 }
 0x664   :  { %v4180_v61 = vpop.f32.mrf.mxu1  ;;  %1927 = vmatprep.mubr.bf16.mxu0 %v4866_v59 }
 0x665   :  { %3255 = vst [vmem:[%s6064_s4 + $0x30] sm:$0xff] %v4179_v26 }
 0x666   :  { %v4181_v42 = vpop.f32.mrf.mxu1 }
 0x667   :  { %v4182_v54 = vadd.f32 %v4181_v42, %v4180_v61 }
 0x668   :  { %v4183_v27 = vpop.f32.mrf.mxu1 }
 0x669   :  { %v1756_v57 = vpack.c.bf16 %v4182_v54, %v4179_v26  ;;  %3256 = vst [vmem:[%s6064_s4 + $0x38] sm:$0xff] %v4182_v54 }
 0x66a   :  { %v4184_v22 = vpop.f32.mrf.mxu1 }
 0x66b   :  { %3834 = vst [vmem:[%s6067_s7 + $0x18] sm:$0xff] %v1756_v57   ;;  %v4185_v35 = vadd.f32 %v4184_v22, %v4183_v27  ;;  %1928 = vmatmul.mubr.bf16.gmra.mxu0 %v1756_v57 }
 0x66c   :  { %v4186_v48 = vpop.f32.mrf.mxu1  ;;  %1937 = vmatprep.mubr.bf16.mxu0 %v4866_v59 }
 0x66d   :  { %3257 = vst [vmem:[%s6064_s4 + $0x40] sm:$0xff] %v4185_v35 }
 0x66e   :  { %v4187_v52 = vpop.f32.mrf.mxu1 }
 0x66f   :  { %v4188_v30 = vadd.f32 %v4187_v52, %v4186_v48 }
 0x670   :  { %v4189_v31 = vpop.f32.mrf.mxu1 }
 0x671   :  { %v1757_v28 = vpack.c.bf16 %v4188_v30, %v4185_v35  ;;  %3258 = vst [vmem:[%s6064_s4 + $0x48] sm:$0xff] %v4188_v30 }
 0x672   :  { %v4190_v53 = vpop.f32.mrf.mxu1 }
 0x673   :  { %3835 = vst [vmem:[%s6067_s7 + $0x20] sm:$0xff] %v1757_v28   ;;  %v4191_v38 = vadd.f32 %v4190_v53, %v4189_v31  ;;  %1938 = vmatmul.mubr.bf16.gmra.mxu0 %v1757_v28 }
 0x674   :  { %v4192_v21 = vpop.f32.mrf.mxu1  ;;  %1947 = vmatprep.mubr.bf16.mxu0 %v4866_v59 }
 0x675   :  { %3259 = vst [vmem:[%s6064_s4 + $0x50] sm:$0xff] %v4191_v38 }
 0x676   :  { %v4193_v50 = vpop.f32.mrf.mxu1 }
 0x677   :  { %v4194_v55 = vadd.f32 %v4193_v50, %v4192_v21 }
 0x678   :  { %v4195_v20 = vpop.f32.mrf.mxu1 }
 0x679   :  { %v1758_v51 = vpack.c.bf16 %v4194_v55, %v4191_v38  ;;  %3260 = vst [vmem:[%s6064_s4 + $0x58] sm:$0xff] %v4194_v55 }
 0x67a   :  { %v4196_v47 = vpop.f32.mrf.mxu1 }
 0x67b   :  { %3836 = vst [vmem:[%s6067_s7 + $0x28] sm:$0xff] %v1758_v51   ;;  %v4197_v45 = vadd.f32 %v4196_v47, %v4195_v20  ;;  %1948 = vmatmul.mubr.bf16.gmra.mxu0 %v1758_v51 }
 0x67c   :  { %v4198_v36 = vpop.f32.mrf.mxu1  ;;  %1957 = vmatprep.mubr.bf16.mxu0 %v4866_v59 }
 0x67d   :  { %3261 = vst [vmem:[%s6064_s4 + $0x60] sm:$0xff] %v4197_v45 }
 0x67e   :  { %v4199_v33 = vpop.f32.mrf.mxu1 }
 0x67f   :  { %v4200_v34 = vadd.f32 %v4199_v33, %v4198_v36 }
 0x680   :  { %v4201_v44 = vpop.f32.mrf.mxu1 }
 0x681   :  { %v1759_v39 = vpack.c.bf16 %v4200_v34, %v4197_v45  ;;  %3262 = vst [vmem:[%s6064_s4 + $0x68] sm:$0xff] %v4200_v34 }
 0x682   :  { %v4202_v43 = vpop.f32.mrf.mxu1 }
 0x683   :  { %3837 = vst [vmem:[%s6067_s7 + $0x30] sm:$0xff] %v1759_v39   ;;  %v4203_v18 = vadd.f32 %v4202_v43, %v4201_v44  ;;  %1958 = vmatmul.mubr.bf16.gmra.mxu0 %v1759_v39 }
 0x684   :  { %v4204_v40 = vpop.f32.mrf.mxu1  ;;  %1967 = vmatprep.mubr.bf16.mxu0 %v4866_v59 }
 0x685   :  { %3263 = vst [vmem:[%s6064_s4 + $0x70] sm:$0xff] %v4203_v18 }
 0x686   :  { %v4205_v60 = vpop.f32.mrf.mxu1 }
 0x687   :  { %v4206_v26 = vadd.f32 %v4205_v60, %v4204_v40 }
 0x688   :  { %v4207_v61 = vpop.f32.mrf.mxu1 }
 0x689   :  { %v1760_v42 = vpack.c.bf16 %v4206_v26, %v4203_v18  ;;  %3264 = vst [vmem:[%s6064_s4 + $0x78] sm:$0xff] %v4206_v26 }
 0x68a   :  { %v4208_v54 = vpop.f32.mrf.mxu1 }
 0x68b   :  { %3838 = vst [vmem:[%s6067_s7 + $0x38] sm:$0xff] %v1760_v42   ;;  %v4209_v27 = vadd.f32 %v4208_v54, %v4207_v61  ;;  %1968 = vmatmul.mubr.bf16.gmra.mxu0 %v1760_v42 }
 0x68c   :  { %v4210_v57 = vpop.f32.mrf.mxu1  ;;  %1977 = vmatprep.mubr.bf16.mxu0 %v4866_v59 }
 0x68d   :  { %3265 = vst [vmem:[%s6064_s4 + $0x80] sm:$0xff] %v4209_v27 }
 0x68e   :  { %v4211_v22 = vpop.f32.mrf.mxu1 }
 0x68f   :  { %v4212_v35 = vadd.f32 %v4211_v22, %v4210_v57 }
 0x690   :  { %v4213_v48 = vpop.f32.mrf.mxu1 }
 0x691   :  { %v1761_v52 = vpack.c.bf16 %v4212_v35, %v4209_v27  ;;  %3266 = vst [vmem:[%s6064_s4 + $0x88] sm:$0xff] %v4212_v35 }
 0x692   :  { %v4214_v30 = vpop.f32.mrf.mxu1 }
 0x693   :  { %3839 = vst [vmem:[%s6067_s7 + $0x40] sm:$0xff] %v1761_v52   ;;  %v4215_v31 = vadd.f32 %v4214_v30, %v4213_v48  ;;  %1978 = vmatmul.mubr.bf16.gmra.mxu0 %v1761_v52 }
 0x694   :  { %v4216_v28 = vpop.f32.mrf.mxu1  ;;  %1987 = vmatprep.mubr.bf16.mxu0 %v4866_v59 }
 0x695   :  { %3267 = vst [vmem:[%s6064_s4 + $0x90] sm:$0xff] %v4215_v31 }
 0x696   :  { %v4217_v53 = vpop.f32.mrf.mxu1 }
 0x697   :  { %v4218_v38 = vadd.f32 %v4217_v53, %v4216_v28 }
 0x698   :  { %v4219_v21 = vpop.f32.mrf.mxu1 }
 0x699   :  { %v1762_v50 = vpack.c.bf16 %v4218_v38, %v4215_v31  ;;  %3268 = vst [vmem:[%s6064_s4 + $0x98] sm:$0xff] %v4218_v38 }
 0x69a   :  { %v4220_v55 = vpop.f32.mrf.mxu1 }
 0x69b   :  { %3840 = vst [vmem:[%s6067_s7 + $0x48] sm:$0xff] %v1762_v50   ;;  %v4221_v20 = vadd.f32 %v4220_v55, %v4219_v21  ;;  %1988 = vmatmul.mubr.bf16.gmra.mxu0 %v1762_v50 }
 0x69c   :  { %v4222_v51 = vpop.f32.mrf.mxu1  ;;  %1997 = vmatprep.mubr.bf16.mxu0 %v4866_v59 }
 0x69d   :  { %3269 = vst [vmem:[%s6064_s4 + $0xa0] sm:$0xff] %v4221_v20 }
 0x69e   :  { %v4223_v47 = vpop.f32.mrf.mxu1 }
 0x69f   :  { %v4224_v45 = vadd.f32 %v4223_v47, %v4222_v51 }
 0x6a0   :  { %v4225_v36 = vpop.f32.mrf.mxu1 }
 0x6a1   :  { %v1763_v33 = vpack.c.bf16 %v4224_v45, %v4221_v20  ;;  %3270 = vst [vmem:[%s6064_s4 + $0xa8] sm:$0xff] %v4224_v45 }
 0x6a2   :  { %v4226_v34 = vpop.f32.mrf.mxu1 }
 0x6a3   :  { %3841 = vst [vmem:[%s6067_s7 + $0x50] sm:$0xff] %v1763_v33   ;;  %v4227_v44 = vadd.f32 %v4226_v34, %v4225_v36  ;;  %1998 = vmatmul.mubr.bf16.gmra.mxu0 %v1763_v33 }
 0x6a4   :  { %v4228_v39 = vpop.f32.mrf.mxu1  ;;  %2007 = vmatprep.mubr.bf16.mxu0 %v4866_v59 }
 0x6a5   :  { %3271 = vst [vmem:[%s6064_s4 + $0xb0] sm:$0xff] %v4227_v44 }
 0x6a6   :  { %v4229_v43 = vpop.f32.mrf.mxu1 }
 0x6a7   :  { %v4230_v18 = vadd.f32 %v4229_v43, %v4228_v39 }
 0x6a8   :  { %v4231_v40 = vpop.f32.mrf.mxu1 }
 0x6a9   :  { %v1764_v60 = vpack.c.bf16 %v4230_v18, %v4227_v44  ;;  %3272 = vst [vmem:[%s6064_s4 + $0xb8] sm:$0xff] %v4230_v18 }
 0x6aa   :  { %v4232_v26 = vpop.f32.mrf.mxu1 }
 0x6ab   :  { %3842 = vst [vmem:[%s6067_s7 + $0x58] sm:$0xff] %v1764_v60   ;;  %v4233_v61 = vadd.f32 %v4232_v26, %v4231_v40  ;;  %2008 = vmatmul.mubr.bf16.gmra.mxu0 %v1764_v60 }
 0x6ac   :  { %v4234_v42 = vpop.f32.mrf.mxu1  ;;  %2017 = vmatprep.mubr.bf16.mxu0 %v4866_v59 }
 0x6ad   :  { %3273 = vst [vmem:[%s6064_s4 + $0xc0] sm:$0xff] %v4233_v61 }
 0x6ae   :  { %v4235_v54 = vpop.f32.mrf.mxu1 }
 0x6af   :  { %v4236_v27 = vadd.f32 %v4235_v54, %v4234_v42 }
 0x6b0   :  { %v4237_v57 = vpop.f32.mrf.mxu1 }
 0x6b1   :  { %v1765_v22 = vpack.c.bf16 %v4236_v27, %v4233_v61  ;;  %3274 = vst [vmem:[%s6064_s4 + $0xc8] sm:$0xff] %v4236_v27 }
 0x6b2   :  { %v4238_v35 = vpop.f32.mrf.mxu1 }
 0x6b3   :  { %3843 = vst [vmem:[%s6067_s7 + $0x60] sm:$0xff] %v1765_v22   ;;  %v4239_v48 = vadd.f32 %v4238_v35, %v4237_v57  ;;  %2018 = vmatmul.mubr.bf16.gmra.mxu0 %v1765_v22 }
 0x6b4   :  { %v4240_v52 = vpop.f32.mrf.mxu1  ;;  %2027 = vmatprep.mubr.bf16.mxu0 %v4866_v59 }
 0x6b5   :  { %3275 = vst [vmem:[%s6064_s4 + $0xd0] sm:$0xff] %v4239_v48 }
 0x6b6   :  { %v4241_v30 = vpop.f32.mrf.mxu1 }
 0x6b7   :  { %v4242_v31 = vadd.f32 %v4241_v30, %v4240_v52 }
 0x6b8   :  { %v4243_v28 = vpop.f32.mrf.mxu1 }
 0x6b9   :  { %v1766_v53 = vpack.c.bf16 %v4242_v31, %v4239_v48  ;;  %3276 = vst [vmem:[%s6064_s4 + $0xd8] sm:$0xff] %v4242_v31 }
 0x6ba   :  { %v4244_v38 = vpop.f32.mrf.mxu1 }
 0x6bb   :  { %3844 = vst [vmem:[%s6067_s7 + $0x68] sm:$0xff] %v1766_v53   ;;  %v4245_v21 = vadd.f32 %v4244_v38, %v4243_v28  ;;  %2028 = vmatmul.mubr.bf16.gmra.mxu0 %v1766_v53 }
 0x6bc   :  { %v4246_v50 = vpop.f32.mrf.mxu1  ;;  %2037 = vmatprep.mubr.bf16.mxu0 %v4866_v59 }
 0x6bd   :  { %3277 = vst [vmem:[%s6064_s4 + $0xe0] sm:$0xff] %v4245_v21 }
 0x6be   :  { %v4247_v55 = vpop.f32.mrf.mxu1 }
 0x6bf   :  { %v4248_v20 = vadd.f32 %v4247_v55, %v4246_v50 }
 0x6c0   :  { %v4249_v51 = vpop.f32.mrf.mxu1 }
 0x6c1   :  { %v1767_v47 = vpack.c.bf16 %v4248_v20, %v4245_v21  ;;  %3278 = vst [vmem:[%s6064_s4 + $0xe8] sm:$0xff] %v4248_v20 }
 0x6c2   :  { %v4250_v45 = vpop.f32.mrf.mxu1 }
 0x6c3   :  { %3845 = vst [vmem:[%s6067_s7 + $0x70] sm:$0xff] %v1767_v47   ;;  %v4251_v36 = vadd.f32 %v4250_v45, %v4249_v51  ;;  %2038 = vmatmul.mubr.bf16.gmra.mxu0 %v1767_v47 }
 0x6c4   :  { %v4252_v33 = vpop.f32.mrf.mxu1  ;;  %2047 = vmatprep.mubr.bf16.mxu0 %v4866_v59 }
 0x6c5   :  { %3279 = vst [vmem:[%s6064_s4 + $0xf0] sm:$0xff] %v4251_v36 }
 0x6c6   :  { %v4253_v34 = vpop.f32.mrf.mxu1 }
 0x6c7   :  { %v4254_v44 = vadd.f32 %v4253_v34, %v4252_v33 }
 0x6c9   :  { %v1768_v39 = vpack.c.bf16 %v4254_v44, %v4251_v36  ;;  %3280 = vst [vmem:[%s6064_s4 + $0xf8] sm:$0xff] %v4254_v44 }
 0x6cb   :  { %3846 = vst [vmem:[%s6067_s7 + $0x78] sm:$0xff] %v1768_v39   ;;  %2048 = vmatmul.mubr.bf16.gmra.mxu0 %v1768_v39 }
 0x713   :  { %v5653_v43 = vpop.f32.mrf.mxu0 }
 0x715   :  { %v5655_v18 = vpop.f32.mrf.mxu0 }
 0x717   :  { %v5657_v59 = vpop.f32.mrf.mxu0 }
 0x719   :  { %v5661_v60 = vpop.f32.mrf.mxu0 }
 0x71b   :  { %v5663_v26 = vpop.f32.mrf.mxu0 }
 0x71d   :  { %v5665_v61 = vpop.f32.mrf.mxu0 }
 0x71f   :  { %v5667_v42 = vpop.f32.mrf.mxu0 }
 0x721   :  { %v5671_v27 = vpop.f32.mrf.mxu0 }
 0x723   :  { %v1919_v57 = vpop.f32.mrf.mxu0 }
 0x725   :  { %v1921_v22 = vpop.f32.mrf.mxu0 }
 0x727   :  { %v1923_v35 = vpop.f32.mrf.mxu0 }
 0x729   :  { %v1925_v48 = vpop.f32.mrf.mxu0 }
 0x72b   :  { %v1929_v52 = vpop.f32.mrf.mxu0 }
 0x72d   :  { %v1931_v30 = vpop.f32.mrf.mxu0 }
 0x72f   :  { %v1933_v31 = vpop.f32.mrf.mxu0 }
 0x731   :  { %v1935_v28 = vpop.f32.mrf.mxu0 }
 0x733   :  { %v1939_v53 = vpop.f32.mrf.mxu0 }
 0x735   :  { %v1941_v38 = vpop.f32.mrf.mxu0 }
 0x737   :  { %v1943_v21 = vpop.f32.mrf.mxu0 }
 0x739   :  { %v1945_v50 = vpop.f32.mrf.mxu0 }
 0x73b   :  { %v1949_v55 = vpop.f32.mrf.mxu0 }
 0x73d   :  { %v1951_v20 = vpop.f32.mrf.mxu0 }
 0x73f   :  { %v1953_v51 = vpop.f32.mrf.mxu0 }
 0x741   :  { %v1955_v47 = vpop.f32.mrf.mxu0 }
 0x742   :  { %v2069_v49 = vpack.c.bf16 %v1955_v47, %v1951_v20 }
 0x743   :  { %v1959_v45 = vpop.f32.mrf.mxu0 }
 0x745   :  { %v1961_v36 = vpop.f32.mrf.mxu0 }
 0x747   :  { %v1963_v33 = vpop.f32.mrf.mxu0 }
 0x748   :  { %v2070_v23 = vpack.c.bf16 %v1963_v33, %v1959_v45  ;;  %v2065_v45 = vpack.c.bf16 %v1935_v28, %v1931_v30  ;;  %v2059_v28 = vpack.c.bf16 %v5661_v60, %v5655_v18 }
 0x749   :  { %v1965_v34 = vpop.f32.mrf.mxu0 }
 0x74a   :  { %v2071_v25 = vpack.c.bf16 %v1965_v34, %v1961_v36  ;;  %v2067_v36 = vpack.c.bf16 %v1945_v50, %v1941_v38  ;;  %v2062_v38 = vpack.c.bf16 %v1923_v35, %v1919_v57  ;;  %v6139_v57 = vpack.c.bf16 %v5657_v59, %v5653_v43 }
 0x74b   :  { %v1969_v44 = vpop.f32.mrf.mxu0 }
 0x74d   :  { %v1971_v39 = vpop.f32.mrf.mxu0 }
 0x74f   :  { %v1973_v40 = vpop.f32.mrf.mxu0 }
 0x750   :  { %v2072_v32 = vpack.c.bf16 %v1973_v40, %v1969_v44  ;;  %v2068_v40 = vpack.c.bf16 %v1953_v51, %v1949_v55  ;;  %v2063_v55 = vpack.c.bf16 %v1925_v48, %v1921_v22 }
 0x751   :  { %v1975_v54 = vpop.f32.mrf.mxu0 }
 0x752   :  { %v2073_v46 = vpack.c.bf16 %v1975_v54, %v1971_v39 }
 0x753   :  { %v5673_v37 = vpop.f32.mrf.mxu0 }
 0x754   :  { %2090 = vmatprep.subr.bf16.mxu1 %v2073_v46 }
 0x755   :  { %v5675_v41 = vpop.f32.mrf.mxu0  ;;  %2091 = vmatpush1.bf16.msra.mxu1 %v2072_v32 }
 0x756   :  { %2092 = vmatprep.subr.bf16.mxu1 %v2071_v25  ;;  %v2066_v25 = vpack.c.bf16 %v1943_v21, %v1939_v53  ;;  %v2061_v53 = vpack.c.bf16 %v5671_v27, %v5665_v61 }
 0x757   :  { %v5677_v29 = vpop.f32.mrf.mxu0 }
 0x759   :  { %v5681_v17 = vpop.f32.mrf.mxu0  ;;  %2093 = vmatpush1.bf16.msra.mxu1 %v2070_v23 }
 0x75a   :  { %2094 = vmatprep.subr.bf16.mxu1 %v2069_v49  ;;  %v2064_v49 = vpack.c.bf16 %v1933_v31, %v1929_v52  ;;  %v6138_v52 = vpack.c.bf16 %v5667_v42, %v5663_v26 }
 0x75b   :  { %v5683_v54 = vpop.f32.mrf.mxu0 }
 0x75d   :  { %v5685_v46 = vpop.f32.mrf.mxu0  ;;  %2095 = vmatpush1.bf16.msra.mxu1 %v2068_v40 }
 0x75e   :  { %2096 = vmatprep.subr.bf16.mxu1 %v2067_v36 }
 0x75f   :  { %v5687_v32 = vpop.f32.mrf.mxu0 }
 0x761   :  { %v5691_v47 = vpop.f32.mrf.mxu0  ;;  %2097 = vmatpush1.bf16.msra.mxu1 %v2066_v25 }
 0x762   :  { %2098 = vmatprep.subr.bf16.mxu1 %v2065_v45 }
 0x763   :  { %v1999_v23 = vpop.f32.mrf.mxu0 }
 0x765   :  { %v2001_v51 = vpop.f32.mrf.mxu0  ;;  %2099 = vmatpush1.bf16.msra.mxu1 %v2064_v49 }
 0x766   :  { %2100 = vmatprep.subr.bf16.mxu1 %v2063_v55 }
 0x767   :  { %v2003_v50 = vpop.f32.mrf.mxu0 }
 0x769   :  { %v2005_v21 = vpop.f32.mrf.mxu0  ;;  %2101 = vmatpush1.bf16.msra.mxu1 %v2062_v38 }
 0x76a   :  { %2102 = vmatprep.subr.bf16.mxu1 %v2061_v53  ;;  %v2079_v16 = vpack.c.bf16 %v2005_v21, %v2001_v51  ;;  %v6145_v51 = vld [vmem:[#allocation16_spill] sm:$0xff]  ;;  %v6147_v21 = vld [vmem:[#allocation7_spill] sm:$0xff] }
 0x76b   :  { %v2009_v30 = vpop.f32.mrf.mxu0 }
 0x76d   :  { %v2011_v33 = vpop.f32.mrf.mxu0  ;;  %2103 = vmatpush1.bf16.msra.mxu1 %v6138_v52 }
 0x76e   :  { %2104 = vmatprep.subr.bf16.mxu1 %v2059_v28 }
 0x76f   :  { %v2013_v22 = vpop.f32.mrf.mxu0 }
 0x770   :  { %v2080_v20 = vpack.c.bf16 %v2013_v22, %v2009_v30  ;;  %v6148_v30 = vld [vmem:[#allocation10_spill] sm:$0xff]  ;;  %v6150_v22 = vld [vmem:[#allocation12_spill] sm:$0xff] }
 0x771   :  { %v2015_v48 = vpop.f32.mrf.mxu0  ;;  %2105 = vmatpush1.bf16.msra.mxu1 %v6139_v57 }
 0x772   :  { %v2081_v19 = vpack.c.bf16 %v2015_v48, %v2011_v33  ;;  %v6149_v33 = vld [vmem:[#allocation9_spill] sm:$0xff]  ;;  %v6151_v48 = vld [vmem:[#allocation11_spill] sm:$0xff] }
 0x773   :  { %v2019_v61 = vpop.f32.mrf.mxu0 }
 0x775   :  { %v2021_v27 = vpop.f32.mrf.mxu0 }
 0x777   :  { %v2023_v35 = vpop.f32.mrf.mxu0 }
 0x778   :  { %v2082_v57 = vpack.c.bf16 %v2023_v35, %v2019_v61  ;;  %v4848_v61 = vld [vmem:[%s6061_s1 + $0xf8] sm:$0xff]  }
 0x779   :  { %v2025_v31 = vpop.f32.mrf.mxu0  ;;  %4671 = vmatprep.subr.bf16.mxu0 %v4848_v61 }
 0x77a   :  { %v2083_v52 = vpack.c.bf16 %v2025_v31, %v2021_v27  ;;  %4672 = vmatpush3.bf16.msra.mxu0 %v4848_v61 }
 0x77b   :  { %v2029_v34 = vpop.f32.mrf.mxu0 }
 0x77d   :  { %v2031_v44 = vpop.f32.mrf.mxu0 }
 0x77f   :  { %v2033_v39 = vpop.f32.mrf.mxu0 }
 0x780   :  { %v2084_v28 = vpack.c.bf16 %v2033_v39, %v2029_v34  ;;  %v2075_v34 = vpack.c.bf16 %v5681_v17, %v5675_v41  ;;  %v4850_v17 = vld [vmem:[%s6061_s1 + $0xe8] sm:$0xff]   ;;  %v6141_v41 = vpack.c.bf16 %v5677_v29, %v5673_v37  ;;  %v4852_v29 = vld [vmem:[%s6061_s1 + $0xd8] sm:$0xff]   ;;  %v4853_v37 = vld [vmem:[%s6061_s1 + $0xd0] sm:$0xff]  }
 0x781   :  { %v2035_v18 = vpop.f32.mrf.mxu0 }
 0x782   :  { %v2085_v53 = vpack.c.bf16 %v2035_v18, %v2031_v44 }
 0x783   :  { %v2039_v60 = vpop.f32.mrf.mxu0 }
 0x785   :  { %v2041_v40 = vpop.f32.mrf.mxu0 }
 0x787   :  { %v2043_v36 = vpop.f32.mrf.mxu0 }
 0x788   :  { %v2086_v59 = vpack.c.bf16 %v2043_v36, %v2039_v60 }
 0x789   :  { %v2045_v26 = vpop.f32.mrf.mxu0 }
 0x78a   :  { %v2087_v43 = vpack.c.bf16 %v2045_v26, %v2041_v40  ;;  %v2078_v40 = vpack.c.bf16 %v2003_v50, %v1999_v23  ;;  %v2077_v26 = vpack.c.bf16 %v5691_v47, %v5685_v46  ;;  %v4854_v46 = vld [vmem:[%s6061_s1 + $0xc8] sm:$0xff]   ;;  %v6144_v23 = vld [vmem:[#allocation6_spill] sm:$0xff]  ;;  %v6146_v50 = vld [vmem:[#allocation8_spill] sm:$0xff] }
 0x78b   :  { %v2049_v42 = vpop.f32.mrf.mxu0  ;;  %v6143_v47 = vld [vmem:[#allocation15_spill] sm:$0xff] }
 0x78d   :  { %v2051_v25 = vpop.f32.mrf.mxu0 }
 0x78f   :  { %v2053_v45 = vpop.f32.mrf.mxu0 }
 0x790   :  { %v2088_v38 = vpack.c.bf16 %v2053_v45, %v2049_v42 }
 0x791   :  { %v2055_v49 = vpop.f32.mrf.mxu0 }
 0x792   :  { %v2089_v55 = vpack.c.bf16 %v2055_v49, %v2051_v25 }
 0x794   :  { %2106 = vmatprep.subr.bf16.mxu1 %v2089_v55 }
 0x795   :  { %2107 = vmatpush2.bf16.msra.mxu1 %v2088_v38 }
 0x796   :  { %2108 = vmatprep.subr.bf16.mxu1 %v2087_v43 }
 0x799   :  { %2109 = vmatpush2.bf16.msra.mxu1 %v2086_v59 }
 0x79a   :  { %2110 = vmatprep.subr.bf16.mxu1 %v2085_v53 }
 0x79d   :  { %2111 = vmatpush2.bf16.msra.mxu1 %v2084_v28 }
 0x79e   :  { %2112 = vmatprep.subr.bf16.mxu1 %v2083_v52 }
 0x7a1   :  { %2113 = vmatpush2.bf16.msra.mxu1 %v2082_v57 }
 0x7a2   :  { %2114 = vmatprep.subr.bf16.mxu1 %v2081_v19  ;;  %v4849_v19 = vld [vmem:[%s6061_s1 + $0xf0] sm:$0xff]  }
 0x7a3   :  { %4673 = vmatprep.subr.bf16.mxu0 %v4849_v19 }
 0x7a4   :  { %4674 = vmatpush3.bf16.msra.mxu0 %v4849_v19 }
 0x7a5   :  { %2115 = vmatpush2.bf16.msra.mxu1 %v2080_v20  ;;  %4675 = vmatprep.subr.bf16.mxu0 %v4850_v17  ;;  %v6142_v20 = vld [vmem:[#allocation14_spill] sm:$0xff] }
 0x7a6   :  { %2116 = vmatprep.subr.bf16.mxu1 %v2079_v16  ;;  %v6140_v16 = vpack.c.bf16 %v5687_v32, %v5683_v54  ;;  %v4851_v54 = vld [vmem:[%s6061_s1 + $0xe0] sm:$0xff]  }
 0x7a7   :  { %v4855_v32 = vld [vmem:[%s6061_s1 + $0xc0] sm:$0xff]  }
 0x7a8   :  { %4676 = vmatpush3.bf16.msra.mxu0 %v4850_v17 }
 0x7a9   :  { %2117 = vmatpush2.bf16.msra.mxu1 %v2078_v40  ;;  %4677 = vmatprep.subr.bf16.mxu0 %v4851_v54 }
 0x7aa   :  { %2118 = vmatprep.subr.bf16.mxu1 %v2077_v26 }
 0x7ac   :  { %4678 = vmatpush3.bf16.msra.mxu0 %v4851_v54 }
 0x7ad   :  { %2119 = vmatpush2.bf16.msra.mxu1 %v6140_v16  ;;  %4679 = vmatprep.subr.bf16.mxu0 %v4852_v29 }
 0x7ae   :  { %2120 = vmatprep.subr.bf16.mxu1 %v2075_v34 }
 0x7b0   :  { %4680 = vmatpush3.bf16.msra.mxu0 %v4852_v29 }
 0x7b1   :  { %2121 = vmatpush2.bf16.msra.mxu1 %v6141_v41  ;;  %4681 = vmatprep.subr.bf16.mxu0 %v4853_v37 }
 0x7b4   :  { %2123 = vmatmul.mubr.bf16.vlgmr.msra.gmra.mxu1 %v5169_v62  ;;  %4682 = vmatpush3.bf16.msra.mxu0 %v4853_v37 }
 0x7b5   :  { %2132 = vmatprep.mubr.bf16.mxu1 %v5177_v58  ;;  %4683 = vmatprep.subr.bf16.mxu0 %v4854_v46 }
 0x7b8   :  { %4684 = vmatpush3.bf16.msra.mxu0 %v4854_v46 }
 0x7b9   :  { %4685 = vmatprep.subr.bf16.mxu0 %v4855_v32 }
 0x7bc   :  { %2133 = vmatmul.mubr.bf16.gmra.mxu1 %v5192_v0  ;;  %4686 = vmatpush3.bf16.msra.mxu0 %v4855_v32 }
 0x7bd   :  { %2142 = vmatprep.mubr.bf16.mxu1 %v5200_v8 }
 0x7c4   :  { %2143 = vmatmul.mubr.bf16.gmra.mxu1 %v5212_v2 }
 0x7c5   :  { %2152 = vmatprep.mubr.bf16.mxu1 %v5220_v10 }
 0x7cc   :  { %2153 = vmatmul.mubr.bf16.gmra.mxu1 %v5232_v4 }
 0x7cd   :  { %2162 = vmatprep.mubr.bf16.mxu1 %v5155_v24 }
 0x7d4   :  { %2163 = vmatmul.mubr.bf16.gmra.mxu1 %v5173_v56 }
 0x7d5   :  { %2172 = vmatprep.mubr.bf16.mxu1 %v5181_v63 }
 0x7dc   :  { %2173 = vmatmul.mubr.bf16.gmra.mxu1 %v5196_v1 }
 0x7dd   :  { %2182 = vmatprep.mubr.bf16.mxu1 %v5204_v9 }
 0x7e4   :  { %2183 = vmatmul.mubr.bf16.gmra.mxu1 %v5216_v3 }
 0x7e5   :  { %2192 = vmatprep.mubr.bf16.mxu1 %v5224_v11 }
 0x7ec   :  { %2193 = vmatmul.mubr.bf16.gmra.mxu1 %v5236_v5 }
 0x7ed   :  { %2202 = vmatprep.mubr.bf16.mxu1 %v5240_v12 }
 0x7f4   :  { %2203 = vmatmul.mubr.bf16.gmra.mxu1 %v5247_v13 }
 0x7f5   :  { %2212 = vmatprep.mubr.bf16.mxu1 %v5251_v6 }
 0x7fc   :  { %2213 = vmatmul.mubr.bf16.gmra.mxu1 %v5257_v7 }
 0x7fd   :  { %2222 = vmatprep.mubr.bf16.mxu1 %v5261_v14 }
 0x804   :  { %2223 = vmatmul.mubr.bf16.gmra.mxu1 %v5267_v15 }
 0x805   :  { %2232 = vmatprep.mubr.bf16.mxu1 %v6142_v20 }
 0x80c   :  { %2233 = vmatmul.mubr.bf16.gmra.mxu1 %v6143_v47 }
 0x80d   :  { %2242 = vmatprep.mubr.bf16.mxu1 %v6144_v23 }
 0x814   :  { %2243 = vmatmul.mubr.bf16.gmra.mxu1 %v6145_v51 }
 0x815   :  { %2252 = vmatprep.mubr.bf16.mxu1 %v6146_v50 }
 0x81c   :  { %2253 = vmatmul.mubr.bf16.gmra.mxu1 %v6147_v21 }
 0x81d   :  { %2262 = vmatprep.mubr.bf16.mxu1 %v6148_v30 }
 0x824   :  { %2263 = vmatmul.mubr.bf16.gmra.mxu1 %v6149_v33 }
 0x825   :  { %2272 = vmatprep.mubr.bf16.mxu1 %v6150_v22 }
 0x82c   :  { %2273 = vmatmul.mubr.bf16.gmra.mxu1 %v6151_v48 }
 0x874   :  { %v2124_v27 = vpop.f32.mrf.mxu1 }
 0x875   :  { %v2283_v35 = vmax.f32 %v2124_v27, 0.0 }
 0x876   :  { %v2126_v31 = vpop.f32.mrf.mxu1 }
 0x877   :  { %3281 = vst [vmem:[%s6065_s5] sm:$0xff] %v2283_v35  ;;  %v2284_v60 = vmax.f32 %v2126_v31, 0.0 }
 0x878   :  { %v2128_v44 = vpop.f32.mrf.mxu1 }
 0x879   :  { %v2285_v39 = vmax.f32 %v2128_v44, 0.0 }
 0x87a   :  { %v2130_v18 = vpop.f32.mrf.mxu1 }
 0x87b   :  { %3282 = vst [vmem:[%s6065_s5 + $0x8] sm:$0xff] %v2285_v39  ;;  %v2286_v36 = vmax.f32 %v2130_v18, 0.0 }
 0x87c   :  { %v2134_v42 = vpop.f32.mrf.mxu1 }
 0x87d   :  { %v2347_v25 = vpack.c.bf16 %v2286_v36, %v2284_v60  ;;  %v2287_v45 = vmax.f32 %v2134_v42, 0.0 }
 0x87e   :  { %v2136_v49 = vpop.f32.mrf.mxu1 }
 0x87f   :  { %3283 = vst [vmem:[%s6065_s5 + $0x10] sm:$0xff] %v2287_v45  ;;  %4687 = vmatprep.mubr.bf16.mxu0 %v2347_v25  ;;  %v2288_v59 = vmax.f32 %v2136_v49, 0.0 }
 0x880   :  { %v2138_v55 = vpop.f32.mrf.mxu1 }
 0x881   :  { %v2289_v38 = vmax.f32 %v2138_v55, 0.0 }
 0x882   :  { %v2140_v43 = vpop.f32.mrf.mxu1 }
 0x883   :  { %3284 = vst [vmem:[%s6065_s5 + $0x18] sm:$0xff] %v2289_v38  ;;  %v2290_v53 = vmax.f32 %v2140_v43, 0.0 }
 0x884   :  { %v2144_v28 = vpop.f32.mrf.mxu1 }
 0x885   :  { %v2348_v52 = vpack.c.bf16 %v2290_v53, %v2288_v59  ;;  %v2291_v57 = vmax.f32 %v2144_v28, 0.0 }
 0x886   :  { %v2146_v40 = vpop.f32.mrf.mxu1 }
 0x887   :  { %3285 = vst [vmem:[%s6065_s5 + $0x20] sm:$0xff] %v2291_v57  ;;  %4688 = vmatmul.mubr.bf16.vlgmr.msra.gmra.mxu0 %v2348_v52  ;;  %v2292_v19 = vmax.f32 %v2146_v40, 0.0 }
 0x888   :  { %v2148_v26 = vpop.f32.mrf.mxu1 }
 0x889   :  { %v2293_v34 = vmax.f32 %v2148_v26, 0.0 }
 0x88a   :  { %v2150_v61 = vpop.f32.mrf.mxu1 }
 0x88b   :  { %3286 = vst [vmem:[%s6065_s5 + $0x28] sm:$0xff] %v2293_v34  ;;  %v2294_v16 = vmax.f32 %v2150_v61, 0.0 }
 0x88c   :  { %v2154_v17 = vpop.f32.mrf.mxu1 }
 0x88d   :  { %v2349_v41 = vpack.c.bf16 %v2294_v16, %v2292_v19  ;;  %v2295_v54 = vmax.f32 %v2154_v17, 0.0 }
 0x88e   :  { %v2156_v29 = vpop.f32.mrf.mxu1 }
 0x88f   :  { %3287 = vst [vmem:[%s6065_s5 + $0x30] sm:$0xff] %v2295_v54  ;;  %4691 = vmatprep.mubr.bf16.mxu0 %v2349_v41  ;;  %v2296_v27 = vmax.f32 %v2156_v29, 0.0 }
 0x890   :  { %v2158_v37 = vpop.f32.mrf.mxu1 }
 0x891   :  { %v2297_v46 = vmax.f32 %v2158_v37, 0.0 }
 0x892   :  { %v2160_v32 = vpop.f32.mrf.mxu1 }
 0x893   :  { %3288 = vst [vmem:[%s6065_s5 + $0x38] sm:$0xff] %v2297_v46  ;;  %v2298_v35 = vmax.f32 %v2160_v32, 0.0 }
 0x894   :  { %v2164_v31 = vpop.f32.mrf.mxu1 }
 0x895   :  { %v2350_v44 = vpack.c.bf16 %v2298_v35, %v2296_v27  ;;  %v2299_v39 = vmax.f32 %v2164_v31, 0.0 }
 0x896   :  { %v2166_v18 = vpop.f32.mrf.mxu1 }
 0x897   :  { %3289 = vst [vmem:[%s6065_s5 + $0x40] sm:$0xff] %v2299_v39  ;;  %4692 = vmatmul.mubr.bf16.gmra.mxu0 %v2350_v44  ;;  %v2300_v25 = vmax.f32 %v2166_v18, 0.0 }
 0x898   :  { %v2168_v60 = vpop.f32.mrf.mxu1 }
 0x899   :  { %v2301_v36 = vmax.f32 %v2168_v60, 0.0 }
 0x89a   :  { %v2170_v42 = vpop.f32.mrf.mxu1 }
 0x89b   :  { %3290 = vst [vmem:[%s6065_s5 + $0x48] sm:$0xff] %v2301_v36  ;;  %v2302_v45 = vmax.f32 %v2170_v42, 0.0 }
 0x89c   :  { %v2174_v49 = vpop.f32.mrf.mxu1 }
 0x89d   :  { %v2351_v55 = vpack.c.bf16 %v2302_v45, %v2300_v25  ;;  %v2303_v38 = vmax.f32 %v2174_v49, 0.0 }
 0x89e   :  { %v2176_v43 = vpop.f32.mrf.mxu1 }
 0x89f   :  { %3291 = vst [vmem:[%s6065_s5 + $0x50] sm:$0xff] %v2303_v38  ;;  %4695 = vmatprep.mubr.bf16.mxu0 %v2351_v55  ;;  %v2304_v52 = vmax.f32 %v2176_v43, 0.0 }
 0x8a0   :  { %v2178_v59 = vpop.f32.mrf.mxu1 }
 0x8a1   :  { %v2305_v53 = vmax.f32 %v2178_v59, 0.0 }
 0x8a2   :  { %v2180_v28 = vpop.f32.mrf.mxu1 }
 0x8a3   :  { %3292 = vst [vmem:[%s6065_s5 + $0x58] sm:$0xff] %v2305_v53  ;;  %v2306_v57 = vmax.f32 %v2180_v28, 0.0 }
 0x8a4   :  { %v2184_v40 = vpop.f32.mrf.mxu1 }
 0x8a5   :  { %v2352_v26 = vpack.c.bf16 %v2306_v57, %v2304_v52  ;;  %v2307_v34 = vmax.f32 %v2184_v40, 0.0 }
 0x8a6   :  { %v2186_v61 = vpop.f32.mrf.mxu1 }
 0x8a7   :  { %3293 = vst [vmem:[%s6065_s5 + $0x60] sm:$0xff] %v2307_v34  ;;  %4696 = vmatmul.mubr.bf16.gmra.mxu0 %v2352_v26  ;;  %v2308_v41 = vmax.f32 %v2186_v61, 0.0 }
 0x8a8   :  { %v2188_v19 = vpop.f32.mrf.mxu1 }
 0x8a9   :  { %v2309_v16 = vmax.f32 %v2188_v19, 0.0 }
 0x8aa   :  { %v2190_v17 = vpop.f32.mrf.mxu1 }
 0x8ab   :  { %3294 = vst [vmem:[%s6065_s5 + $0x68] sm:$0xff] %v2309_v16  ;;  %v2310_v54 = vmax.f32 %v2190_v17, 0.0 }
 0x8ac   :  { %v2194_v29 = vpop.f32.mrf.mxu1 }
 0x8ad   :  { %v2353_v37 = vpack.c.bf16 %v2310_v54, %v2308_v41  ;;  %v2311_v46 = vmax.f32 %v2194_v29, 0.0 }
 0x8ae   :  { %v2196_v32 = vpop.f32.mrf.mxu1 }
 0x8af   :  { %3295 = vst [vmem:[%s6065_s5 + $0x70] sm:$0xff] %v2311_v46  ;;  %4699 = vmatprep.mubr.bf16.mxu0 %v2353_v37  ;;  %v2312_v44 = vmax.f32 %v2196_v32, 0.0 }
 0x8b0   :  { %v2198_v27 = vpop.f32.mrf.mxu1 }
 0x8b1   :  { %v2313_v35 = vmax.f32 %v2198_v27, 0.0 }
 0x8b2   :  { %v2200_v31 = vpop.f32.mrf.mxu1 }
 0x8b3   :  { %3296 = vst [vmem:[%s6065_s5 + $0x78] sm:$0xff] %v2313_v35  ;;  %v2314_v39 = vmax.f32 %v2200_v31, 0.0 }
 0x8b4   :  { %v2204_v18 = vpop.f32.mrf.mxu1 }
 0x8b5   :  { %v2354_v60 = vpack.c.bf16 %v2314_v39, %v2312_v44  ;;  %v2315_v36 = vmax.f32 %v2204_v18, 0.0 }
 0x8b6   :  { %v2206_v42 = vpop.f32.mrf.mxu1 }
 0x8b7   :  { %3297 = vst [vmem:[%s6065_s5 + $0x80] sm:$0xff] %v2315_v36  ;;  %4700 = vmatmul.mubr.bf16.gmra.mxu0 %v2354_v60  ;;  %v2316_v55 = vmax.f32 %v2206_v42, 0.0 }
 0x8b8   :  { %v2208_v25 = vpop.f32.mrf.mxu1 }
 0x8b9   :  { %v2317_v45 = vmax.f32 %v2208_v25, 0.0 }
 0x8ba   :  { %v2210_v49 = vpop.f32.mrf.mxu1 }
 0x8bb   :  { %3298 = vst [vmem:[%s6065_s5 + $0x88] sm:$0xff] %v2317_v45  ;;  %v2318_v38 = vmax.f32 %v2210_v49, 0.0 }
 0x8bc   :  { %v2214_v43 = vpop.f32.mrf.mxu1 }
 0x8bd   :  { %v2355_v59 = vpack.c.bf16 %v2318_v38, %v2316_v55  ;;  %v2319_v53 = vmax.f32 %v2214_v43, 0.0 }
 0x8be   :  { %v2216_v28 = vpop.f32.mrf.mxu1 }
 0x8bf   :  { %3299 = vst [vmem:[%s6065_s5 + $0x90] sm:$0xff] %v2319_v53  ;;  %4703 = vmatprep.mubr.bf16.mxu0 %v2355_v59  ;;  %v2320_v26 = vmax.f32 %v2216_v28, 0.0 }
 0x8c0   :  { %v2218_v52 = vpop.f32.mrf.mxu1 }
 0x8c1   :  { %v2321_v57 = vmax.f32 %v2218_v52, 0.0 }
 0x8c2   :  { %v2220_v40 = vpop.f32.mrf.mxu1 }
 0x8c3   :  { %3300 = vst [vmem:[%s6065_s5 + $0x98] sm:$0xff] %v2321_v57  ;;  %v2322_v34 = vmax.f32 %v2220_v40, 0.0 }
 0x8c4   :  { %v2224_v61 = vpop.f32.mrf.mxu1 }
 0x8c5   :  { %v2356_v19 = vpack.c.bf16 %v2322_v34, %v2320_v26  ;;  %v2323_v16 = vmax.f32 %v2224_v61, 0.0 }
 0x8c6   :  { %v2226_v17 = vpop.f32.mrf.mxu1 }
 0x8c7   :  { %3301 = vst [vmem:[%s6065_s5 + $0xa0] sm:$0xff] %v2323_v16  ;;  %4704 = vmatmul.mubr.bf16.gmra.mxu0 %v2356_v19  ;;  %v2324_v37 = vmax.f32 %v2226_v17, 0.0 }
 0x8c8   :  { %v2228_v41 = vpop.f32.mrf.mxu1 }
 0x8c9   :  { %v2325_v54 = vmax.f32 %v2228_v41, 0.0 }
 0x8ca   :  { %v2230_v29 = vpop.f32.mrf.mxu1 }
 0x8cb   :  { %3302 = vst [vmem:[%s6065_s5 + $0xa8] sm:$0xff] %v2325_v54  ;;  %v2326_v46 = vmax.f32 %v2230_v29, 0.0 }
 0x8cc   :  { %v2234_v32 = vpop.f32.mrf.mxu1 }
 0x8cd   :  { %v2357_v27 = vpack.c.bf16 %v2326_v46, %v2324_v37  ;;  %v2327_v35 = vmax.f32 %v2234_v32, 0.0 }
 0x8ce   :  { %v2236_v31 = vpop.f32.mrf.mxu1 }
 0x8cf   :  { %3303 = vst [vmem:[%s6065_s5 + $0xb0] sm:$0xff] %v2327_v35  ;;  %4707 = vmatprep.mubr.bf16.mxu0 %v2357_v27  ;;  %v2328_v60 = vmax.f32 %v2236_v31, 0.0 }
 0x8d0   :  { %v2238_v44 = vpop.f32.mrf.mxu1 }
 0x8d1   :  { %v2329_v39 = vmax.f32 %v2238_v44, 0.0 }
 0x8d2   :  { %v2240_v18 = vpop.f32.mrf.mxu1 }
 0x8d3   :  { %3304 = vst [vmem:[%s6065_s5 + $0xb8] sm:$0xff] %v2329_v39  ;;  %v2330_v36 = vmax.f32 %v2240_v18, 0.0 }
 0x8d4   :  { %v2244_v42 = vpop.f32.mrf.mxu1 }
 0x8d5   :  { %v2358_v25 = vpack.c.bf16 %v2330_v36, %v2328_v60  ;;  %v2331_v45 = vmax.f32 %v2244_v42, 0.0 }
 0x8d6   :  { %v2246_v49 = vpop.f32.mrf.mxu1 }
 0x8d7   :  { %3305 = vst [vmem:[%s6065_s5 + $0xc0] sm:$0xff] %v2331_v45  ;;  %4708 = vmatmul.mubr.bf16.gmra.mxu0 %v2358_v25  ;;  %v2332_v59 = vmax.f32 %v2246_v49, 0.0 }
 0x8d8   :  { %v2248_v55 = vpop.f32.mrf.mxu1 }
 0x8d9   :  { %v2333_v38 = vmax.f32 %v2248_v55, 0.0  ;;  %v6152_v55 = vld [vmem:[#allocation13_spill] sm:$0xff] }
 0x8da   :  { %v2250_v43 = vpop.f32.mrf.mxu1 }
 0x8db   :  { %3306 = vst [vmem:[%s6065_s5 + $0xc8] sm:$0xff] %v2333_v38  ;;  %v2334_v53 = vmax.f32 %v2250_v43, 0.0 }
 0x8dc   :  { %v2254_v28 = vpop.f32.mrf.mxu1 }
 0x8dd   :  { %v2359_v52 = vpack.c.bf16 %v2334_v53, %v2332_v59  ;;  %v2335_v57 = vmax.f32 %v2254_v28, 0.0 }
 0x8de   :  { %v2256_v40 = vpop.f32.mrf.mxu1 }
 0x8df   :  { %3307 = vst [vmem:[%s6065_s5 + $0xd0] sm:$0xff] %v2335_v57  ;;  %4711 = vmatprep.mubr.bf16.mxu0 %v2359_v52  ;;  %v2336_v19 = vmax.f32 %v2256_v40, 0.0 }
 0x8e0   :  { %v2258_v26 = vpop.f32.mrf.mxu1 }
 0x8e1   :  { %v2337_v34 = vmax.f32 %v2258_v26, 0.0 }
 0x8e2   :  { %v2260_v61 = vpop.f32.mrf.mxu1 }
 0x8e3   :  { %3308 = vst [vmem:[%s6065_s5 + $0xd8] sm:$0xff] %v2337_v34  ;;  %v2338_v16 = vmax.f32 %v2260_v61, 0.0 }
 0x8e4   :  { %v2264_v17 = vpop.f32.mrf.mxu1 }
 0x8e5   :  { %v2360_v41 = vpack.c.bf16 %v2338_v16, %v2336_v19  ;;  %v2339_v54 = vmax.f32 %v2264_v17, 0.0 }
 0x8e6   :  { %v2266_v29 = vpop.f32.mrf.mxu1 }
 0x8e7   :  { %3309 = vst [vmem:[%s6065_s5 + $0xe0] sm:$0xff] %v2339_v54  ;;  %4712 = vmatmul.mubr.bf16.gmra.mxu0 %v2360_v41  ;;  %v2340_v27 = vmax.f32 %v2266_v29, 0.0 }
 0x8e8   :  { %v2268_v37 = vpop.f32.mrf.mxu1 }
 0x8e9   :  { %v2341_v46 = vmax.f32 %v2268_v37, 0.0 }
 0x8ea   :  { %v2270_v32 = vpop.f32.mrf.mxu1 }
 0x8eb   :  { %3310 = vst [vmem:[%s6065_s5 + $0xe8] sm:$0xff] %v2341_v46  ;;  %v2342_v35 = vmax.f32 %v2270_v32, 0.0 }
 0x8ec   :  { %v2274_v31 = vpop.f32.mrf.mxu1 }
 0x8ed   :  { %v2361_v44 = vpack.c.bf16 %v2342_v35, %v2340_v27  ;;  %v2343_v39 = vmax.f32 %v2274_v31, 0.0 }
 0x8ee   :  { %v2276_v18 = vpop.f32.mrf.mxu1 }
 0x8ef   :  { %3311 = vst [vmem:[%s6065_s5 + $0xf0] sm:$0xff] %v2343_v39  ;;  %4715 = vmatprep.mubr.bf16.mxu0 %v2361_v44  ;;  %v2344_v25 = vmax.f32 %v2276_v18, 0.0 }
 0x8f0   :  { %v2278_v60 = vpop.f32.mrf.mxu1 }
 0x8f1   :  { %v2345_v36 = vmax.f32 %v2278_v60, 0.0 }
 0x8f2   :  { %v2280_v42 = vpop.f32.mrf.mxu1 }
 0x8f3   :  { %3312 = vst [vmem:[%s6065_s5 + $0xf8] sm:$0xff] %v2345_v36  ;;  %v2346_v45 = vmax.f32 %v2280_v42, 0.0 }
 0x8f5   :  { %v2362_v49 = vpack.c.bf16 %v2346_v45, %v2344_v25 }
 0x8f7   :  { %4716 = vmatmul.mubr.bf16.gmra.mxu0 %v2362_v49 }
 0x8f8   :  { %2637 = vmatprep.mubr.bf16.mxu0 %v6152_v55 }
 0x947   :  { %v5865_v38 = vpop.f32.mrf.mxu0 }
 0x949   :  { %v5867_v43 = vpop.f32.mrf.mxu0 }
 0x94b   :  { %v4690_v59 = vpop.f32.mrf.mxu0 }
 0x94c   :  { %v2590_v53 = vpack.c.bf16 %v4690_v59, %v5865_v38 }
 0x94d   :  { %v5870_v28 = vpop.f32.mrf.mxu0 }
 0x957   :  { %v4693_v57 = vpop.f32.mrf.mxu0 }
 0x959   :  { %v2478_v40 = vpop.f32.mrf.mxu0 }
 0x95b   :  { %v4694_v26 = vpop.f32.mrf.mxu0 }
 0x95c   :  { %v2592_v34 = vpack.c.bf16 %v4694_v26, %v4693_v57 }
 0x95d   :  { %v2481_v61 = vpop.f32.mrf.mxu0 }
 0x95e   :  { %v2591_v19 = vpack.c.bf16 %v2481_v61, %v2478_v40 }
 0x967   :  { %v4697_v16 = vpop.f32.mrf.mxu0 }
 0x969   :  { %v2494_v17 = vpop.f32.mrf.mxu0 }
 0x96b   :  { %v4698_v41 = vpop.f32.mrf.mxu0 }
 0x96c   :  { %v2594_v22 = vpack.c.bf16 %v4698_v41, %v4697_v16  ;;  %v6158_v16 = vld [vmem:[#allocation12_spill] sm:$0xff] }
 0x96d   :  { %v2497_v54 = vpop.f32.mrf.mxu0 }
 0x96e   :  { %v2593_v30 = vpack.c.bf16 %v2497_v54, %v2494_v17  ;;  %v6159_v17 = vld [vmem:[#allocation11_spill] sm:$0xff] }
 0x977   :  { %v4701_v29 = vpop.f32.mrf.mxu0 }
 0x979   :  { %v2510_v37 = vpop.f32.mrf.mxu0 }
 0x97b   :  { %v4702_v46 = vpop.f32.mrf.mxu0 }
 0x97c   :  { %v2596_v26 = vpack.c.bf16 %v4702_v46, %v4701_v29 }
 0x97d   :  { %v2513_v32 = vpop.f32.mrf.mxu0 }
 0x97e   :  { %v2595_v55 = vpack.c.bf16 %v2513_v32, %v2510_v37 }
 0x987   :  { %v4705_v27 = vpop.f32.mrf.mxu0 }
 0x989   :  { %v2526_v35 = vpop.f32.mrf.mxu0 }
 0x98b   :  { %v4706_v31 = vpop.f32.mrf.mxu0 }
 0x98c   :  { %v2598_v29 = vpack.c.bf16 %v4706_v31, %v4705_v27 }
 0x98d   :  { %v2529_v44 = vpop.f32.mrf.mxu0 }
 0x98e   :  { %v2597_v46 = vpack.c.bf16 %v2529_v44, %v2526_v35 }
 0x997   :  { %v4709_v39 = vpop.f32.mrf.mxu0 }
 0x999   :  { %v2542_v18 = vpop.f32.mrf.mxu0 }
 0x99b   :  { %v4710_v60 = vpop.f32.mrf.mxu0 }
 0x99c   :  { %v2600_v21 = vpack.c.bf16 %v4710_v60, %v4709_v39 }
 0x99d   :  { %v2545_v36 = vpop.f32.mrf.mxu0 }
 0x99e   :  { %v2599_v50 = vpack.c.bf16 %v2545_v36, %v2542_v18 }
 0x9a7   :  { %v4713_v42 = vpop.f32.mrf.mxu0 }
 0x9a9   :  { %v2558_v25 = vpop.f32.mrf.mxu0 }
 0x9ab   :  { %v4714_v45 = vpop.f32.mrf.mxu0 }
 0x9ac   :  { %v2602_v48 = vpack.c.bf16 %v4714_v45, %v4713_v42 }
 0x9ad   :  { %v2561_v49 = vpop.f32.mrf.mxu0 }
 0x9ae   :  { %v2601_v33 = vpack.c.bf16 %v2561_v49, %v2558_v25 }
 0x9b7   :  { %v4717_v38 = vpop.f32.mrf.mxu0 }
 0x9b9   :  { %v2574_v59 = vpop.f32.mrf.mxu0 }
 0x9bb   :  { %v4718_v57 = vpop.f32.mrf.mxu0 }
 0x9bc   :  { %v2604_v40 = vpack.c.bf16 %v4718_v57, %v4717_v38 }
 0x9bd   :  { %v2577_v61 = vpop.f32.mrf.mxu0 }
 0x9be   :  { %v2603_v52 = vpack.c.bf16 %v2577_v61, %v2574_v59  ;;  %4279 = vmatprep.subr.bf16.mxu0 %v2604_v40 }
 0x9bf   :  { %4280 = vmatpush3.bf16.msra.mxu0 %v2596_v26 }
 0x9c0   :  { %4281 = vmatprep.subr.bf16.mxu0 %v2603_v52  ;;  %v6155_v52 = vld [vmem:[#allocation7_spill] sm:$0xff] }
 0x9c3   :  { %4282 = vmatpush3.bf16.msra.mxu0 %v2595_v55  ;;  %v4856_v55 = vld [vmem:[%s6061_s1 + $0x138] sm:$0xff]  }
 0x9c4   :  { %4283 = vmatprep.subr.bf16.mxu0 %v2602_v48  ;;  %4719 = vmatprep.subr.bf16.mxu1 %v4856_v55  ;;  %v4861_v48 = vld [vmem:[%s6061_s1 + $0x110] sm:$0xff]  }
 0x9c5   :  { %4720 = vmatpush3.bf16.msra.mxu1 %v4856_v55 }
 0x9c7   :  { %4284 = vmatpush3.bf16.msra.mxu0 %v2594_v22  ;;  %v4857_v22 = vld [vmem:[%s6061_s1 + $0x130] sm:$0xff]  }
 0x9c8   :  { %4285 = vmatprep.subr.bf16.mxu0 %v2601_v33  ;;  %4721 = vmatprep.subr.bf16.mxu1 %v4857_v22  ;;  %v4860_v33 = vld [vmem:[%s6061_s1 + $0x118] sm:$0xff]  }
 0x9c9   :  { %4722 = vmatpush3.bf16.msra.mxu1 %v4857_v22 }
 0x9cb   :  { %4286 = vmatpush3.bf16.msra.mxu0 %v2593_v30  ;;  %v4859_v30 = vld [vmem:[%s6061_s1 + $0x120] sm:$0xff]  }
 0x9cc   :  { %4287 = vmatprep.subr.bf16.mxu0 %v2600_v21  ;;  %v6153_v21 = vpack.c.bf16 %v5870_v28, %v5867_v43  ;;  %v4862_v43 = vld [vmem:[%s6061_s1 + $0x108] sm:$0xff]   ;;  %v6154_v28 = vld [vmem:[#allocation8_spill] sm:$0xff] }
 0x9cf   :  { %4288 = vmatpush3.bf16.msra.mxu0 %v2592_v34  ;;  %v6156_v34 = vld [vmem:[#allocation10_spill] sm:$0xff] }
 0x9d0   :  { %4289 = vmatprep.subr.bf16.mxu0 %v2599_v50  ;;  %v4858_v50 = vld [vmem:[%s6061_s1 + $0x128] sm:$0xff]  }
 0x9d1   :  { %4723 = vmatprep.subr.bf16.mxu1 %v4858_v50 }
 0x9d2   :  { %4724 = vmatpush3.bf16.msra.mxu1 %v4858_v50 }
 0x9d3   :  { %4290 = vmatpush3.bf16.msra.mxu0 %v2591_v19  ;;  %4725 = vmatprep.subr.bf16.mxu1 %v4859_v30  ;;  %v6157_v19 = vld [vmem:[#allocation9_spill] sm:$0xff] }
 0x9d4   :  { %4291 = vmatprep.subr.bf16.mxu0 %v2598_v29 }
 0x9d6   :  { %4726 = vmatpush3.bf16.msra.mxu1 %v4859_v30 }
 0x9d7   :  { %4292 = vmatpush3.bf16.msra.mxu0 %v2590_v53  ;;  %4727 = vmatprep.subr.bf16.mxu1 %v4860_v33  ;;  %v4863_v53 = vld [vmem:[%s6061_s1 + $0x100] sm:$0xff]  }
 0x9d8   :  { %4293 = vmatprep.subr.bf16.mxu0 %v2597_v46 }
 0x9da   :  { %4728 = vmatpush3.bf16.msra.mxu1 %v4860_v33 }
 0x9db   :  { %4294 = vmatpush3.bf16.msra.mxu0 %v6153_v21  ;;  %4729 = vmatprep.subr.bf16.mxu1 %v4861_v48 }
 0x9de   :  { %2638 = vmatmul.mubr.bf16.vlgmr.msra.gmra.mxu0 %v5169_v62  ;;  %4730 = vmatpush3.bf16.msra.mxu1 %v4861_v48 }
 0x9df   :  { %2645 = vmatprep.mubr.bf16.mxu0 %v5177_v58  ;;  %4731 = vmatprep.subr.bf16.mxu1 %v4862_v43 }
 0x9e2   :  { %4732 = vmatpush3.bf16.msra.mxu1 %v4862_v43 }
 0x9e3   :  { %4733 = vmatprep.subr.bf16.mxu1 %v4863_v53 }
 0x9e6   :  { %2646 = vmatmul.mubr.bf16.gmra.mxu0 %v5192_v0  ;;  %4734 = vmatpush3.bf16.msra.mxu1 %v4863_v53 }
 0x9e7   :  { %2653 = vmatprep.mubr.bf16.mxu0 %v5200_v8 }
 0x9ee   :  { %2654 = vmatmul.mubr.bf16.gmra.mxu0 %v5212_v2 }
 0x9ef   :  { %2661 = vmatprep.mubr.bf16.mxu0 %v5220_v10 }
 0x9f6   :  { %2662 = vmatmul.mubr.bf16.gmra.mxu0 %v5232_v4 }
 0x9f7   :  { %2669 = vmatprep.mubr.bf16.mxu0 %v5155_v24 }
 0x9fe   :  { %2670 = vmatmul.mubr.bf16.gmra.mxu0 %v5173_v56 }
 0x9ff   :  { %2677 = vmatprep.mubr.bf16.mxu0 %v5181_v63 }
 0xa06   :  { %2678 = vmatmul.mubr.bf16.gmra.mxu0 %v5196_v1 }
 0xa07   :  { %2685 = vmatprep.mubr.bf16.mxu0 %v5204_v9 }
 0xa0e   :  { %2686 = vmatmul.mubr.bf16.gmra.mxu0 %v5216_v3 }
 0xa0f   :  { %2693 = vmatprep.mubr.bf16.mxu0 %v5224_v11 }
 0xa16   :  { %2694 = vmatmul.mubr.bf16.gmra.mxu0 %v5236_v5 }
 0xa17   :  { %2701 = vmatprep.mubr.bf16.mxu0 %v5240_v12 }
 0xa1e   :  { %2702 = vmatmul.mubr.bf16.gmra.mxu0 %v5247_v13 }
 0xa1f   :  { %2709 = vmatprep.mubr.bf16.mxu0 %v5251_v6 }
 0xa26   :  { %2710 = vmatmul.mubr.bf16.gmra.mxu0 %v5257_v7 }
 0xa27   :  { %2717 = vmatprep.mubr.bf16.mxu0 %v5261_v14 }
 0xa2e   :  { %2718 = vmatmul.mubr.bf16.gmra.mxu0 %v5267_v15 }
 0xa2f   :  { %2725 = vmatprep.mubr.bf16.mxu0 %v6142_v20 }
 0xa36   :  { %2726 = vmatmul.mubr.bf16.gmra.mxu0 %v6143_v47 }
 0xa37   :  { %2733 = vmatprep.mubr.bf16.mxu0 %v6144_v23 }
 0xa3e   :  { %2734 = vmatmul.mubr.bf16.gmra.mxu0 %v6145_v51 }
 0xa3f   :  { %2741 = vmatprep.mubr.bf16.mxu0 %v6154_v28 }
 0xa46   :  { %2742 = vmatmul.mubr.bf16.gmra.mxu0 %v6155_v52 }
 0xa47   :  { %2749 = vmatprep.mubr.bf16.mxu0 %v6156_v34 }
 0xa4e   :  { %2750 = vmatmul.mubr.bf16.gmra.mxu0 %v6157_v19 }
 0xa4f   :  { %2757 = vmatprep.mubr.bf16.mxu0 %v6158_v16 }
 0xa56   :  { %2758 = vmatmul.mubr.bf16.gmra.mxu0 %v6159_v17 }
 0xa9e   :  { %v4295_v41 = vpop.f32.mrf.mxu0 }
 0xaa0   :  { %v4296_v54 = vpop.f32.mrf.mxu0 }
 0xaa1   :  { %v4297_v32 = vadd.f32 %v4296_v54, %v4295_v41 }
 0xaa2   :  { %v4298_v37 = vpop.f32.mrf.mxu0 }
 0xaa3   :  { %v2766_v44 = vmax.f32 %v4297_v32, 0.0 }
 0xaa4   :  { %v4299_v27 = vpop.f32.mrf.mxu0 }
 0xaa5   :  { %v4300_v35 = vadd.f32 %v4299_v27, %v4298_v37 }
 0xaa6   :  { %v4301_v31 = vpop.f32.mrf.mxu0 }
 0xaa7   :  { %v2767_v39 = vmax.f32 %v4300_v35, 0.0 }
 0xaa8   :  { %v4302_v18 = vpop.f32.mrf.mxu0 }
 0xaa9   :  { %v2798_v60 = vpack.c.bf16 %v2767_v39, %v2766_v44  ;;  %v4303_v42 = vadd.f32 %v4302_v18, %v4301_v31 }
 0xaaa   :  { %v4304_v36 = vpop.f32.mrf.mxu0 }
 0xaab   :  { %4735 = vmatprep.mubr.bf16.mxu1 %v2798_v60  ;;  %v2768_v38 = vmax.f32 %v4303_v42, 0.0 }
 0xaac   :  { %v4305_v25 = vpop.f32.mrf.mxu0 }
 0xaad   :  { %v4306_v45 = vadd.f32 %v4305_v25, %v4304_v36 }
 0xaae   :  { %v4307_v49 = vpop.f32.mrf.mxu0 }
 0xaaf   :  { %v2769_v59 = vmax.f32 %v4306_v45, 0.0 }
 0xab0   :  { %v4308_v57 = vpop.f32.mrf.mxu0 }
 0xab1   :  { %v2799_v40 = vpack.c.bf16 %v2769_v59, %v2768_v38  ;;  %v4309_v61 = vadd.f32 %v4308_v57, %v4307_v49 }
 0xab2   :  { %v4310_v26 = vpop.f32.mrf.mxu0 }
 0xab3   :  { %4736 = vmatmul.mubr.bf16.vlgmr.msra.gmra.mxu1 %v2799_v40  ;;  %v2770_v22 = vmax.f32 %v4309_v61, 0.0 }
 0xab4   :  { %v4311_v29 = vpop.f32.mrf.mxu0 }
 0xab5   :  { %v4312_v46 = vadd.f32 %v4311_v29, %v4310_v26 }
 0xab6   :  { %v4313_v55 = vpop.f32.mrf.mxu0 }
 0xab7   :  { %v2771_v50 = vmax.f32 %v4312_v46, 0.0 }
 0xab8   :  { %v4314_v21 = vpop.f32.mrf.mxu0 }
 0xab9   :  { %v2800_v30 = vpack.c.bf16 %v2771_v50, %v2770_v22  ;;  %v4315_v48 = vadd.f32 %v4314_v21, %v4313_v55 }
 0xaba   :  { %v4316_v33 = vpop.f32.mrf.mxu0 }
 0xabb   :  { %4739 = vmatprep.mubr.bf16.mxu1 %v2800_v30  ;;  %v2772_v54 = vmax.f32 %v4315_v48, 0.0 }
 0xabc   :  { %v4317_v43 = vpop.f32.mrf.mxu0 }
 0xabd   :  { %v4318_v53 = vadd.f32 %v4317_v43, %v4316_v33 }
 0xabe   :  { %v4319_v41 = vpop.f32.mrf.mxu0 }
 0xabf   :  { %v2773_v37 = vmax.f32 %v4318_v53, 0.0 }
 0xac0   :  { %v4320_v32 = vpop.f32.mrf.mxu0 }
 0xac1   :  { %v2801_v27 = vpack.c.bf16 %v2773_v37, %v2772_v54  ;;  %v4321_v31 = vadd.f32 %v4320_v32, %v4319_v41 }
 0xac2   :  { %v4322_v35 = vpop.f32.mrf.mxu0 }
 0xac3   :  { %4740 = vmatmul.mubr.bf16.gmra.mxu1 %v2801_v27  ;;  %v2774_v60 = vmax.f32 %v4321_v31, 0.0 }
 0xac4   :  { %v4323_v44 = vpop.f32.mrf.mxu0 }
 0xac5   :  { %v4324_v39 = vadd.f32 %v4323_v44, %v4322_v35 }
 0xac6   :  { %v4325_v18 = vpop.f32.mrf.mxu0 }
 0xac7   :  { %v2775_v36 = vmax.f32 %v4324_v39, 0.0 }
 0xac8   :  { %v4326_v42 = vpop.f32.mrf.mxu0 }
 0xac9   :  { %v2802_v25 = vpack.c.bf16 %v2775_v36, %v2774_v60  ;;  %v4327_v49 = vadd.f32 %v4326_v42, %v4325_v18 }
 0xaca   :  { %v4328_v45 = vpop.f32.mrf.mxu0 }
 0xacb   :  { %4743 = vmatprep.mubr.bf16.mxu1 %v2802_v25  ;;  %v2776_v40 = vmax.f32 %v4327_v49, 0.0 }
 0xacc   :  { %v4329_v38 = vpop.f32.mrf.mxu0 }
 0xacd   :  { %v4330_v59 = vadd.f32 %v4329_v38, %v4328_v45 }
 0xace   :  { %v4331_v57 = vpop.f32.mrf.mxu0 }
 0xacf   :  { %v2777_v26 = vmax.f32 %v4330_v59, 0.0 }
 0xad0   :  { %v4332_v61 = vpop.f32.mrf.mxu0 }
 0xad1   :  { %v2803_v29 = vpack.c.bf16 %v2777_v26, %v2776_v40  ;;  %v4333_v55 = vadd.f32 %v4332_v61, %v4331_v57 }
 0xad2   :  { %v4334_v46 = vpop.f32.mrf.mxu0 }
 0xad3   :  { %4744 = vmatmul.mubr.bf16.gmra.mxu1 %v2803_v29  ;;  %v2778_v30 = vmax.f32 %v4333_v55, 0.0 }
 0xad4   :  { %v4335_v22 = vpop.f32.mrf.mxu0 }
 0xad5   :  { %v4336_v50 = vadd.f32 %v4335_v22, %v4334_v46 }
 0xad6   :  { %v4337_v21 = vpop.f32.mrf.mxu0 }
 0xad7   :  { %v2779_v33 = vmax.f32 %v4336_v50, 0.0 }
 0xad8   :  { %v4338_v48 = vpop.f32.mrf.mxu0 }
 0xad9   :  { %v2804_v43 = vpack.c.bf16 %v2779_v33, %v2778_v30  ;;  %v4339_v41 = vadd.f32 %v4338_v48, %v4337_v21 }
 0xada   :  { %v4340_v53 = vpop.f32.mrf.mxu0 }
 0xadb   :  { %4747 = vmatprep.mubr.bf16.mxu1 %v2804_v43  ;;  %v2780_v27 = vmax.f32 %v4339_v41, 0.0 }
 0xadc   :  { %v4341_v54 = vpop.f32.mrf.mxu0 }
 0xadd   :  { %v4342_v37 = vadd.f32 %v4341_v54, %v4340_v53 }
 0xade   :  { %v4343_v32 = vpop.f32.mrf.mxu0 }
 0xadf   :  { %v2781_v35 = vmax.f32 %v4342_v37, 0.0 }
 0xae0   :  { %v4344_v31 = vpop.f32.mrf.mxu0 }
 0xae1   :  { %v2805_v44 = vpack.c.bf16 %v2781_v35, %v2780_v27  ;;  %v4345_v18 = vadd.f32 %v4344_v31, %v4343_v32 }
 0xae2   :  { %v4346_v39 = vpop.f32.mrf.mxu0 }
 0xae3   :  { %4748 = vmatmul.mubr.bf16.gmra.mxu1 %v2805_v44  ;;  %v2782_v25 = vmax.f32 %v4345_v18, 0.0 }
 0xae4   :  { %v4347_v60 = vpop.f32.mrf.mxu0 }
 0xae5   :  { %v4348_v36 = vadd.f32 %v4347_v60, %v4346_v39 }
 0xae6   :  { %v4349_v42 = vpop.f32.mrf.mxu0 }
 0xae7   :  { %v2783_v45 = vmax.f32 %v4348_v36, 0.0 }
 0xae8   :  { %v4350_v49 = vpop.f32.mrf.mxu0 }
 0xae9   :  { %v2806_v38 = vpack.c.bf16 %v2783_v45, %v2782_v25  ;;  %v4351_v57 = vadd.f32 %v4350_v49, %v4349_v42 }
 0xaea   :  { %v4352_v59 = vpop.f32.mrf.mxu0 }
 0xaeb   :  { %4751 = vmatprep.mubr.bf16.mxu1 %v2806_v38  ;;  %v2784_v29 = vmax.f32 %v4351_v57, 0.0 }
 0xaec   :  { %v4353_v40 = vpop.f32.mrf.mxu0 }
 0xaed   :  { %v4354_v26 = vadd.f32 %v4353_v40, %v4352_v59 }
 0xaee   :  { %v4355_v61 = vpop.f32.mrf.mxu0 }
 0xaef   :  { %v2785_v46 = vmax.f32 %v4354_v26, 0.0 }
 0xaf0   :  { %v4356_v55 = vpop.f32.mrf.mxu0 }
 0xaf1   :  { %v2807_v22 = vpack.c.bf16 %v2785_v46, %v2784_v29  ;;  %v4357_v21 = vadd.f32 %v4356_v55, %v4355_v61 }
 0xaf2   :  { %v4358_v50 = vpop.f32.mrf.mxu0 }
 0xaf3   :  { %4752 = vmatmul.mubr.bf16.gmra.mxu1 %v2807_v22  ;;  %v2786_v43 = vmax.f32 %v4357_v21, 0.0 }
 0xaf4   :  { %v4359_v30 = vpop.f32.mrf.mxu0 }
 0xaf5   :  { %v4360_v33 = vadd.f32 %v4359_v30, %v4358_v50 }
 0xaf6   :  { %v4361_v48 = vpop.f32.mrf.mxu0 }
 0xaf7   :  { %v2787_v53 = vmax.f32 %v4360_v33, 0.0 }
 0xaf8   :  { %v4362_v41 = vpop.f32.mrf.mxu0 }
 0xaf9   :  { %v2808_v54 = vpack.c.bf16 %v2787_v53, %v2786_v43  ;;  %v4363_v32 = vadd.f32 %v4362_v41, %v4361_v48 }
 0xafa   :  { %v4364_v37 = vpop.f32.mrf.mxu0 }
 0xafb   :  { %4755 = vmatprep.mubr.bf16.mxu1 %v2808_v54  ;;  %v2788_v44 = vmax.f32 %v4363_v32, 0.0 }
 0xafc   :  { %v4365_v27 = vpop.f32.mrf.mxu0 }
 0xafd   :  { %v4366_v35 = vadd.f32 %v4365_v27, %v4364_v37 }
 0xafe   :  { %v4367_v31 = vpop.f32.mrf.mxu0 }
 0xaff   :  { %v2789_v39 = vmax.f32 %v4366_v35, 0.0 }
 0xb00   :  { %v4368_v18 = vpop.f32.mrf.mxu0 }
 0xb01   :  { %v2809_v60 = vpack.c.bf16 %v2789_v39, %v2788_v44  ;;  %v4369_v42 = vadd.f32 %v4368_v18, %v4367_v31 }
 0xb02   :  { %v4370_v36 = vpop.f32.mrf.mxu0 }
 0xb03   :  { %4756 = vmatmul.mubr.bf16.gmra.mxu1 %v2809_v60  ;;  %v2790_v38 = vmax.f32 %v4369_v42, 0.0  ;;  %v6160_v42 = vld [vmem:[#allocation13_spill] sm:$0xff] }
 0xb04   :  { %v4371_v25 = vpop.f32.mrf.mxu0 }
 0xb05   :  { %v4372_v45 = vadd.f32 %v4371_v25, %v4370_v36 }
 0xb06   :  { %v4373_v49 = vpop.f32.mrf.mxu0 }
 0xb07   :  { %v2791_v59 = vmax.f32 %v4372_v45, 0.0 }
 0xb08   :  { %v4374_v57 = vpop.f32.mrf.mxu0 }
 0xb09   :  { %v2810_v40 = vpack.c.bf16 %v2791_v59, %v2790_v38  ;;  %v4375_v61 = vadd.f32 %v4374_v57, %v4373_v49 }
 0xb0a   :  { %v4376_v26 = vpop.f32.mrf.mxu0 }
 0xb0b   :  { %4759 = vmatprep.mubr.bf16.mxu1 %v2810_v40  ;;  %v2792_v22 = vmax.f32 %v4375_v61, 0.0 }
 0xb0c   :  { %v4377_v29 = vpop.f32.mrf.mxu0 }
 0xb0d   :  { %v4378_v46 = vadd.f32 %v4377_v29, %v4376_v26 }
 0xb0e   :  { %v4379_v55 = vpop.f32.mrf.mxu0 }
 0xb0f   :  { %v2793_v50 = vmax.f32 %v4378_v46, 0.0 }
 0xb10   :  { %v4380_v21 = vpop.f32.mrf.mxu0 }
 0xb11   :  { %v2811_v30 = vpack.c.bf16 %v2793_v50, %v2792_v22  ;;  %v4381_v48 = vadd.f32 %v4380_v21, %v4379_v55 }
 0xb12   :  { %v4382_v33 = vpop.f32.mrf.mxu0 }
 0xb13   :  { %4760 = vmatmul.mubr.bf16.gmra.mxu1 %v2811_v30  ;;  %v2794_v54 = vmax.f32 %v4381_v48, 0.0 }
 0xb14   :  { %v4383_v43 = vpop.f32.mrf.mxu0 }
 0xb15   :  { %v4384_v53 = vadd.f32 %v4383_v43, %v4382_v33 }
 0xb16   :  { %v4385_v41 = vpop.f32.mrf.mxu0 }
 0xb17   :  { %v2795_v37 = vmax.f32 %v4384_v53, 0.0 }
 0xb18   :  { %v4386_v32 = vpop.f32.mrf.mxu0 }
 0xb19   :  { %v2812_v27 = vpack.c.bf16 %v2795_v37, %v2794_v54  ;;  %v4387_v31 = vadd.f32 %v4386_v32, %v4385_v41 }
 0xb1a   :  { %v4388_v35 = vpop.f32.mrf.mxu0 }
 0xb1b   :  { %4763 = vmatprep.mubr.bf16.mxu1 %v2812_v27  ;;  %v2796_v18 = vmax.f32 %v4387_v31, 0.0 }
 0xb1c   :  { %v4389_v44 = vpop.f32.mrf.mxu0 }
 0xb1d   :  { %v4390_v39 = vadd.f32 %v4389_v44, %v4388_v35 }
 0xb1f   :  { %v2797_v60 = vmax.f32 %v4390_v39, 0.0 }
 0xb21   :  { %v2813_v36 = vpack.c.bf16 %v2797_v60, %v2796_v18 }
 0xb23   :  { %4764 = vmatmul.mubr.bf16.gmra.mxu1 %v2813_v36 }
 0xb24   :  { %3088 = vmatprep.mubr.bf16.mxu1 %v6160_v42 }
 0xb73   :  { %v4737_v25 = vpop.f32.mrf.mxu1 }
 0xb75   :  { %v2913_v45 = vpop.f32.mrf.mxu1 }
 0xb77   :  { %v4738_v49 = vpop.f32.mrf.mxu1 }
 0xb78   :  { %v3041_v38 = vpack.c.bf16 %v4738_v49, %v4737_v25 }
 0xb79   :  { %v2916_v59 = vpop.f32.mrf.mxu1 }
 0xb7a   :  { %v3040_v57 = vpack.c.bf16 %v2916_v59, %v2913_v45 }
 0xb83   :  { %v4741_v40 = vpop.f32.mrf.mxu1 }
 0xb85   :  { %v2929_v26 = vpop.f32.mrf.mxu1 }
 0xb87   :  { %v4742_v61 = vpop.f32.mrf.mxu1 }
 0xb88   :  { %v3043_v29 = vpack.c.bf16 %v4742_v61, %v4741_v40 }
 0xb89   :  { %v2932_v46 = vpop.f32.mrf.mxu1 }
 0xb8a   :  { %v3042_v55 = vpack.c.bf16 %v2932_v46, %v2929_v26 }
 0xb93   :  { %v4745_v22 = vpop.f32.mrf.mxu1 }
 0xb95   :  { %v2945_v50 = vpop.f32.mrf.mxu1 }
 0xb97   :  { %v4746_v21 = vpop.f32.mrf.mxu1 }
 0xb98   :  { %v3045_v17 = vpack.c.bf16 %v4746_v21, %v4745_v22 }
 0xb99   :  { %v2948_v30 = vpop.f32.mrf.mxu1 }
 0xb9a   :  { %v3044_v19 = vpack.c.bf16 %v2948_v30, %v2945_v50 }
 0xba3   :  { %v4749_v33 = vpop.f32.mrf.mxu1 }
 0xba5   :  { %v2961_v48 = vpop.f32.mrf.mxu1 }
 0xba7   :  { %v4750_v43 = vpop.f32.mrf.mxu1 }
 0xba8   :  { %v3047_v59 = vpack.c.bf16 %v4750_v43, %v4749_v33 }
 0xba9   :  { %v2964_v53 = vpop.f32.mrf.mxu1 }
 0xbaa   :  { %v3046_v61 = vpack.c.bf16 %v2964_v53, %v2961_v48 }
 0xbb3   :  { %v4753_v41 = vpop.f32.mrf.mxu1 }
 0xbb5   :  { %v2977_v54 = vpop.f32.mrf.mxu1 }
 0xbb7   :  { %v4754_v37 = vpop.f32.mrf.mxu1 }
 0xbb8   :  { %v3049_v33 = vpack.c.bf16 %v4754_v37, %v4753_v41 }
 0xbb9   :  { %v2980_v32 = vpop.f32.mrf.mxu1 }
 0xbba   :  { %v3048_v43 = vpack.c.bf16 %v2980_v32, %v2977_v54 }
 0xbc3   :  { %v4757_v27 = vpop.f32.mrf.mxu1 }
 0xbc5   :  { %v2993_v35 = vpop.f32.mrf.mxu1 }
 0xbc7   :  { %v4758_v31 = vpop.f32.mrf.mxu1 }
 0xbc8   :  { %v3051_v34 = vpack.c.bf16 %v4758_v31, %v4757_v27 }
 0xbc9   :  { %v2996_v44 = vpop.f32.mrf.mxu1 }
 0xbca   :  { %v3050_v52 = vpack.c.bf16 %v2996_v44, %v2993_v35 }
 0xbd3   :  { %v4761_v39 = vpop.f32.mrf.mxu1 }
 0xbd5   :  { %v3009_v18 = vpop.f32.mrf.mxu1 }
 0xbd7   :  { %v4762_v60 = vpop.f32.mrf.mxu1 }
 0xbd8   :  { %v3053_v46 = vpack.c.bf16 %v4762_v60, %v4761_v39 }
 0xbd9   :  { %v3012_v36 = vpop.f32.mrf.mxu1 }
 0xbda   :  { %v3052_v16 = vpack.c.bf16 %v3012_v36, %v3009_v18 }
 0xbe3   :  { %v4765_v42 = vpop.f32.mrf.mxu1 }
 0xbe5   :  { %v3025_v25 = vpop.f32.mrf.mxu1 }
 0xbe7   :  { %v4766_v45 = vpop.f32.mrf.mxu1 }
 0xbe8   :  { %v3055_v49 = vpack.c.bf16 %v4766_v45, %v4765_v42 }
 0xbe9   :  { %v3028_v40 = vpop.f32.mrf.mxu1 }
 0xbea   :  { %v3054_v26 = vpack.c.bf16 %v3028_v40, %v3025_v25  ;;  %4415 = vmatprep.subr.bf16.mxu1 %v3055_v49 }
 0xbeb   :  { %4416 = vmatpush3.bf16.msra.mxu1 %v3047_v59 }
 0xbec   :  { %4417 = vmatprep.subr.bf16.mxu1 %v3054_v26 }
 0xbef   :  { %4418 = vmatpush3.bf16.msra.mxu1 %v3046_v61 }
 0xbf0   :  { %4419 = vmatprep.subr.bf16.mxu1 %v3053_v46 }
 0xbf3   :  { %4420 = vmatpush3.bf16.msra.mxu1 %v3045_v17 }
 0xbf4   :  { %4421 = vmatprep.subr.bf16.mxu1 %v3052_v16 }
 0xbf7   :  { %4422 = vmatpush3.bf16.msra.mxu1 %v3044_v19 }
 0xbf8   :  { %4423 = vmatprep.subr.bf16.mxu1 %v3051_v34 }
 0xbfb   :  { %4424 = vmatpush3.bf16.msra.mxu1 %v3043_v29 }
 0xbfc   :  { %4425 = vmatprep.subr.bf16.mxu1 %v3050_v52 }
 0xbff   :  { %4426 = vmatpush3.bf16.msra.mxu1 %v3042_v55 }
 0xc00   :  { %4427 = vmatprep.subr.bf16.mxu1 %v3049_v33 }
 0xc03   :  { %4428 = vmatpush3.bf16.msra.mxu1 %v3041_v38 }
 0xc04   :  { %4429 = vmatprep.subr.bf16.mxu1 %v3048_v43 }
 0xc07   :  { %4430 = vmatpush3.bf16.msra.mxu1 %v3040_v57 }
 0xc0a   :  { %3089 = vmatmul.mubr.bf16.vlgmr.msra.gmra.mxu1 %v5169_v62  ;;  %v6162_v62 = vld [vmem:[#allocation10_spill] sm:$0xff] }
 0xc0b   :  { %3096 = vmatprep.mubr.bf16.mxu1 %v5177_v58  ;;  %v6164_v58 = vld [vmem:[#allocation12_spill] sm:$0xff] }
 0xc12   :  { %3097 = vmatmul.mubr.bf16.gmra.mxu1 %v5192_v0 }
 0xc13   :  { %3104 = vmatprep.mubr.bf16.mxu1 %v5200_v8 }
 0xc1a   :  { %3105 = vmatmul.mubr.bf16.gmra.mxu1 %v5212_v2 }
 0xc1b   :  { %3112 = vmatprep.mubr.bf16.mxu1 %v5220_v10 }
 0xc22   :  { %3113 = vmatmul.mubr.bf16.gmra.mxu1 %v5232_v4 }
 0xc23   :  { %3120 = vmatprep.mubr.bf16.mxu1 %v5155_v24  ;;  %v6161_v24 = vld [vmem:[#allocation7_spill] sm:$0xff] }
 0xc2a   :  { %3121 = vmatmul.mubr.bf16.gmra.mxu1 %v5173_v56  ;;  %v6163_v56 = vld [vmem:[#allocation9_spill] sm:$0xff] }
 0xc2b   :  { %3128 = vmatprep.mubr.bf16.mxu1 %v5181_v63  ;;  %v6165_v63 = vld [vmem:[#allocation11_spill] sm:$0xff] }
 0xc32   :  { %3129 = vmatmul.mubr.bf16.gmra.mxu1 %v5196_v1 }
 0xc33   :  { %3136 = vmatprep.mubr.bf16.mxu1 %v5204_v9 }
 0xc3a   :  { %3137 = vmatmul.mubr.bf16.gmra.mxu1 %v5216_v3 }
 0xc3b   :  { %3144 = vmatprep.mubr.bf16.mxu1 %v5224_v11 }
 0xc42   :  { %3145 = vmatmul.mubr.bf16.gmra.mxu1 %v5236_v5 }
 0xc43   :  { %3152 = vmatprep.mubr.bf16.mxu1 %v5240_v12 }
 0xc4a   :  { %3153 = vmatmul.mubr.bf16.gmra.mxu1 %v5247_v13 }
 0xc4b   :  { %3160 = vmatprep.mubr.bf16.mxu1 %v5251_v6 }
 0xc52   :  { %3161 = vmatmul.mubr.bf16.gmra.mxu1 %v5257_v7 }
 0xc53   :  { %3168 = vmatprep.mubr.bf16.mxu1 %v5261_v14 }
 0xc5a   :  { %3169 = vmatmul.mubr.bf16.gmra.mxu1 %v5267_v15 }
 0xc5b   :  { %3176 = vmatprep.mubr.bf16.mxu1 %v6142_v20 }
 0xc62   :  { %3177 = vmatmul.mubr.bf16.gmra.mxu1 %v6143_v47 }
 0xc63   :  { %3184 = vmatprep.mubr.bf16.mxu1 %v6144_v23 }
 0xc6a   :  { %3185 = vmatmul.mubr.bf16.gmra.mxu1 %v6145_v51 }
 0xc6b   :  { %3192 = vmatprep.mubr.bf16.mxu1 %v6154_v28 }
 0xc72   :  { %3193 = vmatmul.mubr.bf16.gmra.mxu1 %v6161_v24 }
 0xc73   :  { %3200 = vmatprep.mubr.bf16.mxu1 %v6162_v62 }
 0xc7a   :  { %3201 = vmatmul.mubr.bf16.gmra.mxu1 %v6163_v56 }
 0xc7b   :  { %3208 = vmatprep.mubr.bf16.mxu1 %v6164_v58 }
 0xc82   :  { %3209 = vmatmul.mubr.bf16.gmra.mxu1 %v6165_v63 }
 0xcca   :  { %v4431_v0 = vpop.f32.mrf.mxu1 }
 0xccc   :  { %v4432_v1 = vpop.f32.mrf.mxu1 }
 0xccd   :  { %v4433_v8 = vadd.f32 %v4432_v1, %v4431_v0 }
 0xcce   :  { %v4434_v9 = vpop.f32.mrf.mxu1 }
 0xccf   :  { %v3217_v2 = vmax.f32 %v4433_v8, 0.0 }
 0xcd0   :  { %v4435_v3 = vpop.f32.mrf.mxu1 }
 0xcd1   :  { %3313 = vst [vmem:[%s6066_s6] sm:$0xff] %v3217_v2  ;;  %v4436_v10 = vadd.f32 %v4435_v3, %v4434_v9 }
 0xcd2   :  { %v4437_v11 = vpop.f32.mrf.mxu1 }
 0xcd3   :  { %v3218_v4 = vmax.f32 %v4436_v10, 0.0 }
 0xcd4   :  { %v4438_v5 = vpop.f32.mrf.mxu1 }
 0xcd5   :  { %3314 = vst [vmem:[%s6066_s6 + $0x8] sm:$0xff] %v3218_v4  ;;  %v4439_v12 = vadd.f32 %v4438_v5, %v4437_v11 }
 0xcd6   :  { %v4440_v13 = vpop.f32.mrf.mxu1 }
 0xcd7   :  { %v3219_v6 = vmax.f32 %v4439_v12, 0.0 }
 0xcd8   :  { %v4441_v7 = vpop.f32.mrf.mxu1 }
 0xcd9   :  { %3315 = vst [vmem:[%s6066_s6 + $0x10] sm:$0xff] %v3219_v6  ;;  %v4442_v14 = vadd.f32 %v4441_v7, %v4440_v13 }
 0xcda   :  { %v4443_v15 = vpop.f32.mrf.mxu1 }
 0xcdb   :  { %v3220_v20 = vmax.f32 %v4442_v14, 0.0 }
 0xcdc   :  { %v4444_v47 = vpop.f32.mrf.mxu1 }
 0xcdd   :  { %3316 = vst [vmem:[%s6066_s6 + $0x18] sm:$0xff] %v3220_v20  ;;  %v4445_v23 = vadd.f32 %v4444_v47, %v4443_v15 }
 0xcde   :  { %v4446_v51 = vpop.f32.mrf.mxu1 }
 0xcdf   :  { %v3221_v28 = vmax.f32 %v4445_v23, 0.0 }
 0xce0   :  { %v4447_v52 = vpop.f32.mrf.mxu1 }
 0xce1   :  { %3317 = vst [vmem:[%s6066_s6 + $0x20] sm:$0xff] %v3221_v28  ;;  %v4448_v34 = vadd.f32 %v4447_v52, %v4446_v51 }
 0xce2   :  { %v4449_v19 = vpop.f32.mrf.mxu1 }
 0xce3   :  { %v3222_v16 = vmax.f32 %v4448_v34, 0.0 }
 0xce4   :  { %v4450_v17 = vpop.f32.mrf.mxu1 }
 0xce5   :  { %3318 = vst [vmem:[%s6066_s6 + $0x28] sm:$0xff] %v3222_v16  ;;  %v4451_v38 = vadd.f32 %v4450_v17, %v4449_v19 }
 0xce6   :  { %v4452_v57 = vpop.f32.mrf.mxu1 }
 0xce7   :  { %v3223_v29 = vmax.f32 %v4451_v38, 0.0 }
 0xce8   :  { %v4453_v55 = vpop.f32.mrf.mxu1 }
 0xce9   :  { %3319 = vst [vmem:[%s6066_s6 + $0x30] sm:$0xff] %v3223_v29  ;;  %v4454_v22 = vadd.f32 %v4453_v55, %v4452_v57 }
 0xcea   :  { %v4455_v50 = vpop.f32.mrf.mxu1 }
 0xceb   :  { %v3224_v21 = vmax.f32 %v4454_v22, 0.0 }
 0xcec   :  { %v4456_v30 = vpop.f32.mrf.mxu1 }
 0xced   :  { %3320 = vst [vmem:[%s6066_s6 + $0x38] sm:$0xff] %v3224_v21  ;;  %v4457_v48 = vadd.f32 %v4456_v30, %v4455_v50 }
 0xcee   :  { %v4458_v53 = vpop.f32.mrf.mxu1 }
 0xcef   :  { %v3225_v41 = vmax.f32 %v4457_v48, 0.0 }
 0xcf0   :  { %v4459_v54 = vpop.f32.mrf.mxu1 }
 0xcf1   :  { %3321 = vst [vmem:[%s6066_s6 + $0x40] sm:$0xff] %v3225_v41  ;;  %v4460_v37 = vadd.f32 %v4459_v54, %v4458_v53 }
 0xcf2   :  { %v4461_v32 = vpop.f32.mrf.mxu1 }
 0xcf3   :  { %v3226_v27 = vmax.f32 %v4460_v37, 0.0 }
 0xcf4   :  { %v4462_v35 = vpop.f32.mrf.mxu1 }
 0xcf5   :  { %3322 = vst [vmem:[%s6066_s6 + $0x48] sm:$0xff] %v3226_v27  ;;  %v4463_v31 = vadd.f32 %v4462_v35, %v4461_v32 }
 0xcf6   :  { %v4464_v44 = vpop.f32.mrf.mxu1 }
 0xcf7   :  { %v3227_v39 = vmax.f32 %v4463_v31, 0.0 }
 0xcf8   :  { %v4465_v18 = vpop.f32.mrf.mxu1 }
 0xcf9   :  { %3323 = vst [vmem:[%s6066_s6 + $0x50] sm:$0xff] %v3227_v39  ;;  %v4466_v60 = vadd.f32 %v4465_v18, %v4464_v44 }
 0xcfa   :  { %v4467_v36 = vpop.f32.mrf.mxu1 }
 0xcfb   :  { %v3228_v42 = vmax.f32 %v4466_v60, 0.0 }
 0xcfc   :  { %v4468_v25 = vpop.f32.mrf.mxu1 }
 0xcfd   :  { %3324 = vst [vmem:[%s6066_s6 + $0x58] sm:$0xff] %v3228_v42  ;;  %v4469_v45 = vadd.f32 %v4468_v25, %v4467_v36 }
 0xcfe   :  { %v4470_v49 = vpop.f32.mrf.mxu1 }
 0xcff   :  { %v3229_v59 = vmax.f32 %v4469_v45, 0.0 }
 0xd00   :  { %v4471_v40 = vpop.f32.mrf.mxu1 }
 0xd01   :  { %3325 = vst [vmem:[%s6066_s6 + $0x60] sm:$0xff] %v3229_v59  ;;  %v4472_v26 = vadd.f32 %v4471_v40, %v4470_v49 }
 0xd02   :  { %v4473_v61 = vpop.f32.mrf.mxu1 }
 0xd03   :  { %v3230_v46 = vmax.f32 %v4472_v26, 0.0 }
 0xd04   :  { %v4474_v33 = vpop.f32.mrf.mxu1 }
 0xd05   :  { %3326 = vst [vmem:[%s6066_s6 + $0x68] sm:$0xff] %v3230_v46  ;;  %v4475_v43 = vadd.f32 %v4474_v33, %v4473_v61 }
 0xd06   :  { %v4476_v24 = vpop.f32.mrf.mxu1 }
 0xd07   :  { %v3231_v62 = vmax.f32 %v4475_v43, 0.0 }
 0xd08   :  { %v4477_v56 = vpop.f32.mrf.mxu1 }
 0xd09   :  { %3327 = vst [vmem:[%s6066_s6 + $0x70] sm:$0xff] %v3231_v62  ;;  %v4478_v58 = vadd.f32 %v4477_v56, %v4476_v24 }
 0xd0a   :  { %v4479_v63 = vpop.f32.mrf.mxu1 }
 0xd0b   :  { %v3232_v0 = vmax.f32 %v4478_v58, 0.0 }
 0xd0c   :  { %v4480_v1 = vpop.f32.mrf.mxu1 }
 0xd0d   :  { %3328 = vst [vmem:[%s6066_s6 + $0x78] sm:$0xff] %v3232_v0  ;;  %v4481_v8 = vadd.f32 %v4480_v1, %v4479_v63 }
 0xd0e   :  { %v4482_v9 = vpop.f32.mrf.mxu1 }
 0xd0f   :  { %v3233_v2 = vmax.f32 %v4481_v8, 0.0 }
 0xd10   :  { %v4483_v3 = vpop.f32.mrf.mxu1 }
 0xd11   :  { %3329 = vst [vmem:[%s6066_s6 + $0x80] sm:$0xff] %v3233_v2  ;;  %v4484_v10 = vadd.f32 %v4483_v3, %v4482_v9 }
 0xd12   :  { %v4485_v11 = vpop.f32.mrf.mxu1 }
 0xd13   :  { %v3234_v4 = vmax.f32 %v4484_v10, 0.0 }
 0xd14   :  { %v4486_v5 = vpop.f32.mrf.mxu1 }
 0xd15   :  { %3330 = vst [vmem:[%s6066_s6 + $0x88] sm:$0xff] %v3234_v4  ;;  %v4487_v12 = vadd.f32 %v4486_v5, %v4485_v11 }
 0xd16   :  { %v4488_v13 = vpop.f32.mrf.mxu1 }
 0xd17   :  { %v3235_v6 = vmax.f32 %v4487_v12, 0.0 }
 0xd18   :  { %v4489_v7 = vpop.f32.mrf.mxu1 }
 0xd19   :  { %3331 = vst [vmem:[%s6066_s6 + $0x90] sm:$0xff] %v3235_v6  ;;  %v4490_v14 = vadd.f32 %v4489_v7, %v4488_v13 }
 0xd1a   :  { %v4491_v15 = vpop.f32.mrf.mxu1 }
 0xd1b   :  { %v3236_v20 = vmax.f32 %v4490_v14, 0.0 }
 0xd1c   :  { %v4492_v47 = vpop.f32.mrf.mxu1 }
 0xd1d   :  { %3332 = vst [vmem:[%s6066_s6 + $0x98] sm:$0xff] %v3236_v20  ;;  %v4493_v23 = vadd.f32 %v4492_v47, %v4491_v15 }
 0xd1e   :  { %v4494_v51 = vpop.f32.mrf.mxu1 }
 0xd1f   :  { %v3237_v28 = vmax.f32 %v4493_v23, 0.0 }
 0xd20   :  { %v4495_v52 = vpop.f32.mrf.mxu1 }
 0xd21   :  { %3333 = vst [vmem:[%s6066_s6 + $0xa0] sm:$0xff] %v3237_v28  ;;  %v4496_v34 = vadd.f32 %v4495_v52, %v4494_v51 }
 0xd22   :  { %v4497_v19 = vpop.f32.mrf.mxu1 }
 0xd23   :  { %v3238_v16 = vmax.f32 %v4496_v34, 0.0 }
 0xd24   :  { %v4498_v17 = vpop.f32.mrf.mxu1 }
 0xd25   :  { %3334 = vst [vmem:[%s6066_s6 + $0xa8] sm:$0xff] %v3238_v16  ;;  %v4499_v38 = vadd.f32 %v4498_v17, %v4497_v19 }
 0xd26   :  { %v4500_v57 = vpop.f32.mrf.mxu1 }
 0xd27   :  { %v3239_v29 = vmax.f32 %v4499_v38, 0.0 }
 0xd28   :  { %v4501_v55 = vpop.f32.mrf.mxu1 }
 0xd29   :  { %3335 = vst [vmem:[%s6066_s6 + $0xb0] sm:$0xff] %v3239_v29  ;;  %v4502_v22 = vadd.f32 %v4501_v55, %v4500_v57 }
 0xd2a   :  { %v4503_v50 = vpop.f32.mrf.mxu1 }
 0xd2b   :  { %v3240_v21 = vmax.f32 %v4502_v22, 0.0 }
 0xd2c   :  { %v4504_v30 = vpop.f32.mrf.mxu1 }
 0xd2d   :  { %3336 = vst [vmem:[%s6066_s6 + $0xb8] sm:$0xff] %v3240_v21  ;;  %v4505_v48 = vadd.f32 %v4504_v30, %v4503_v50 }
 0xd2e   :  { %v4506_v53 = vpop.f32.mrf.mxu1 }
 0xd2f   :  { %v3241_v41 = vmax.f32 %v4505_v48, 0.0 }
 0xd30   :  { %v4507_v54 = vpop.f32.mrf.mxu1 }
 0xd31   :  { %3337 = vst [vmem:[%s6066_s6 + $0xc0] sm:$0xff] %v3241_v41  ;;  %v4508_v37 = vadd.f32 %v4507_v54, %v4506_v53 }
 0xd32   :  { %v4509_v32 = vpop.f32.mrf.mxu1 }
 0xd33   :  { %v3242_v27 = vmax.f32 %v4508_v37, 0.0 }
 0xd34   :  { %v4510_v35 = vpop.f32.mrf.mxu1 }
 0xd35   :  { %3338 = vst [vmem:[%s6066_s6 + $0xc8] sm:$0xff] %v3242_v27  ;;  %v4511_v31 = vadd.f32 %v4510_v35, %v4509_v32 }
 0xd36   :  { %v4512_v44 = vpop.f32.mrf.mxu1 }
 0xd37   :  { %v3243_v39 = vmax.f32 %v4511_v31, 0.0 }
 0xd38   :  { %v4513_v18 = vpop.f32.mrf.mxu1 }
 0xd39   :  { %3339 = vst [vmem:[%s6066_s6 + $0xd0] sm:$0xff] %v3243_v39  ;;  %v4514_v60 = vadd.f32 %v4513_v18, %v4512_v44 }
 0xd3a   :  { %v4515_v36 = vpop.f32.mrf.mxu1 }
 0xd3b   :  { %v3244_v42 = vmax.f32 %v4514_v60, 0.0 }
 0xd3c   :  { %v4516_v25 = vpop.f32.mrf.mxu1 }
 0xd3d   :  { %3340 = vst [vmem:[%s6066_s6 + $0xd8] sm:$0xff] %v3244_v42  ;;  %v4517_v45 = vadd.f32 %v4516_v25, %v4515_v36 }
 0xd3e   :  { %v4518_v49 = vpop.f32.mrf.mxu1 }
 0xd3f   :  { %v3245_v59 = vmax.f32 %v4517_v45, 0.0 }
 0xd40   :  { %v4519_v40 = vpop.f32.mrf.mxu1 }
 0xd41   :  { %3341 = vst [vmem:[%s6066_s6 + $0xe0] sm:$0xff] %v3245_v59  ;;  %v4520_v26 = vadd.f32 %v4519_v40, %v4518_v49 }
 0xd42   :  { %v4521_v61 = vpop.f32.mrf.mxu1 }
 0xd43   :  { %v3246_v46 = vmax.f32 %v4520_v26, 0.0 }
 0xd44   :  { %v4522_v33 = vpop.f32.mrf.mxu1 }
 0xd45   :  { %3342 = vst [vmem:[%s6066_s6 + $0xe8] sm:$0xff] %v3246_v46  ;;  %v4523_v43 = vadd.f32 %v4522_v33, %v4521_v61 }
 0xd46   :  { %v4524_v24 = vpop.f32.mrf.mxu1 }
 0xd47   :  { %v3247_v62 = vmax.f32 %v4523_v43, 0.0 }
 0xd48   :  { %v4525_v56 = vpop.f32.mrf.mxu1 }
 0xd49   :  { %3343 = vst [vmem:[%s6066_s6 + $0xf0] sm:$0xff] %v3247_v62  ;;  %v4526_v58 = vadd.f32 %v4525_v56, %v4524_v24 }
 0xd4b   :  { %v3248_v63 = vmax.f32 %v4526_v58, 0.0 }
 0xd4d   :  { %3344 = vst [vmem:[%s6066_s6 + $0xf8] sm:$0xff] %v3248_v63 }
 0xd4e   :  { %3505 = vsyncmov [#allocation3] }
 0xd51   :  { %s3506_s11 = vpop.sfrf %3505 }
 0xd52   :  { %p3719_p0 = scmp.ne.s32.totalorder %s3506_s11, 0 }
 0xd54   :  { %3510 = shalt.err (%p3719_p0)  }

</bundles_post_ra>
